<compile_context>
chip_gen: v5e
topology: v5e:2x2
jax: 0.10.0
libtpu: 0.0.40
codegen_flags: <defaults>
</compile_context>

<pallas_src>
import jax
import jax.numpy as jnp
from jax.experimental import pallas as pl
from jax.experimental.pallas import tpu as pltpu

TEXT_DIM = 768                 # BERT-style last_hidden_state[:, 0]
IMG_DIM = 512                  # CLIP get_image_features
FUSED_DIM = TEXT_DIM + IMG_DIM # 1280 (module hardcodes 512 + 768)
HIDDEN = 512
HALF = HIDDEN // 2             # 256
FUSE_N = HIDDEN + HALF         # 768: [fusion layer0 | residual folded thru w4]
OUT_DIM = 2
OUT_PAD = 128                  # lane-dense padded output width
TB_CAP = 512                   # max batch tile (good on v5e/v6e/v7x)


# ---------------------------------------------------------------------------
# Pallas kernel: fusion MLP + folded residual + regressor head, fused in VMEM.
# ---------------------------------------------------------------------------
def _head_kernel(xt_ref, xi_ref,
                 wt_ref, wi_ref, b0_ref,          # fused [w1 | wr@w4], concat bias
                 w2_ref, b2_ref, w3_ref, b3_ref,
                 w4_ref, b4_ref, w5_ref, b5_ref,
                 out_ref):
    xt = xt_ref[...]                               # (TB, 768)  bf16
    xi = xi_ref[...]                               # (TB, 512)  bf16

    # First layer fused with the (w4-folded) residual: one N=768 MXU pass,
    # K split over the text / image row blocks (no HBM concat ever built).
    pre = (jnp.dot(xt, wt_ref[...], preferred_element_type=jnp.float32)
           + jnp.dot(xi, wi_ref[...], preferred_element_type=jnp.float32)
           + b0_ref[...])                          # (TB, 768) f32

    h = jnp.maximum(pre[:, :HIDDEN], 0.0)          # fusion Linear0 -> ReLU
    rproj = pre[:, HIDDEN:]                        # (TB, 256) residual @ w4

    # fusion Linear1 -> ReLU -> (Dropout=id) -> Linear2 -> ReLU -> (Dropout=id)
    h = jnp.dot(h.astype(jnp.bfloat16), w2_ref[...],
                preferred_element_type=jnp.float32) + b2_ref[...]
    h = jnp.maximum(h, 0.0)
    h = jnp.dot(h.astype(jnp.bfloat16), w3_ref[...],
                preferred_element_type=jnp.float32) + b3_ref[...]
    h = jnp.maximum(h, 0.0)

    # regressor Linear(512->256) with the folded residual added pre-ReLU:
    # relu(h @ w4 + (x@wr + br) @ w4 + b4)  ==  relu(h @ w4 + rproj + b4)
    g = jnp.dot(h.astype(jnp.bfloat16), w4_ref[...],
                preferred_element_type=jnp.float32) + rproj + b4_ref[...]
    g = jnp.maximum(g, 0.0)

    # (Dropout=id) -> Linear(256 -> 2, zero-padded to 128 for lane-dense store)
    y = jnp.dot(g.astype(jnp.bfloat16), w5_ref[...],
                preferred_element_type=jnp.float32) + b5_ref[...]

    out_ref[...] = y.astype(out_ref.dtype)         # lane-dense (TB, 128) bf16


# ---------------------------------------------------------------------------
# Core-aware batch-tile chooser.
# ---------------------------------------------------------------------------
def _choose_batch_tile(B):
    """Return (tb, padded_B).  Prefers: no wrapper-side padding (tb divides B),
    >= 2 grid steps when B >= 16 (keeps both v7x TensorCores busy), and tb as
    large as possible up to TB_CAP to amortize per-grid-step overhead."""
    if B < 16:
        return B, B                                 # single full-extent tile
    # largest multiple-of-8 divisor of B that is <= TB_CAP and leaves >= 2 steps
    for tb in range(min(TB_CAP, B // 2), 7, -1):
        if tb % 8 == 0 and B % tb == 0:
            return tb, B
    # no clean divisor: pad to a multiple of an 8-aligned tile (grid >= 2)
    tb = min(TB_CAP, 8 * pl.cdiv(pl.cdiv(B, 2), 8))
    return tb, pl.cdiv(B, tb) * tb


# ---------------------------------------------------------------------------
# Wrapper: batch-tiled pallas_call, weights pinned via constant index_maps.
# ---------------------------------------------------------------------------
def multimodal_head(text_feat, image_feat, params):
    B = text_feat.shape[0]
    xt = text_feat.astype(jnp.bfloat16)
    xi = image_feat.astype(jnp.bfloat16)

    tb, Bp = _choose_batch_tile(B)
    if Bp != B:
        xt = jnp.pad(xt, ((0, Bp - B), (0, 0)))
        xi = jnp.pad(xi, ((0, Bp - B), (0, 0)))

    grid = (Bp // tb,)
    const = lambda i: (0, 0)                        # weights: same block every step
    in_specs = [
        pl.BlockSpec((tb, TEXT_DIM), lambda i: (i, 0)),
        pl.BlockSpec((tb, IMG_DIM), lambda i: (i, 0)),
        pl.BlockSpec((TEXT_DIM, FUSE_N), const),
        pl.BlockSpec((IMG_DIM, FUSE_N), const),
        pl.BlockSpec((1, FUSE_N), const),
        pl.BlockSpec((HIDDEN, HIDDEN), const),
        pl.BlockSpec((1, HIDDEN), const),
        pl.BlockSpec((HIDDEN, HIDDEN), const),
        pl.BlockSpec((1, HIDDEN), const),
        pl.BlockSpec((HIDDEN, HALF), const),
        pl.BlockSpec((1, HALF), const),
        pl.BlockSpec((HALF, OUT_PAD), const),
        pl.BlockSpec((1, OUT_PAD), const),
    ]
    out_spec = pl.BlockSpec((tb, OUT_PAD), lambda i: (i, 0))

    out = pl.pallas_call(
        _head_kernel,
        out_shape=jax.ShapeDtypeStruct((Bp, OUT_PAD), jnp.bfloat16),
        grid_spec=pltpu.PrefetchScalarGridSpec(
            num_scalar_prefetch=0,
            grid=grid,
            in_specs=in_specs,
            out_specs=out_spec,
        ),
        compiler_params=pltpu.CompilerParams(
            dimension_semantics=("parallel",),      # batch tiles shard over TCs
            vmem_limit_bytes=48 << 20,              # ample headroom, even on v7x
        ),
    )(xt, xi,
      params["wt"], params["wi"], params["b0"],
      params["w2"], params["b2"], params["w3"], params["b3"],
      params["w4"], params["b4"], params["w5"], params["b5"])

    return out[:B, :OUT_DIM].astype(jnp.float32)


# ---------------------------------------------------------------------------
# Synthetic encoder stand-ins (plain JAX glue).
# TODO(synk): real text_encoder / image_encoder are external pretrained
# transformer models and are not translated; these deterministic stand-ins
# only reproduce the output shapes (B, 768) and (B, 512).
# ---------------------------------------------------------------------------
def synthetic_text_encoder(input_ids, attention_mask, emb_table):
    last_hidden_state = emb_table[input_ids]        # (B, S, 768)
    del attention_mask
    return last_hidden_state[:, 0]                  # (B, 768) CLS feature


def synthetic_image_encoder(pixel_values, proj_w, proj_b):
    pooled = jnp.mean(pixel_values, axis=(2, 3))    # NCHW -> (B, C) global avg pool
    return pooled @ proj_w + proj_b                 # (B, 512)


# ---------------------------------------------------------------------------
# Parameter construction (deterministic).  Matmul weights bf16, biases f32.
# Returns (kernel_params, ref_params) — ref_params keeps the original unfolded
# f32 weights for the pure-JAX correctness reference.
# ---------------------------------------------------------------------------
def make_params(key):
    ks = jax.random.split(key, 9)

    def lin(k, din, dout, scale=0.02):
        kw, kb = jax.random.split(k)
        w = jax.random.normal(kw, (din, dout), jnp.float32) * scale
        b = jax.random.normal(kb, (1, dout), jnp.float32) * scale
        return w, b

    w1, b1 = lin(ks[0], FUSED_DIM, HIDDEN)
    w2, b2 = lin(ks[1], HIDDEN, HIDDEN)
    w3, b3 = lin(ks[2], HIDDEN, HIDDEN)
    wr, br = lin(ks[3], FUSED_DIM, HIDDEN)
    w4, b4 = lin(ks[4], HIDDEN, HALF)
    w5, b5 = lin(ks[5], HALF, OUT_DIM)

    # Fold the residual Linear through the regressor's first layer (exact in
    # f32 math): x@wr + br contributes x@(wr@w4) + (br@w4) inside the w4 layer.
    wr_f = wr @ w4                                  # (1280, 256)
    br_f = br @ w4                                  # (1, 256)

    # Fuse fusion[0] and the folded residual along N (512 + 256 = 768), then
    # split by K rows (text / image) so the (B, 1280) concat is never built.
    w0 = jnp.concatenate([w1, wr_f], axis=1)        # (1280, 768)
    b0 = jnp.concatenate([b1, br_f], axis=1)        # (1, 768)

    params = {
        "wt": w0[:TEXT_DIM].astype(jnp.bfloat16),   # (768, 768)
        "wi": w0[TEXT_DIM:].astype(jnp.bfloat16),   # (512, 768)
        "b0": b0,                                   # (1, 768) f32
        "w2": w2.astype(jnp.bfloat16), "b2": b2,
        "w3": w3.astype(jnp.bfloat16), "b3": b3,
        "w4": w4.astype(jnp.bfloat16), "b4": b4,
        # lane-dense pad of the tiny head: (256, 2) -> (256, 128)
        "w5": jnp.pad(w5, ((0, 0), (0, OUT_PAD - OUT_DIM))).astype(jnp.bfloat16),
        "b5": jnp.pad(b5, ((0, 0), (0, OUT_PAD - OUT_DIM))),
        # synthetic encoder params (glue, outside the kernel)
        "emb_table": jax.random.normal(ks[6], (1000, TEXT_DIM), jnp.float32),
        "img_proj_w": jax.random.normal(ks[7], (3, IMG_DIM), jnp.float32) * 0.5,
        "img_proj_b": jax.random.normal(ks[8], (1, IMG_DIM), jnp.float32) * 0.02,
    }
    ref = {"w1": w1, "b1": b1, "w2": w2, "b2": b2, "w3": w3, "b3": b3,
           "wr": wr, "br": br, "w4": w4, "b4": b4, "w5": w5, "b5": b5}
    return params, ref


def multimodal_regressor_forward(params, input_ids, attention_mask, pixel_values):
    text_feat = synthetic_text_encoder(input_ids, attention_mask, params["emb_table"])
    image_feat = synthetic_image_encoder(pixel_values, params["img_proj_w"],
                                         params["img_proj_b"])
    return multimodal_head(text_feat, image_feat, params)        # (B, 2)


# ---------------------------------------------------------------------------
# Pure-JAX reference: original (un-folded, un-fused) module math in f32.
# ---------------------------------------------------------------------------
def _ref_head(text_feat, image_feat, r):
    x = jnp.concatenate([text_feat, image_feat], axis=1).astype(jnp.float32)
    h = jnp.maximum(x @ r["w1"] + r["b1"], 0.0)
    h = jnp.maximum(h @ r["w2"] + r["b2"], 0.0)
    h = jnp.maximum(h @ r["w3"] + r["b3"], 0.0)
    z = h + (x @ r["wr"] + r["br"])                 # fusion(x) + residual(x)
    g = jnp.maximum(z @ r["w4"] + r["b4"], 0.0)
    return g @ r["w5"] + r["b5"]                    # (B, 2)


if __name__ == "__main__":
    key = jax.random.PRNGKey(0)
    kp, k_ids, k_pix, k_t2, k_i2 = jax.random.split(key, 5)

    params, ref_params = make_params(kp)

    # --- small end-to-end example (matches the module's expected inputs) ----
    B, S = 2, 8
    input_ids = jax.random.randint(k_ids, (B, S), 0, 1000, dtype=jnp.int32)
    attention_mask = jnp.ones((B, S), dtype=jnp.int32)
    pixel_values = jax.random.normal(k_pix, (B, 3, 16, 16), jnp.float32)

    out = multimodal_regressor_forward(params, input_ids, attention_mask, pixel_values)
    out = jax.block_until_ready(out)
    assert out.shape == (B, OUT_DIM)

    text_feat = synthetic_text_encoder(input_ids, attention_mask, params["emb_table"])
    image_feat = synthetic_image_encoder(pixel_values, params["img_proj_w"],
                                         params["img_proj_b"])
    ref = _ref_head(text_feat, image_feat, ref_params)
    assert jnp.allclose(out, ref, atol=2e-2, rtol=2e-2), (out, ref)

    # --- multi-tile path (grid >= 2, divisor tile => no padding) ------------
    B2 = 48
    tf2 = jax.random.normal(k_t2, (B2, TEXT_DIM), jnp.float32)
    if2 = jax.random.normal(k_i2, (B2, IMG_DIM), jnp.float32) * 0.1
    out2 = jax.block_until_ready(multimodal_head(tf2, if2, params))
    ref2 = _ref_head(tf2, if2, ref_params)
    assert out2.shape == (B2, OUT_DIM)
    assert jnp.allclose(out2, ref2, atol=2e-2, rtol=2e-2), (out2, ref2)

    print("KERNEL_OK")
</pallas_src>

<mosaic_0001>
module attributes {stable_mosaic.version = 11 : i64} {
  func.func @_head_kernel(%arg0: i32, %arg1: memref<2x768xbf16, #tpu.memory_space<vmem>>, %arg2: memref<2x512xbf16, #tpu.memory_space<vmem>>, %arg3: memref<768x768xbf16, #tpu.memory_space<vmem>>, %arg4: memref<512x768xbf16, #tpu.memory_space<vmem>>, %arg5: memref<1x768xf32, #tpu.memory_space<vmem>>, %arg6: memref<512x512xbf16, #tpu.memory_space<vmem>>, %arg7: memref<1x512xf32, #tpu.memory_space<vmem>>, %arg8: memref<512x512xbf16, #tpu.memory_space<vmem>>, %arg9: memref<1x512xf32, #tpu.memory_space<vmem>>, %arg10: memref<512x256xbf16, #tpu.memory_space<vmem>>, %arg11: memref<1x256xf32, #tpu.memory_space<vmem>>, %arg12: memref<256x128xbf16, #tpu.memory_space<vmem>>, %arg13: memref<1x128xf32, #tpu.memory_space<vmem>>, %arg14: memref<2x128xbf16, #tpu.memory_space<vmem>>) attributes {dimension_semantics = [#tpu.dimension_semantics<parallel>], iteration_bounds = array<i64: 1>, scalar_prefetch = 0 : i64, scratch_operands = 0 : i64, tpu.core_type = #tpu.core_type<tc>, window_params = [{transform_indices = @transform_0, window_bounds = array<i64: 2, 768>}, {transform_indices = @transform_1, window_bounds = array<i64: 2, 512>}, {pipeline_mode = #tpu.pipeline_mode<synchronous>, transform_indices = @transform_2, window_bounds = array<i64: 768, 768>}, {pipeline_mode = #tpu.pipeline_mode<synchronous>, transform_indices = @transform_3, window_bounds = array<i64: 512, 768>}, {pipeline_mode = #tpu.pipeline_mode<synchronous>, transform_indices = @transform_4, window_bounds = array<i64: 1, 768>}, {pipeline_mode = #tpu.pipeline_mode<synchronous>, transform_indices = @transform_5, window_bounds = array<i64: 512, 512>}, {pipeline_mode = #tpu.pipeline_mode<synchronous>, transform_indices = @transform_6, window_bounds = array<i64: 1, 512>}, {pipeline_mode = #tpu.pipeline_mode<synchronous>, transform_indices = @transform_7, window_bounds = array<i64: 512, 512>}, {pipeline_mode = #tpu.pipeline_mode<synchronous>, transform_indices = @transform_8, window_bounds = array<i64: 1, 512>}, {pipeline_mode = #tpu.pipeline_mode<synchronous>, transform_indices = @transform_9, window_bounds = array<i64: 512, 256>}, {pipeline_mode = #tpu.pipeline_mode<synchronous>, transform_indices = @transform_10, window_bounds = array<i64: 1, 256>}, {pipeline_mode = #tpu.pipeline_mode<synchronous>, transform_indices = @transform_11, window_bounds = array<i64: 256, 128>}, {pipeline_mode = #tpu.pipeline_mode<synchronous>, transform_indices = @transform_12, window_bounds = array<i64: 1, 128>}, {transform_indices = @transform_13, window_bounds = array<i64: 2, 128>}]} {
    %c0 = arith.constant 0 : index
    %c0_0 = arith.constant 0 : index
    %0 = vector.load %arg1[%c0, %c0_0] : memref<2x768xbf16, #tpu.memory_space<vmem>>, vector<2x768xbf16>
    %c0_1 = arith.constant 0 : index
    %c0_2 = arith.constant 0 : index
    %1 = vector.load %arg2[%c0_1, %c0_2] : memref<2x512xbf16, #tpu.memory_space<vmem>>, vector<2x512xbf16>
    %c0_3 = arith.constant 0 : index
    %c0_4 = arith.constant 0 : index
    %2 = vector.load %arg3[%c0_3, %c0_4] : memref<768x768xbf16, #tpu.memory_space<vmem>>, vector<768x768xbf16>
    %cst = arith.constant dense<0.000000e+00> : vector<2x768xf32>
    %3 = tpu.matmul %0, %2, %cst {dimension_numbers = #tpu.dot_dimension_numbers<[1], [0], [0], [1], [0, 0, 1, 1], [], []>} : vector<2x768xbf16>, vector<768x768xbf16>, vector<2x768xf32> -> vector<2x768xf32>
    %c0_5 = arith.constant 0 : index
    %c0_6 = arith.constant 0 : index
    %4 = vector.load %arg4[%c0_5, %c0_6] : memref<512x768xbf16, #tpu.memory_space<vmem>>, vector<512x768xbf16>
    %cst_7 = arith.constant dense<0.000000e+00> : vector<2x768xf32>
    %5 = tpu.matmul %1, %4, %cst_7 {dimension_numbers = #tpu.dot_dimension_numbers<[1], [0], [0], [1], [0, 0, 1, 1], [], []>} : vector<2x512xbf16>, vector<512x768xbf16>, vector<2x768xf32> -> vector<2x768xf32>
    %6 = arith.addf %3, %5 : vector<2x768xf32>
    %c0_8 = arith.constant 0 : index
    %c0_9 = arith.constant 0 : index
    %7 = vector.load %arg5[%c0_8, %c0_9] : memref<1x768xf32, #tpu.memory_space<vmem>>, vector<1x768xf32>
    %8 = vector.broadcast %7 : vector<1x768xf32> to vector<2x768xf32>
    %9 = arith.addf %6, %8 : vector<2x768xf32>
    %10 = vector.extract_strided_slice %9 {offsets = [0, 0], sizes = [2, 512], strides = [1, 1]} : vector<2x768xf32> to vector<2x512xf32>
    %cst_10 = arith.constant 0.000000e+00 : f32
    %11 = vector.broadcast %cst_10 : f32 to vector<2x512xf32>
    %12 = arith.maximumf %10, %11 : vector<2x512xf32>
    %13 = vector.extract_strided_slice %9 {offsets = [0, 512], sizes = [2, 256], strides = [1, 1]} : vector<2x768xf32> to vector<2x256xf32>
    %14 = arith.truncf %12 : vector<2x512xf32> to vector<2x512xbf16>
    %c0_11 = arith.constant 0 : index
    %c0_12 = arith.constant 0 : index
    %15 = vector.load %arg6[%c0_11, %c0_12] : memref<512x512xbf16, #tpu.memory_space<vmem>>, vector<512x512xbf16>
    %cst_13 = arith.constant dense<0.000000e+00> : vector<2x512xf32>
    %16 = tpu.matmul %14, %15, %cst_13 {dimension_numbers = #tpu.dot_dimension_numbers<[1], [0], [0], [1], [0, 0, 1, 1], [], []>} : vector<2x512xbf16>, vector<512x512xbf16>, vector<2x512xf32> -> vector<2x512xf32>
    %c0_14 = arith.constant 0 : index
    %c0_15 = arith.constant 0 : index
    %17 = vector.load %arg7[%c0_14, %c0_15] : memref<1x512xf32, #tpu.memory_space<vmem>>, vector<1x512xf32>
    %18 = vector.broadcast %17 : vector<1x512xf32> to vector<2x512xf32>
    %19 = arith.addf %16, %18 : vector<2x512xf32>
    %cst_16 = arith.constant 0.000000e+00 : f32
    %20 = vector.broadcast %cst_16 : f32 to vector<2x512xf32>
    %21 = arith.maximumf %19, %20 : vector<2x512xf32>
    %22 = arith.truncf %21 : vector<2x512xf32> to vector<2x512xbf16>
    %c0_17 = arith.constant 0 : index
    %c0_18 = arith.constant 0 : index
    %23 = vector.load %arg8[%c0_17, %c0_18] : memref<512x512xbf16, #tpu.memory_space<vmem>>, vector<512x512xbf16>
    %cst_19 = arith.constant dense<0.000000e+00> : vector<2x512xf32>
    %24 = tpu.matmul %22, %23, %cst_19 {dimension_numbers = #tpu.dot_dimension_numbers<[1], [0], [0], [1], [0, 0, 1, 1], [], []>} : vector<2x512xbf16>, vector<512x512xbf16>, vector<2x512xf32> -> vector<2x512xf32>
    %c0_20 = arith.constant 0 : index
    %c0_21 = arith.constant 0 : index
    %25 = vector.load %arg9[%c0_20, %c0_21] : memref<1x512xf32, #tpu.memory_space<vmem>>, vector<1x512xf32>
    %26 = vector.broadcast %25 : vector<1x512xf32> to vector<2x512xf32>
    %27 = arith.addf %24, %26 : vector<2x512xf32>
    %cst_22 = arith.constant 0.000000e+00 : f32
    %28 = vector.broadcast %cst_22 : f32 to vector<2x512xf32>
    %29 = arith.maximumf %27, %28 : vector<2x512xf32>
    %30 = arith.truncf %29 : vector<2x512xf32> to vector<2x512xbf16>
    %c0_23 = arith.constant 0 : index
    %c0_24 = arith.constant 0 : index
    %31 = vector.load %arg10[%c0_23, %c0_24] : memref<512x256xbf16, #tpu.memory_space<vmem>>, vector<512x256xbf16>
    %cst_25 = arith.constant dense<0.000000e+00> : vector<2x256xf32>
    %32 = tpu.matmul %30, %31, %cst_25 {dimension_numbers = #tpu.dot_dimension_numbers<[1], [0], [0], [1], [0, 0, 1, 1], [], []>} : vector<2x512xbf16>, vector<512x256xbf16>, vector<2x256xf32> -> vector<2x256xf32>
    %33 = arith.addf %32, %13 : vector<2x256xf32>
    %c0_26 = arith.constant 0 : index
    %c0_27 = arith.constant 0 : index
    %34 = vector.load %arg11[%c0_26, %c0_27] : memref<1x256xf32, #tpu.memory_space<vmem>>, vector<1x256xf32>
    %35 = vector.broadcast %34 : vector<1x256xf32> to vector<2x256xf32>
    %36 = arith.addf %33, %35 : vector<2x256xf32>
    %cst_28 = arith.constant 0.000000e+00 : f32
    %37 = vector.broadcast %cst_28 : f32 to vector<2x256xf32>
    %38 = arith.maximumf %36, %37 : vector<2x256xf32>
    %39 = arith.truncf %38 : vector<2x256xf32> to vector<2x256xbf16>
    %c0_29 = arith.constant 0 : index
    %c0_30 = arith.constant 0 : index
    %40 = vector.load %arg12[%c0_29, %c0_30] : memref<256x128xbf16, #tpu.memory_space<vmem>>, vector<256x128xbf16>
    %cst_31 = arith.constant dense<0.000000e+00> : vector<2x128xf32>
    %41 = tpu.matmul %39, %40, %cst_31 {dimension_numbers = #tpu.dot_dimension_numbers<[1], [0], [0], [1], [0, 0, 1, 1], [], []>} : vector<2x256xbf16>, vector<256x128xbf16>, vector<2x128xf32> -> vector<2x128xf32>
    %c0_32 = arith.constant 0 : index
    %c0_33 = arith.constant 0 : index
    %42 = vector.load %arg13[%c0_32, %c0_33] : memref<1x128xf32, #tpu.memory_space<vmem>>, vector<1x128xf32>
    %43 = vector.broadcast %42 : vector<1x128xf32> to vector<2x128xf32>
    %44 = arith.addf %41, %43 : vector<2x128xf32>
    %45 = arith.truncf %44 : vector<2x128xf32> to vector<2x128xbf16>
    %c0_34 = arith.constant 0 : index
    %c0_35 = arith.constant 0 : index
    %46 = vector.load %arg14[%c0_34, %c0_35] : memref<2x128xbf16, #tpu.memory_space<vmem>>, vector<2x128xbf16>
    tpu.vector_store %arg14[%c0_34, %c0_35], %45 {strides = array<i32>} : memref<2x128xbf16, #tpu.memory_space<vmem>>, vector<2x128xbf16>,
    return
  }
  func.func @transform_0(%arg0: i32) -> (i32, i32) {
    %c0_i32 = arith.constant 0 : i32
    %c0_i32_0 = arith.constant 0 : i32
    return %arg0, %c0_i32 : i32, i32
  }
  func.func @transform_1(%arg0: i32) -> (i32, i32) {
    %c0_i32 = arith.constant 0 : i32
    %c0_i32_0 = arith.constant 0 : i32
    return %arg0, %c0_i32 : i32, i32
  }
  func.func @transform_2(%arg0: i32) -> (i32, i32) {
    %c0_i32 = arith.constant 0 : i32
    %c0_i32_0 = arith.constant 0 : i32
    %c0_i32_1 = arith.constant 0 : i32
    return %c0_i32, %c0_i32_0 : i32, i32
  }
  func.func @transform_3(%arg0: i32) -> (i32, i32) {
    %c0_i32 = arith.constant 0 : i32
    %c0_i32_0 = arith.constant 0 : i32
    %c0_i32_1 = arith.constant 0 : i32
    return %c0_i32, %c0_i32_0 : i32, i32
  }
  func.func @transform_4(%arg0: i32) -> (i32, i32) {
    %c0_i32 = arith.constant 0 : i32
    %c0_i32_0 = arith.constant 0 : i32
    %c0_i32_1 = arith.constant 0 : i32
    return %c0_i32, %c0_i32_0 : i32, i32
  }
  func.func @transform_5(%arg0: i32) -> (i32, i32) {
    %c0_i32 = arith.constant 0 : i32
    %c0_i32_0 = arith.constant 0 : i32
    %c0_i32_1 = arith.constant 0 : i32
    return %c0_i32, %c0_i32_0 : i32, i32
  }
  func.func @transform_6(%arg0: i32) -> (i32, i32) {
    %c0_i32 = arith.constant 0 : i32
    %c0_i32_0 = arith.constant 0 : i32
    %c0_i32_1 = arith.constant 0 : i32
    return %c0_i32, %c0_i32_0 : i32, i32
  }
  func.func @transform_7(%arg0: i32) -> (i32, i32) {
    %c0_i32 = arith.constant 0 : i32
    %c0_i32_0 = arith.constant 0 : i32
    %c0_i32_1 = arith.constant 0 : i32
    return %c0_i32, %c0_i32_0 : i32, i32
  }
  func.func @transform_8(%arg0: i32) -> (i32, i32) {
    %c0_i32 = arith.constant 0 : i32
    %c0_i32_0 = arith.constant 0 : i32
    %c0_i32_1 = arith.constant 0 : i32
    return %c0_i32, %c0_i32_0 : i32, i32
  }
  func.func @transform_9(%arg0: i32) -> (i32, i32) {
    %c0_i32 = arith.constant 0 : i32
    %c0_i32_0 = arith.constant 0 : i32
    %c0_i32_1 = arith.constant 0 : i32
    return %c0_i32, %c0_i32_0 : i32, i32
  }
  func.func @transform_10(%arg0: i32) -> (i32, i32) {
    %c0_i32 = arith.constant 0 : i32
    %c0_i32_0 = arith.constant 0 : i32
    %c0_i32_1 = arith.constant 0 : i32
    return %c0_i32, %c0_i32_0 : i32, i32
  }
  func.func @transform_11(%arg0: i32) -> (i32, i32) {
    %c0_i32 = arith.constant 0 : i32
    %c0_i32_0 = arith.constant 0 : i32
    %c0_i32_1 = arith.constant 0 : i32
    return %c0_i32, %c0_i32_0 : i32, i32
  }
  func.func @transform_12(%arg0: i32) -> (i32, i32) {
    %c0_i32 = arith.constant 0 : i32
    %c0_i32_0 = arith.constant 0 : i32
    %c0_i32_1 = arith.constant 0 : i32
    return %c0_i32, %c0_i32_0 : i32, i32
  }
  func.func @transform_13(%arg0: i32) -> (i32, i32) {
    %c0_i32 = arith.constant 0 : i32
    %c0_i32_0 = arith.constant 0 : i32
    return %arg0, %c0_i32 : i32, i32
  }
}

</mosaic_0001>

<bundles_post_ra>
// kernel: tpu_custom_call.1
= control target key start
LH: loop header
LB: loop body
LE: loop exit
PB: predicated region body
PF: predicated region fallthrough
CT: control target
= control target key end

     0   :  { %18 = vsyncpa [#allocation3], 0  ;;  %s11480_s0 = inlined_call_operand.hbm [shape: bf16[2,768], index: 0, kind: input, shape index: {}]   ;;  %s11481_s1 = inlined_call_operand.hbm [shape: bf16[2,512], index: 1, kind: input, shape index: {}]   ;;  %s11482_s2 = inlined_call_operand.hbm [shape: bf16[768,768], index: 2, kind: input, shape index: {}]   ;;  %s11483_s3 = inlined_call_operand.hbm [shape: bf16[512,768], index: 3, kind: input, shape index: {}]   ;;  %s11484_s4 = inlined_call_operand.hbm [shape: f32[1,768], index: 4, kind: input, shape index: {}]   ;;  %s11485_s5 = inlined_call_operand.hbm [shape: bf16[512,512], index: 5, kind: input, shape index: {}]   ;;  %s11486_s6 = inlined_call_operand.hbm [shape: f32[1,512], index: 6, kind: input, shape index: {}]   ;;  %s11487_s7 = inlined_call_operand.hbm [shape: bf16[512,512], index: 7, kind: input, shape index: {}]   ;;  %s11488_s8 = inlined_call_operand.hbm [shape: f32[1,512], index: 8, kind: input, shape index: {}]   ;;  %s11489_s9 = inlined_call_operand.hbm [shape: bf16[512,256], index: 9, kind: input, shape index: {}]   ;;  %s11490_s10 = inlined_call_operand.hbm [shape: f32[1,256], index: 10, kind: input, shape index: {}]   ;;  %s11491_s11 = inlined_call_operand.hbm [shape: bf16[256,128], index: 11, kind: input, shape index: {}]   ;;  %s11492_s12 = inlined_call_operand.hbm [shape: f32[1,128], index: 12, kind: input, shape index: {}]   ;;  %s11493_s13 = inlined_call_operand.hbm [shape: bf16[2,128], index: 13, kind: output, shape index: {}]  }
   0x1   :  { %19 = vsyncpa [#allocation6], 0 }
   0x2   :  { %20 = vsyncpa [#allocation9], 0 }
   0x3   :  { %21 = vsyncpa [#allocation12], 0 }
   0x4   :  { %22 = vsyncpa [#allocation15], 0 }
   0x5   :  { %23 = vsyncpa [#allocation18], 0 }
   0x6   :  { %24 = vsyncpa [#allocation21], 0  ;;  %s42_s27 = sshll.u32 %s11481_s1, 4  ;;  %s43_s27 = int_to_ptr.hbm [resolvable:$true] %s42_s27 }
   0x7   :  { %25 = vsyncpa [#allocation4], 0  ;;  %s11080_s28 = smov [#allocation5]   ;;  %s65_s15 = sshll.u32 %s11483_s3, 4  ;;  %s66_s15 = int_to_ptr.hbm [resolvable:$true] %s65_s15 }
   0x8   :  { %s44_s29 = sshll.u32 %s11080_s28, 4  ;;  %s11081_s16 = smov [#allocation8]   ;;  %s45_s29 = int_to_ptr.vmem [resolvable:$true] %s44_s29 }
   0x9   :  { %47 = dma.hbm_to_vmem [thread:$0]  %s43_s27, 64, %s45_s29, [#allocation6]  }
   0xa   :  { %s67_s17 = sshll.u32 %s11081_s16, 4  ;;  %s89_s20 = sshll.u32 %s11485_s5, 4  ;;  %s68_s17 = int_to_ptr.vmem [resolvable:$true] %s67_s17  ;;  %s90_s20 = int_to_ptr.hbm [resolvable:$true] %s89_s20 }
   0xb   :  { %s11082_s1 = smov 384   ;;  %s11083_s21 = smov 24  }
   0xc   :  { %73 = dma.hbm_to_vmem [thread:$0]  %s66_s15, 24576, %s68_s17, [#allocation9], %s11082_s1, %s11082_s1, %s11083_s21  }
   0xd   :  { %s11084_s22 = smov [#allocation11]   ;;  %s113_s25 = sshll.u32 %s11487_s7, 4  ;;  %s114_s25 = int_to_ptr.hbm [resolvable:$true] %s113_s25 }
   0xe   :  { %s91_s23 = sshll.u32 %s11084_s22, 4  ;;  %s11085_s26 = smov 256   ;;  %s92_s23 = int_to_ptr.vmem [resolvable:$true] %s91_s23 }
   0xf   :  { %s11086_s27 = smov 16   ;;  %s11087_s5 = smov [#allocation14]  }
  0x10   :  { %97 = dma.hbm_to_vmem [thread:$0]  %s90_s20, 16384, %s92_s23, [#allocation12], %s11085_s26, %s11085_s26, %s11086_s27  }
  0x11   :  { %s115_s28 = sshll.u32 %s11087_s5, 4  ;;  %s137_s14 = sshll.u32 %s11489_s9, 4  ;;  %s116_s28 = int_to_ptr.vmem [resolvable:$true] %s115_s28  ;;  %s138_s14 = int_to_ptr.hbm [resolvable:$true] %s137_s14 }
  0x12   :  { %121 = dma.hbm_to_vmem [thread:$0]  %s114_s25, 16384, %s116_s28, [#allocation15], %s11085_s26, %s11085_s26, %s11086_s27  }
  0x13   :  { %s11088_s15 = smov [#allocation17]   ;;  %s161_s7 = sshll.u32 %s11491_s11, 4  ;;  %s162_s7 = int_to_ptr.hbm [resolvable:$true] %s161_s7 }
  0x14   :  { %s139_s16 = sshll.u32 %s11088_s15, 4  ;;  %s11089_s19 = smov 128   ;;  %s140_s16 = int_to_ptr.vmem [resolvable:$true] %s139_s16 }
  0x15   :  { %s11090_s22 = smov 8   ;;  %s11091_s20 = smov [#allocation20]  }
  0x16   :  { %145 = dma.hbm_to_vmem [thread:$0]  %s138_s14, 8192, %s140_s16, [#allocation18], %s11089_s19, %s11089_s19, %s11090_s22  }
  0x17   :  { %s163_s23 = sshll.u32 %s11091_s20, 4  ;;  %s11092_s24 = smov 64   ;;  %s164_s23 = int_to_ptr.vmem [resolvable:$true] %s163_s23 }
  0x18   :  { %s11093_s3 = smov 4   ;;  %s31_s25 = sshll.u32 %s11480_s0, 4  ;;  %s32_s25 = int_to_ptr.hbm [resolvable:$true] %s31_s25 }
  0x19   :  { %169 = dma.hbm_to_vmem [thread:$0]  %s162_s7, 2048, %s164_s23, [#allocation21], %s11092_s24, %s11092_s24, %s11093_s3  }
  0x1a   :  { %s11094_s26 = smov [#allocation2]   ;;  %s52_s29 = sshll.u32 %s11482_s2, 4  ;;  %s53_s29 = int_to_ptr.hbm [resolvable:$true] %s52_s29 }
  0x1b   :  { %s33_s27 = sshll.u32 %s11094_s26, 4  ;;  %s11095_s30 = smov [#allocation7]   ;;  %s34_s27 = int_to_ptr.vmem [resolvable:$true] %s33_s27 }
  0x1c   :  { %36 = dma.hbm_to_vmem [thread:$0]  %s32_s25, 96, %s34_s27, [#allocation3]  }
  0x1d   :  { %s54_s14 = sshll.u32 %s11095_s30, 4  ;;  %s79_s17 = sshll.u32 %s11484_s4, 4  ;;  %s55_s14 = int_to_ptr.vmem [resolvable:$true] %s54_s14  ;;  %s80_s17 = int_to_ptr.hbm [resolvable:$true] %s79_s17 }
  0x1e   :  { %60 = dma.hbm_to_vmem [thread:$0]  %s53_s29, 36864, %s55_s14, [#allocation6], %s11082_s1, %s11082_s1, %s11083_s21  }
  0x1f   :  { %s103_s7 = sshll.u32 %s11486_s6, 4  ;;  %s11096_s19 = smov [#allocation10]   ;;  %s104_s7 = int_to_ptr.hbm [resolvable:$true] %s103_s7 }
  0x20   :  { %s81_s2 = sshll.u32 %s11096_s19, 4  ;;  %s11097_s22 = smov [#allocation13]   ;;  %s82_s2 = int_to_ptr.vmem [resolvable:$true] %s81_s2 }
  0x21   :  { %84 = dma.hbm_to_vmem [thread:$0]  %s80_s17, 96, %s82_s2, [#allocation9]  }
  0x22   :  { %s105_s20 = sshll.u32 %s11097_s22, 4  ;;  %s127_s4 = sshll.u32 %s11488_s8, 4  ;;  %s106_s20 = int_to_ptr.vmem [resolvable:$true] %s105_s20  ;;  %s128_s4 = int_to_ptr.hbm [resolvable:$true] %s127_s4 }
  0x23   :  { %108 = dma.hbm_to_vmem [thread:$0]  %s104_s7, 64, %s106_s20, [#allocation12]  }
  0x24   :  { %s151_s21 = sshll.u32 %s11490_s10, 4  ;;  %s11098_s9 = smov [#allocation16]   ;;  %s152_s21 = int_to_ptr.hbm [resolvable:$true] %s151_s21 }
  0x25   :  { %s129_s6 = sshll.u32 %s11098_s9, 4  ;;  %s11099_s5 = smov [#allocation19]   ;;  %s130_s6 = int_to_ptr.vmem [resolvable:$true] %s129_s6 }
  0x26   :  { %132 = dma.hbm_to_vmem [thread:$0]  %s128_s4, 64, %s130_s6, [#allocation15]  }
  0x27   :  { %s153_s25 = sshll.u32 %s11099_s5, 4  ;;  %s175_s28 = sshll.u32 %s11492_s12, 4  ;;  %s154_s25 = int_to_ptr.vmem [resolvable:$true] %s153_s25  ;;  %s176_s28 = int_to_ptr.hbm [resolvable:$true] %s175_s28 }
  0x28   :  { %156 = dma.hbm_to_vmem [thread:$0]  %s152_s21, 32, %s154_s25, [#allocation18]  }
  0x29   :  { %s11100_s8 = smov [#allocation22]  }
  0x2a   :  { %s177_s11 = sshll.u32 %s11100_s8, 4  ;;  %s178_s11 = int_to_ptr.vmem [resolvable:$true] %s177_s11 }
  0x2b   :  { %180 = dma.hbm_to_vmem [thread:$0]  %s176_s28, 16, %s178_s11, [#allocation21]  }
  0x2c   :  { %11064 = dma.done.wait [#allocation3], 96  }
  0x2d   :  { %11065 = vsyncadd [#allocation3], 4294967200 }
  0x2e   :  { %11066 = dma.done.wait [#allocation6], 36928  }
  0x2f   :  { %11067 = vsyncadd [#allocation6], 4294930368 }
  0x30   :  { %11068 = dma.done.wait [#allocation9], 24672  }
  0x31   :  { %11069 = vsyncadd [#allocation9], 4294942624 }
  0x32   :  { %11070 = dma.done.wait [#allocation12], 16448  }
  0x33   :  { %11071 = vsyncadd [#allocation12], 4294950848 }
  0x34   :  { %11072 = dma.done.wait [#allocation15], 16448  }
  0x35   :  { %11073 = vsyncadd [#allocation15], 4294950848 }
  0x36   :  { %11074 = dma.done.wait [#allocation18], 8224  }
  0x37   :  { %11075 = vsyncadd [#allocation18], 4294959072 }
  0x38   :  { %11076 = dma.done.wait [#allocation21], 2064  }
  0x39   :  { %11077 = vsyncadd [#allocation21], 4294965232  ;;  %v6788_v0 = vld [vmem:[#allocation8 + $0x150] sm:$0xf]  ;;  %v10215_v1 = vld [vmem:[#allocation8 + $0x164] sm:$0xf0] }
  0x3a   :  { %v6980_v2 = vld [vmem:[#allocation8 + $0x2d0] sm:$0xf]  ;;  %v6789_v3 = vor.u32 %v10215_v1, %v6788_v0  ;;  %v10263_v4 = vld [vmem:[#allocation8 + $0x2e4] sm:$0xf0]  ;;  %v6764_v11 = vld [vmem:[#allocation8 + $0x120] sm:$0xf] }
  0x3b   :  { %v7172_v5 = vld [vmem:[#allocation8 + $0x450] sm:$0xf]  ;;  %v10311_v6 = vld [vmem:[#allocation8 + $0x464] sm:$0xf0]  ;;  %v6981_v7 = vor.u32 %v10263_v4, %v6980_v2  ;;  %v10209_v13 = vld [vmem:[#allocation8 + $0x134] sm:$0xf0] }
  0x3c   :  { %v7173_v8 = vor.u32 %v10311_v6, %v7172_v5  ;;  %v7364_v9 = vld [vmem:[#allocation8 + $0x5d0] sm:$0xf]  ;;  %v10359_v10 = vld [vmem:[#allocation8 + $0x5e4] sm:$0xf0]  ;;  %1685 = vmatpush.bf16.msra.mxu0 %v6789_v3  ;;  %v6956_v14 = vld [vmem:[#allocation8 + $0x2a0] sm:$0xf]  ;;  %v6765_v16 = vor.u32 %v10209_v13, %v6764_v11 }
  0x3d   :  { %v7365_v12 = vor.u32 %v10359_v10, %v7364_v9  ;;  %v10257_v15 = vld [vmem:[#allocation8 + $0x2b4] sm:$0xf0]  ;;  %1698 = vmatpush.bf16.msra.mxu1 %v6981_v7  ;;  %v7148_v18 = vld [vmem:[#allocation8 + $0x420] sm:$0xf]  ;;  %v6740_v23 = vld [vmem:[#allocation8 + $0xf0] sm:$0xf] }
  0x3e   :  { %1711 = vmatpush.bf16.msra.mxu2 %v7173_v8  ;;  %v6957_v17 = vor.u32 %v10257_v15, %v6956_v14  ;;  %v10305_v19 = vld [vmem:[#allocation8 + $0x434] sm:$0xf0]  ;;  %v7340_v20 = vld [vmem:[#allocation8 + $0x5a0] sm:$0xf]  ;;  %v10203_v24 = vld [vmem:[#allocation8 + $0x104] sm:$0xf0] }
  0x3f   :  { %1724 = vmatpush.bf16.msra.mxu3 %v7365_v12  ;;  %v7149_v21 = vor.u32 %v10305_v19, %v7148_v18  ;;  %v10353_v22 = vld [vmem:[#allocation8 + $0x5b4] sm:$0xf0]  ;;  %v6932_v26 = vld [vmem:[#allocation8 + $0x270] sm:$0xf]  ;;  %v10251_v27 = vld [vmem:[#allocation8 + $0x284] sm:$0xf0]  ;;  %v6741_v29 = vor.u32 %v10203_v24, %v6740_v23 }
  0x40   :  { %v7341_v25 = vor.u32 %v10353_v22, %v7340_v20  ;;  %v7124_v28 = vld [vmem:[#allocation8 + $0x3f0] sm:$0xf]  ;;  %1686 = vmatpush.bf16.msra.mxu0 %v6765_v16  ;;  %v10299_v30 = vld [vmem:[#allocation8 + $0x404] sm:$0xf0]  ;;  %v6933_v33 = vor.u32 %v10251_v27, %v6932_v26  ;;  %v6716_v35 = vld [vmem:[#allocation8 + $0xc0] sm:$0xf] }
  0x41   :  { %v7316_v31 = vld [vmem:[#allocation8 + $0x570] sm:$0xf]  ;;  %v10347_v32 = vld [vmem:[#allocation8 + $0x584] sm:$0xf0]  ;;  %1699 = vmatpush.bf16.msra.mxu1 %v6957_v17  ;;  %v7125_v34 = vor.u32 %v10299_v30, %v7124_v28  ;;  %v10197_v36 = vld [vmem:[#allocation8 + $0xd4] sm:$0xf0] }
  0x42   :  { %1712 = vmatpush.bf16.msra.mxu2 %v7149_v21  ;;  %v6908_v37 = vld [vmem:[#allocation8 + $0x240] sm:$0xf]  ;;  %v7317_v38 = vor.u32 %v10347_v32, %v7316_v31  ;;  %v10245_v39 = vld [vmem:[#allocation8 + $0x254] sm:$0xf0]  ;;  %v6717_v44 = vor.u32 %v10197_v36, %v6716_v35  ;;  %v6692_v47 = vld [vmem:[#allocation8 + $0x90] sm:$0xf] }
  0x43   :  { %1725 = vmatpush.bf16.msra.mxu3 %v7341_v25  ;;  %v7100_v40 = vld [vmem:[#allocation8 + $0x3c0] sm:$0xf]  ;;  %v10293_v41 = vld [vmem:[#allocation8 + $0x3d4] sm:$0xf0]  ;;  %v6909_v45 = vor.u32 %v10245_v39, %v6908_v37  ;;  %v10191_v48 = vld [vmem:[#allocation8 + $0xa4] sm:$0xf0] }
  0x44   :  { %v7292_v42 = vld [vmem:[#allocation8 + $0x540] sm:$0xf]  ;;  %v10341_v43 = vld [vmem:[#allocation8 + $0x554] sm:$0xf0]  ;;  %1687 = vmatpush.bf16.msra.mxu0 %v6741_v29  ;;  %v7101_v46 = vor.u32 %v10293_v41, %v7100_v40  ;;  %v6884_v49 = vld [vmem:[#allocation8 + $0x210] sm:$0xf]  ;;  %v6693_v56 = vor.u32 %v10191_v48, %v6692_v47 }
  0x45   :  { %1700 = vmatpush.bf16.msra.mxu1 %v6933_v33  ;;  %v7293_v50 = vor.u32 %v10341_v43, %v7292_v42  ;;  %v10239_v51 = vld [vmem:[#allocation8 + $0x224] sm:$0xf0]  ;;  %v7076_v52 = vld [vmem:[#allocation8 + $0x390] sm:$0xf]  ;;  %v6668_v59 = vld [vmem:[#allocation8 + $0x60] sm:$0xf] }
  0x46   :  { %1713 = vmatpush.bf16.msra.mxu2 %v7125_v34  ;;  %v10287_v53 = vld [vmem:[#allocation8 + $0x3a4] sm:$0xf0]  ;;  %v7268_v54 = vld [vmem:[#allocation8 + $0x510] sm:$0xf]  ;;  %v6885_v57 = vor.u32 %v10239_v51, %v6884_v49  ;;  %v10185_v60 = vld [vmem:[#allocation8 + $0x74] sm:$0xf0] }
  0x47   :  { %1726 = vmatpush.bf16.msra.mxu3 %v7317_v38  ;;  %v10335_v55 = vld [vmem:[#allocation8 + $0x524] sm:$0xf0]  ;;  %v7077_v58 = vor.u32 %v10287_v53, %v7076_v52  ;;  %v6860_v61 = vld [vmem:[#allocation8 + $0x1e0] sm:$0xf]  ;;  %v10233_v63 = vld [vmem:[#allocation8 + $0x1f4] sm:$0xf0]  ;;  %v6669_v4 = vor.u32 %v10185_v60, %v6668_v59 }
  0x48   :  { %1688 = vmatpush.bf16.msra.mxu0 %v6717_v44  ;;  %v7269_v62 = vor.u32 %v10335_v55, %v7268_v54  ;;  %v7052_v0 = vld [vmem:[#allocation8 + $0x360] sm:$0xf]  ;;  %v10281_v1 = vld [vmem:[#allocation8 + $0x374] sm:$0xf0]  ;;  %v6861_v5 = vor.u32 %v10233_v63, %v6860_v61  ;;  %v6644_v7 = vld [vmem:[#allocation8 + $0x30] sm:$0xf] }
  0x49   :  { %1701 = vmatpush.bf16.msra.mxu1 %v6909_v45  ;;  %v7244_v2 = vld [vmem:[#allocation8 + $0x4e0] sm:$0xf]  ;;  %v10329_v3 = vld [vmem:[#allocation8 + $0x4f4] sm:$0xf0]  ;;  %v7053_v6 = vor.u32 %v10281_v1, %v7052_v0  ;;  %v10179_v8 = vld [vmem:[#allocation8 + $0x44] sm:$0xf0] }
  0x4a   :  { %1714 = vmatpush.bf16.msra.mxu2 %v7101_v46  ;;  %v6836_v9 = vld [vmem:[#allocation8 + $0x1b0] sm:$0xf]  ;;  %v7245_v10 = vor.u32 %v10329_v3, %v7244_v2  ;;  %v10227_v11 = vld [vmem:[#allocation8 + $0x1c4] sm:$0xf0]  ;;  %v6645_v16 = vor.u32 %v10179_v8, %v6644_v7  ;;  %v6620_v17 = vld [vmem:[#allocation8] sm:$0xf] }
  0x4b   :  { %1727 = vmatpush.bf16.msra.mxu3 %v7293_v50  ;;  %v7028_v12 = vld [vmem:[#allocation8 + $0x330] sm:$0xf]  ;;  %v10275_v13 = vld [vmem:[#allocation8 + $0x344] sm:$0xf0]  ;;  %v10173_v18 = vld [vmem:[#allocation8 + $0x14] sm:$0xf0]  ;;  %v6837_v19 = vor.u32 %v10227_v11, %v6836_v9 }
  0x4c   :  { %1689 = vmatpush.bf16.msra.mxu0 %v6693_v56  ;;  %v7220_v14 = vld [vmem:[#allocation8 + $0x4b0] sm:$0xf]  ;;  %v10323_v15 = vld [vmem:[#allocation8 + $0x4c4] sm:$0xf0]  ;;  %v7029_v20 = vor.u32 %v10275_v13, %v7028_v12  ;;  %v6812_v21 = vld [vmem:[#allocation8 + $0x180] sm:$0xf]  ;;  %v6621_v31 = vor.u32 %v10173_v18, %v6620_v17 }
  0x4d   :  { %1702 = vmatpush.bf16.msra.mxu1 %v6885_v57  ;;  %v10221_v22 = vld [vmem:[#allocation8 + $0x194] sm:$0xf0]  ;;  %v7004_v23 = vld [vmem:[#allocation8 + $0x300] sm:$0xf]  ;;  %v7221_v24 = vor.u32 %v10323_v15, %v7220_v14  ;;  %v10212_v28 = vld [vmem:[#allocation8 + $0x154] sm:$0xf] }
  0x4e   :  { %1715 = vmatpush.bf16.msra.mxu2 %v7077_v58  ;;  %v10269_v25 = vld [vmem:[#allocation8 + $0x314] sm:$0xf0]  ;;  %v7196_v26 = vld [vmem:[#allocation8 + $0x480] sm:$0xf]  ;;  %v6790_v29 = vld [vmem:[#allocation8 + $0x168] sm:$0xf0]  ;;  %v6813_v35 = vor.u32 %v10221_v22, %v6812_v21 }
  0x4f   :  { %1728 = vmatpush.bf16.msra.mxu3 %v7269_v62  ;;  %v10317_v27 = vld [vmem:[#allocation8 + $0x494] sm:$0xf0]  ;;  %v10260_v30 = vld [vmem:[#allocation8 + $0x2d4] sm:$0xf]  ;;  %v6982_v32 = vld [vmem:[#allocation8 + $0x2e8] sm:$0xf0]  ;;  %v7005_v36 = vor.u32 %v10269_v25, %v7004_v23  ;;  %v6793_v40 = vor.u32 %v10212_v28, %v6790_v29 }
  0x50   :  { %1690 = vmatpush.bf16.msra.mxu0 %v6669_v4  ;;  %v10308_v33 = vld [vmem:[#allocation8 + $0x454] sm:$0xf]  ;;  %v7174_v34 = vld [vmem:[#allocation8 + $0x468] sm:$0xf0]  ;;  %v7197_v39 = vor.u32 %v10317_v27, %v7196_v26  ;;  %v6985_v41 = vor.u32 %v10260_v30, %v6982_v32  ;;  %v10206_v43 = vld [vmem:[#allocation8 + $0x124] sm:$0xf] }
  0x51   :  { %1703 = vmatpush.bf16.msra.mxu1 %v6861_v5  ;;  %v10356_v37 = vld [vmem:[#allocation8 + $0x5d4] sm:$0xf]  ;;  %v7366_v38 = vld [vmem:[#allocation8 + $0x5e8] sm:$0xf0]  ;;  %v7177_v42 = vor.u32 %v10308_v33, %v7174_v34  ;;  %v6766_v44 = vld [vmem:[#allocation8 + $0x138] sm:$0xf0] }
  0x52   :  { %1716 = vmatpush.bf16.msra.mxu2 %v7053_v6  ;;  %v10254_v45 = vld [vmem:[#allocation8 + $0x2a4] sm:$0xf]  ;;  %v7369_v46 = vor.u32 %v10356_v37, %v7366_v38  ;;  %v6958_v47 = vld [vmem:[#allocation8 + $0x2b8] sm:$0xf0]  ;;  %v6769_v52 = vor.u32 %v10206_v43, %v6766_v44  ;;  %v10200_v55 = vld [vmem:[#allocation8 + $0xf4] sm:$0xf] }
  0x53   :  { %1729 = vmatpush.bf16.msra.mxu3 %v7245_v10  ;;  %v10302_v48 = vld [vmem:[#allocation8 + $0x424] sm:$0xf]  ;;  %v7150_v49 = vld [vmem:[#allocation8 + $0x438] sm:$0xf0]  ;;  %v6961_v53 = vor.u32 %v10254_v45, %v6958_v47  ;;  %v6742_v56 = vld [vmem:[#allocation8 + $0x108] sm:$0xf0] }
  0x54   :  { %1691 = vmatpush.bf16.msra.mxu0 %v6645_v16  ;;  %v10350_v50 = vld [vmem:[#allocation8 + $0x5a4] sm:$0xf]  ;;  %v7342_v51 = vld [vmem:[#allocation8 + $0x5b8] sm:$0xf0]  ;;  %v7153_v54 = vor.u32 %v10302_v48, %v7150_v49  ;;  %v10248_v57 = vld [vmem:[#allocation8 + $0x274] sm:$0xf]  ;;  %v6745_v0 = vor.u32 %v10200_v55, %v6742_v56 }
  0x55   :  { %1704 = vmatpush.bf16.msra.mxu1 %v6837_v19  ;;  %v7345_v58 = vor.u32 %v10350_v50, %v7342_v51  ;;  %v6934_v59 = vld [vmem:[#allocation8 + $0x288] sm:$0xf0]  ;;  %v10296_v60 = vld [vmem:[#allocation8 + $0x3f4] sm:$0xf]  ;;  %v10194_v1 = vld [vmem:[#allocation8 + $0xc4] sm:$0xf] }
  0x56   :  { %1717 = vmatpush.bf16.msra.mxu2 %v7029_v20  ;;  %v7126_v61 = vld [vmem:[#allocation8 + $0x408] sm:$0xf0]  ;;  %v10344_v62 = vld [vmem:[#allocation8 + $0x574] sm:$0xf]  ;;  %v234_v2 = vld [vmem:[#allocation5] sm:$0xf]  ;;  %v6937_v3 = vor.u32 %v10248_v57, %v6934_v59 }
  0x57   :  { %1730 = vmatpush.bf16.msra.mxu3 %v7221_v24  ;;  %v7318_v63 = vld [vmem:[#allocation8 + $0x588] sm:$0xf0]  ;;  %v7129_v4 = vor.u32 %v10296_v60, %v7126_v61  ;;  %v6718_v5 = vld [vmem:[#allocation8 + $0xd8] sm:$0xf0]  ;;  %v10242_v6 = vld [vmem:[#allocation8 + $0x244] sm:$0xf] }
  0x58   :  { %1692 = vmatpush.bf16.msra.mxu0 %v6621_v31  ;;  %716 = vst [vmem:[#allocation1] ss:$9 sm:$0xff] %v234_v2  ;;  %v7321_v7 = vor.u32 %v10344_v62, %v7318_v63  ;;  %v6910_v8 = vld [vmem:[#allocation8 + $0x258] sm:$0xf0]  ;;  %v10290_v9 = vld [vmem:[#allocation8 + $0x3c4] sm:$0xf]  ;;  %v6721_v13 = vor.u32 %v10194_v1, %v6718_v5 }
  0x59   :  { %1705 = vmatpush.bf16.msra.mxu1 %v6813_v35  ;;  %v7102_v10 = vld [vmem:[#allocation8 + $0x3d8] sm:$0xf0]  ;;  %v10338_v11 = vld [vmem:[#allocation8 + $0x544] sm:$0xf]  ;;  %v10188_v14 = vld [vmem:[#allocation8 + $0x94] sm:$0xf]  ;;  %v6913_v16 = vor.u32 %v10242_v6, %v6910_v8 }
  0x5a   :  { %1718 = vmatpush.bf16.msra.mxu2 %v7005_v36  ;;  %v7294_v12 = vld [vmem:[#allocation8 + $0x558] sm:$0xf0]  ;;  %v6694_v15 = vld [vmem:[#allocation8 + $0xa8] sm:$0xf0]  ;;  %v7105_v17 = vor.u32 %v10290_v9, %v7102_v10  ;;  %v10236_v18 = vld [vmem:[#allocation8 + $0x214] sm:$0xf] }
  0x5b   :  { %1731 = vmatpush.bf16.msra.mxu3 %v7197_v39  ;;  %v6886_v19 = vld [vmem:[#allocation8 + $0x228] sm:$0xf0]  ;;  %v10284_v20 = vld [vmem:[#allocation8 + $0x394] sm:$0xf]  ;;  %v7297_v21 = vor.u32 %v10338_v11, %v7294_v12  ;;  %v10182_v25 = vld [vmem:[#allocation8 + $0x64] sm:$0xf]  ;;  %v6697_v28 = vor.u32 %v10188_v14, %v6694_v15 }
  0x5c   :  { %1737 = vmatpush.bf16.msrb.mxu0 %v6793_v40  ;;  %v7078_v22 = vld [vmem:[#allocation8 + $0x3a8] sm:$0xf0]  ;;  %v10332_v23 = vld [vmem:[#allocation8 + $0x514] sm:$0xf]  ;;  %v6670_v26 = vld [vmem:[#allocation8 + $0x78] sm:$0xf0]  ;;  %v6889_v32 = vor.u32 %v10236_v18, %v6886_v19 }
  0x5d   :  { %1750 = vmatpush.bf16.msrb.mxu1 %v6985_v41  ;;  %v7270_v24 = vld [vmem:[#allocation8 + $0x528] sm:$0xf0]  ;;  %v233_v27 = vld [vmem:[#allocation2] sm:$0x3f]  ;;  %v7081_v33 = vor.u32 %v10284_v20, %v7078_v22  ;;  %v10230_v34 = vld [vmem:[#allocation8 + $0x1e4] sm:$0xf] }
  0x5e   :  { %1763 = vmatpush.bf16.msrb.mxu2 %v7177_v42  ;;  %v6862_v35 = vld [vmem:[#allocation8 + $0x1f8] sm:$0xf0]  ;;  %v7273_v37 = vor.u32 %v10332_v23, %v7270_v24  ;;  %v10278_v38 = vld [vmem:[#allocation8 + $0x364] sm:$0xf]  ;;  %v6673_v42 = vor.u32 %v10182_v25, %v6670_v26  ;;  %v10176_v45 = vld [vmem:[#allocation8 + $0x34] sm:$0xf] }
  0x5f   :  { %1776 = vmatpush.bf16.msrb.mxu3 %v7369_v46  ;;  %v11217_v29 = vld [vmem:[#allocation1 + $0x12] sm:$0xff]  ;;  %v11219_v30 = vld [vmem:[#allocation1] sm:$0xff]  ;;  %v11223_v36 = vld [vmem:[#allocation1 + $0x9] sm:$0xff]  ;;  %v6865_v43 = vor.u32 %v10230_v34, %v6862_v35  ;;  %s11101_s10 = smov [#allocation23]   ;;  %s6602_s14 = sshll.u32 %s11493_s13, 4  ;;  %s6603_s14 = int_to_ptr.hbm [resolvable:$true] %s6602_s14 }
  0x60   :  { %1738 = vmatpush.bf16.msrb.mxu0 %v6769_v52  ;;  %v11221_v31 = vld [vmem:[#allocation1 + $0x1b] sm:$0xff]  ;;  %v7054_v39 = vld [vmem:[#allocation8 + $0x378] sm:$0xf0]  ;;  %1719 = vmatmul.bf16.vlgmr.msra.gmra.mxu2 %v11217_v29  ;;  %v10326_v40 = vld [vmem:[#allocation8 + $0x4e4] sm:$0xf]  ;;  %s6600_s12 = sshll.u32 %s11101_s10, 4  ;;  %s6601_s12 = int_to_ptr.vmem [resolvable:$true] %s6600_s12 }
  0x61   :  { %1751 = vmatpush.bf16.msrb.mxu1 %v6961_v53  ;;  %1998 = vst [vmem:[#allocation1] ss:$9 sm:$0xff] %v233_v27  ;;  %v7246_v41 = vld [vmem:[#allocation8 + $0x4f8] sm:$0xf0]  ;;  %1693 = vmatmul.bf16.vlgmr.msra.gmra.mxu0 %v11219_v30  ;;  %v7057_v44 = vor.u32 %v10278_v38, %v7054_v39  ;;  %v6646_v46 = vld [vmem:[#allocation8 + $0x48] sm:$0xf0] }
  0x62   :  { %1764 = vmatpush.bf16.msrb.mxu2 %v7153_v54  ;;  %1732 = vmatmul.bf16.vlgmr.msra.gmra.mxu3 %v11221_v31  ;;  %v10224_v47 = vld [vmem:[#allocation8 + $0x1b4] sm:$0xf]  ;;  %v7249_v48 = vor.u32 %v10326_v40, %v7246_v41  ;;  %v6838_v49 = vld [vmem:[#allocation8 + $0x1c8] sm:$0xf0]  ;;  %v6649_v54 = vor.u32 %v10176_v45, %v6646_v46  ;;  %v10170_v55 = vld [vmem:[#allocation8 + $0x4] sm:$0xf] }
  0x63   :  { %1777 = vmatpush.bf16.msrb.mxu3 %v7345_v58  ;;  %1706 = vmatmul.bf16.vlgmr.msra.gmra.mxu1 %v11223_v36  ;;  %v10272_v50 = vld [vmem:[#allocation8 + $0x334] sm:$0xf]  ;;  %v7030_v51 = vld [vmem:[#allocation8 + $0x348] sm:$0xf0]  ;;  %v6622_v56 = vld [vmem:[#allocation8 + $0x18] sm:$0xf0]  ;;  %v6841_v57 = vor.u32 %v10224_v47, %v6838_v49 }
  0x64   :  { %1739 = vmatpush.bf16.msrb.mxu0 %v6745_v0  ;;  %v10320_v52 = vld [vmem:[#allocation8 + $0x4b4] sm:$0xf]  ;;  %v7222_v53 = vld [vmem:[#allocation8 + $0x4c8] sm:$0xf0]  ;;  %v7033_v58 = vor.u32 %v10272_v50, %v7030_v51  ;;  %v10218_v59 = vld [vmem:[#allocation8 + $0x184] sm:$0xf]  ;;  %v6625_v5 = vor.u32 %v10170_v55, %v6622_v56 }
  0x65   :  { %1752 = vmatpush.bf16.msrb.mxu1 %v6937_v3  ;;  %v6814_v60 = vld [vmem:[#allocation8 + $0x198] sm:$0xf0]  ;;  %v10266_v61 = vld [vmem:[#allocation8 + $0x304] sm:$0xf]  ;;  %v7225_v62 = vor.u32 %v10320_v52, %v7222_v53  ;;  %v6796_v2 = vld [vmem:[#allocation8 + $0x158] sm:$0xf] }
  0x66   :  { %1765 = vmatpush.bf16.msrb.mxu2 %v7129_v4  ;;  %v7006_v63 = vld [vmem:[#allocation8 + $0x318] sm:$0xf0]  ;;  %v10314_v0 = vld [vmem:[#allocation8 + $0x484] sm:$0xf]  ;;  %v10216_v3 = vld [vmem:[#allocation8 + $0x16c] sm:$0xf0]  ;;  %v6817_v9 = vor.u32 %v10218_v59, %v6814_v60 }
  0x67   :  { %1778 = vmatpush.bf16.msrb.mxu3 %v7321_v7  ;;  %v7198_v1 = vld [vmem:[#allocation8 + $0x498] sm:$0xf0]  ;;  %v6988_v4 = vld [vmem:[#allocation8 + $0x2d8] sm:$0xf]  ;;  %v10264_v6 = vld [vmem:[#allocation8 + $0x2ec] sm:$0xf0]  ;;  %v7009_v10 = vor.u32 %v10266_v61, %v7006_v63  ;;  %v6797_v14 = vor.u32 %v10216_v3, %v6796_v2 }
  0x68   :  { %1740 = vmatpush.bf16.msrb.mxu0 %v6721_v13  ;;  %v7180_v7 = vld [vmem:[#allocation8 + $0x458] sm:$0xf]  ;;  %v10312_v8 = vld [vmem:[#allocation8 + $0x46c] sm:$0xf0]  ;;  %v7201_v13 = vor.u32 %v10314_v0, %v7198_v1  ;;  %v6989_v15 = vor.u32 %v10264_v6, %v6988_v4  ;;  %v10210_v18 = vld [vmem:[#allocation8 + $0x13c] sm:$0xf0] }
  0x69   :  { %1753 = vmatpush.bf16.msrb.mxu1 %v6913_v16  ;;  %v7372_v11 = vld [vmem:[#allocation8 + $0x5d8] sm:$0xf]  ;;  %v10360_v12 = vld [vmem:[#allocation8 + $0x5ec] sm:$0xf0]  ;;  %v7181_v16 = vor.u32 %v10312_v8, %v7180_v7  ;;  %v6964_v19 = vld [vmem:[#allocation8 + $0x2a8] sm:$0xf] }
  0x6a   :  { %1766 = vmatpush.bf16.msrb.mxu2 %v7105_v17  ;;  %v6772_v17 = vld [vmem:[#allocation8 + $0x128] sm:$0xf]  ;;  %v7373_v20 = vor.u32 %v10360_v12, %v7372_v11  ;;  %v10306_v23 = vld [vmem:[#allocation8 + $0x43c] sm:$0xf0]  ;;  %v6940_v34 = vld [vmem:[#allocation8 + $0x278] sm:$0xf] }
  0x6b   :  { %1779 = vmatpush.bf16.msrb.mxu3 %v7297_v21  ;;  %v10258_v21 = vld [vmem:[#allocation8 + $0x2bc] sm:$0xf0]  ;;  %v7156_v22 = vld [vmem:[#allocation8 + $0x428] sm:$0xf]  ;;  %v6773_v26 = vor.u32 %v10210_v18, %v6772_v17  ;;  %v7132_v38 = vld [vmem:[#allocation8 + $0x3f8] sm:$0xf] }
  0x6c   :  { %1741 = vmatpush.bf16.msrb.mxu0 %v6697_v28  ;;  %v7348_v24 = vld [vmem:[#allocation8 + $0x5a8] sm:$0xf]  ;;  %v10354_v25 = vld [vmem:[#allocation8 + $0x5bc] sm:$0xf0]  ;;  %v6965_v27 = vor.u32 %v10258_v21, %v6964_v19  ;;  %v7157_v28 = vor.u32 %v10306_v23, %v7156_v22  ;;  %v10300_v39 = vld [vmem:[#allocation8 + $0x40c] sm:$0xf0] }
  0x6d   :  { %1754 = vmatpush.bf16.msrb.mxu1 %v6889_v32  ;;  %v6748_v32 = vld [vmem:[#allocation8 + $0xf8] sm:$0xf]  ;;  %v7349_v35 = vor.u32 %v10354_v25, %v7348_v24  ;;  %v10348_v41 = vld [vmem:[#allocation8 + $0x58c] sm:$0xf0]  ;;  %v6724_v45 = vld [vmem:[#allocation8 + $0xc8] sm:$0xf] }
  0x6e   :  { %1767 = vmatpush.bf16.msrb.mxu2 %v7081_v33  ;;  %v10204_v33 = vld [vmem:[#allocation8 + $0x10c] sm:$0xf0]  ;;  %v7324_v40 = vld [vmem:[#allocation8 + $0x578] sm:$0xf]  ;;  %v10198_v46 = vld [vmem:[#allocation8 + $0xdc] sm:$0xf0] }
  0x6f   :  { %1780 = vmatpush.bf16.msrb.mxu3 %v7273_v37  ;;  %v10252_v37 = vld [vmem:[#allocation8 + $0x28c] sm:$0xf0]  ;;  %v6916_v47 = vld [vmem:[#allocation8 + $0x248] sm:$0xf]  ;;  %v10246_v49 = vld [vmem:[#allocation8 + $0x25c] sm:$0xf0] }
  0x70   :  { %1742 = vmatpush.bf16.msrb.mxu0 %v6673_v42  ;;  %v6749_v42 = vor.u32 %v10204_v33, %v6748_v32  ;;  %v7108_v50 = vld [vmem:[#allocation8 + $0x3c8] sm:$0xf]  ;;  %v10294_v51 = vld [vmem:[#allocation8 + $0x3dc] sm:$0xf0]  ;;  %v6917_v55 = vor.u32 %v10246_v49, %v6916_v47  ;;  %v6892_v59 = vld [vmem:[#allocation8 + $0x218] sm:$0xf] }
  0x71   :  { %1755 = vmatpush.bf16.msrb.mxu1 %v6865_v43  ;;  %v6941_v43 = vor.u32 %v10252_v37, %v6940_v34  ;;  %v7300_v52 = vld [vmem:[#allocation8 + $0x548] sm:$0xf]  ;;  %v10342_v53 = vld [vmem:[#allocation8 + $0x55c] sm:$0xf0]  ;;  %v7109_v56 = vor.u32 %v10294_v51, %v7108_v50  ;;  %v10240_v61 = vld [vmem:[#allocation8 + $0x22c] sm:$0xf0] }
  0x72   :  { %1768 = vmatpush.bf16.msrb.mxu2 %v7057_v44  ;;  %v7133_v44 = vor.u32 %v10300_v39, %v7132_v38  ;;  %v7301_v60 = vor.u32 %v10342_v53, %v7300_v52  ;;  %v10288_v63 = vld [vmem:[#allocation8 + $0x3ac] sm:$0xf0]  ;;  %v7276_v0 = vld [vmem:[#allocation8 + $0x518] sm:$0xf]  ;;  %v6893_v3 = vor.u32 %v10240_v61, %v6892_v59  ;;  %v10186_v6 = vld [vmem:[#allocation8 + $0x7c] sm:$0xf0] }
  0x73   :  { %1781 = vmatpush.bf16.msrb.mxu3 %v7249_v48  ;;  %v7325_v48 = vor.u32 %v10348_v41, %v7324_v40  ;;  %v10336_v1 = vld [vmem:[#allocation8 + $0x52c] sm:$0xf0]  ;;  %v6868_v7 = vld [vmem:[#allocation8 + $0x1e8] sm:$0xf]  ;;  %v10282_v11 = vld [vmem:[#allocation8 + $0x37c] sm:$0xf0] }
  0x74   :  { %1743 = vmatpush.bf16.msrb.mxu0 %v6649_v54  ;;  %v6725_v54 = vor.u32 %v10198_v46, %v6724_v45  ;;  %v7277_v8 = vor.u32 %v10336_v1, %v7276_v0  ;;  %v7252_v12 = vld [vmem:[#allocation8 + $0x4e8] sm:$0xf]  ;;  %v6652_v17 = vld [vmem:[#allocation8 + $0x38] sm:$0xf]  ;;  %v10180_v18 = vld [vmem:[#allocation8 + $0x4c] sm:$0xf0] }
  0x75   :  { %1756 = vmatpush.bf16.msrb.mxu1 %v6841_v57  ;;  %v6700_v57 = vld [vmem:[#allocation8 + $0x98] sm:$0xf]  ;;  %v10228_v21 = vld [vmem:[#allocation8 + $0x1cc] sm:$0xf0]  ;;  %v6820_v34 = vld [vmem:[#allocation8 + $0x188] sm:$0xf] }
  0x76   :  { %1769 = vmatpush.bf16.msrb.mxu2 %v7033_v58  ;;  %v10192_v58 = vld [vmem:[#allocation8 + $0xac] sm:$0xf0]  ;;  %v6844_v19 = vld [vmem:[#allocation8 + $0x1b8] sm:$0xf]  ;;  %v7012_v37 = vld [vmem:[#allocation8 + $0x308] sm:$0xf] }
  0x77   :  { %1782 = vmatpush.bf16.msrb.mxu3 %v7225_v62  ;;  %v7084_v62 = vld [vmem:[#allocation8 + $0x398] sm:$0xf]  ;;  %v6701_v2 = vor.u32 %v10192_v58, %v6700_v57  ;;  %v10276_v23 = vld [vmem:[#allocation8 + $0x34c] sm:$0xf0]  ;;  %v6845_v32 = vor.u32 %v10228_v21, %v6844_v19  ;;  %v10270_v39 = vld [vmem:[#allocation8 + $0x31c] sm:$0xf0] }
  0x78   :  { %1744 = vmatpush.bf16.msrb.mxu0 %v6625_v5  ;;  %v7085_v4 = vor.u32 %v10288_v63, %v7084_v62  ;;  %v6676_v5 = vld [vmem:[#allocation8 + $0x68] sm:$0xf]  ;;  %v7036_v22 = vld [vmem:[#allocation8 + $0x338] sm:$0xf]  ;;  %v10324_v25 = vld [vmem:[#allocation8 + $0x4cc] sm:$0xf0]  ;;  %v7013_v50 = vor.u32 %v10270_v39, %v7012_v37 }
  0x79   :  { %1757 = vmatpush.bf16.msrb.mxu1 %v6817_v9  ;;  %v10234_v9 = vld [vmem:[#allocation8 + $0x1fc] sm:$0xf0]  ;;  %v7228_v24 = vld [vmem:[#allocation8 + $0x4b8] sm:$0xf]  ;;  %v7037_v33 = vor.u32 %v10276_v23, %v7036_v22  ;;  %v7204_v40 = vld [vmem:[#allocation8 + $0x488] sm:$0xf] }
  0x7a   :  { %1770 = vmatpush.bf16.msrb.mxu2 %v7009_v10  ;;  %v7060_v10 = vld [vmem:[#allocation8 + $0x368] sm:$0xf]  ;;  %v7229_v38 = vor.u32 %v10324_v25, %v7228_v24  ;;  %v10318_v41 = vld [vmem:[#allocation8 + $0x49c] sm:$0xf0]  ;;  %v6990_v46 = vld [vmem:[#allocation8 + $0x2f0] sm:$0xf0] }
  0x7b   :  { %1783 = vmatpush.bf16.msrb.mxu3 %v7201_v13  ;;  %1745 = vmatmul.bf16.vlgmr.msrb.gmra.mxu0 %v11219_v30  ;;  %v10330_v13 = vld [vmem:[#allocation8 + $0x4fc] sm:$0xf0]  ;;  %v10309_v47 = vld [vmem:[#allocation8 + $0x45c] sm:$0xf]  ;;  %v7374_v52 = vld [vmem:[#allocation8 + $0x5f0] sm:$0xf0]  ;;  %v7205_v53 = vor.u32 %v10318_v41, %v7204_v40 }
  0x7c   :  { %1789 = vmatpush.bf16.msra.mxu0 %v6797_v14  ;;  %1758 = vmatmul.bf16.vlgmr.msrb.gmra.mxu1 %v11223_v36  ;;  %v6677_v14 = vor.u32 %v10186_v6, %v6676_v5  ;;  %v10357_v51 = vld [vmem:[#allocation8 + $0x5dc] sm:$0xf]  ;;  %v10207_v57 = vld [vmem:[#allocation8 + $0x12c] sm:$0xf]  ;;  %v6774_v58 = vld [vmem:[#allocation8 + $0x140] sm:$0xf0] }
  0x7d   :  { %1802 = vmatpush.bf16.msra.mxu1 %v6989_v15  ;;  %1771 = vmatmul.bf16.vlgmr.msrb.gmra.mxu2 %v11217_v29  ;;  %v6869_v15 = vor.u32 %v10234_v9, %v6868_v7  ;;  %v10255_v59 = vld [vmem:[#allocation8 + $0x2ac] sm:$0xf]  ;;  %v6966_v61 = vld [vmem:[#allocation8 + $0x2c0] sm:$0xf0]  ;;  %v10201_v5 = vld [vmem:[#allocation8 + $0xfc] sm:$0xf] }
  0x7e   :  { %1815 = vmatpush.bf16.msra.mxu2 %v7181_v16  ;;  %1784 = vmatmul.bf16.vlgmr.msrb.gmra.mxu3 %v11221_v31  ;;  %v7061_v16 = vor.u32 %v10282_v11, %v7060_v10  ;;  %v10303_v62 = vld [vmem:[#allocation8 + $0x42c] sm:$0xf]  ;;  %v7158_v63 = vld [vmem:[#allocation8 + $0x440] sm:$0xf0]  ;;  %v6750_v6 = vld [vmem:[#allocation8 + $0x110] sm:$0xf0] }
  0x7f   :  { %1828 = vmatpush.bf16.msra.mxu3 %v7373_v20  ;;  %v7253_v20 = vor.u32 %v10330_v13, %v7252_v12  ;;  %v10351_v0 = vld [vmem:[#allocation8 + $0x5ac] sm:$0xf]  ;;  %v7350_v1 = vld [vmem:[#allocation8 + $0x5c0] sm:$0xf0]  ;;  %v10249_v7 = vld [vmem:[#allocation8 + $0x27c] sm:$0xf] }
  0x80   :  { %1790 = vmatpush.bf16.msra.mxu0 %v6773_v26  ;;  %v6653_v26 = vor.u32 %v10180_v18, %v6652_v17  ;;  %v6942_v9 = vld [vmem:[#allocation8 + $0x290] sm:$0xf0]  ;;  %v10297_v10 = vld [vmem:[#allocation8 + $0x3fc] sm:$0xf]  ;;  %v10195_v17 = vld [vmem:[#allocation8 + $0xcc] sm:$0xf] }
  0x81   :  { %1803 = vmatpush.bf16.msra.mxu1 %v6965_v27  ;;  %v6628_v27 = vld [vmem:[#allocation8 + $0x8] sm:$0xf]  ;;  %v7134_v11 = vld [vmem:[#allocation8 + $0x410] sm:$0xf0]  ;;  %v10345_v12 = vld [vmem:[#allocation8 + $0x57c] sm:$0xf] }
  0x82   :  { %1816 = vmatpush.bf16.msra.mxu2 %v7157_v28  ;;  %v10174_v28 = vld [vmem:[#allocation8 + $0x1c] sm:$0xf0]  ;;  %v7326_v13 = vld [vmem:[#allocation8 + $0x590] sm:$0xf0]  ;;  %v6726_v18 = vld [vmem:[#allocation8 + $0xe0] sm:$0xf0] }
  0x83   :  { %1829 = vmatpush.bf16.msra.mxu3 %v7349_v35  ;;  %v10222_v35 = vld [vmem:[#allocation8 + $0x19c] sm:$0xf0]  ;;  %v6629_v45 = vor.u32 %v10174_v28, %v6628_v27  ;;  %v10243_v19 = vld [vmem:[#allocation8 + $0x24c] sm:$0xf]  ;;  %v6918_v21 = vld [vmem:[#allocation8 + $0x260] sm:$0xf0] }
  0x84   :  { %1791 = vmatpush.bf16.msra.mxu0 %v6749_v42  ;;  %v10213_v42 = vld [vmem:[#allocation8 + $0x15c] sm:$0xf]  ;;  %v6821_v49 = vor.u32 %v10222_v35, %v6820_v34  ;;  %v10291_v22 = vld [vmem:[#allocation8 + $0x3cc] sm:$0xf]  ;;  %v7110_v23 = vld [vmem:[#allocation8 + $0x3e0] sm:$0xf0]  ;;  %v6921_v27 = vor.u32 %v10243_v19, %v6918_v21 }
  0x85   :  { %1804 = vmatpush.bf16.msra.mxu1 %v6941_v43  ;;  %v6798_v43 = vld [vmem:[#allocation8 + $0x170] sm:$0xf0]  ;;  %v10339_v24 = vld [vmem:[#allocation8 + $0x54c] sm:$0xf]  ;;  %v7302_v25 = vld [vmem:[#allocation8 + $0x560] sm:$0xf0]  ;;  %v7113_v28 = vor.u32 %v10291_v22, %v7110_v23 }
  0x86   :  { %1817 = vmatpush.bf16.msra.mxu2 %v7133_v44  ;;  %v10261_v44 = vld [vmem:[#allocation8 + $0x2dc] sm:$0xf]  ;;  %v7305_v35 = vor.u32 %v10339_v24, %v7302_v25  ;;  %v6894_v37 = vld [vmem:[#allocation8 + $0x230] sm:$0xf0]  ;;  %v7188_v19 = vld [vmem:[#allocation8 + $0x460] sm:$0xf] }
  0x87   :  { %1830 = vmatpush.bf16.msra.mxu3 %v7325_v48  ;;  %v7182_v48 = vld [vmem:[#allocation8 + $0x470] sm:$0xf0]  ;;  %v10237_v34 = vld [vmem:[#allocation8 + $0x21c] sm:$0xf]  ;;  %v7380_v23 = vld [vmem:[#allocation8 + $0x5e0] sm:$0xf] }
  0x88   :  { %1792 = vmatpush.bf16.msra.mxu0 %v6725_v54  ;;  %v6801_v54 = vor.u32 %v10213_v42, %v6798_v43  ;;  %v7086_v39 = vld [vmem:[#allocation8 + $0x3b0] sm:$0xf0]  ;;  %v10333_v40 = vld [vmem:[#allocation8 + $0x51c] sm:$0xf]  ;;  %v6897_v43 = vor.u32 %v10237_v34, %v6894_v37  ;;  %v10361_v24 = vld [vmem:[#allocation8 + $0x5f4] sm:$0xf0] }
  0x89   :  { %1805 = vmatpush.bf16.msra.mxu1 %v6917_v55  ;;  %v6993_v55 = vor.u32 %v10261_v44, %v6990_v46  ;;  %v7278_v41 = vld [vmem:[#allocation8 + $0x530] sm:$0xf0]  ;;  %v6678_v46 = vld [vmem:[#allocation8 + $0x80] sm:$0xf0]  ;;  %v6972_v34 = vld [vmem:[#allocation8 + $0x2b0] sm:$0xf] }
  0x8a   :  { %1818 = vmatpush.bf16.msra.mxu2 %v7109_v56  ;;  %v7185_v56 = vor.u32 %v10309_v47, %v7182_v48  ;;  %v10231_v47 = vld [vmem:[#allocation8 + $0x1ec] sm:$0xf]  ;;  %v7281_v48 = vor.u32 %v10333_v40, %v7278_v41  ;;  %v10259_v37 = vld [vmem:[#allocation8 + $0x2c4] sm:$0xf0]  ;;  %v7356_v40 = vld [vmem:[#allocation8 + $0x5b0] sm:$0xf] }
  0x8b   :  { %1831 = vmatpush.bf16.msra.mxu3 %v7301_v60  ;;  %v7377_v60 = vor.u32 %v10357_v51, %v7374_v52  ;;  %v7062_v51 = vld [vmem:[#allocation8 + $0x380] sm:$0xf0]  ;;  %v10327_v52 = vld [vmem:[#allocation8 + $0x4ec] sm:$0xf]  ;;  %v10355_v41 = vld [vmem:[#allocation8 + $0x5c4] sm:$0xf0] }
  0x8c   :  { %1793 = vmatpush.bf16.msra.mxu0 %v6701_v2  ;;  %v6777_v2 = vor.u32 %v10207_v57, %v6774_v58  ;;  %v10177_v57 = vld [vmem:[#allocation8 + $0x3c] sm:$0xf]  ;;  %v6654_v58 = vld [vmem:[#allocation8 + $0x50] sm:$0xf0] }
  0x8d   :  { %1806 = vmatpush.bf16.msra.mxu1 %v6893_v3  ;;  %v6969_v3 = vor.u32 %v10255_v59, %v6966_v61  ;;  %v10225_v59 = vld [vmem:[#allocation8 + $0x1bc] sm:$0xf]  ;;  %v6846_v61 = vld [vmem:[#allocation8 + $0x1d0] sm:$0xf0] }
  0x8e   :  { %1819 = vmatpush.bf16.msra.mxu2 %v7085_v4  ;;  %v7161_v4 = vor.u32 %v10303_v62, %v7158_v63  ;;  %v10273_v62 = vld [vmem:[#allocation8 + $0x33c] sm:$0xf]  ;;  %v7038_v63 = vld [vmem:[#allocation8 + $0x350] sm:$0xf0] }
  0x8f   :  { %1832 = vmatpush.bf16.msra.mxu3 %v7277_v8  ;;  %v7353_v8 = vor.u32 %v10351_v0, %v7350_v1  ;;  %v10321_v0 = vld [vmem:[#allocation8 + $0x4bc] sm:$0xf]  ;;  %v7230_v1 = vld [vmem:[#allocation8 + $0x4d0] sm:$0xf0] }
  0x90   :  { %1794 = vmatpush.bf16.msra.mxu0 %v6677_v14  ;;  %v6753_v14 = vor.u32 %v10201_v5, %v6750_v6  ;;  %v6849_v5 = vor.u32 %v10225_v59, %v6846_v61  ;;  %v7041_v6 = vor.u32 %v10273_v62, %v7038_v63  ;;  %v6924_v59 = vld [vmem:[#allocation8 + $0x250] sm:$0xf]  ;;  %v10247_v61 = vld [vmem:[#allocation8 + $0x264] sm:$0xf0] }
  0x91   :  { %1807 = vmatpush.bf16.msra.mxu1 %v6869_v15  ;;  %v6945_v15 = vor.u32 %v10249_v7, %v6942_v9  ;;  %v10219_v7 = vld [vmem:[#allocation8 + $0x18c] sm:$0xf]  ;;  %v7116_v62 = vld [vmem:[#allocation8 + $0x3d0] sm:$0xf]  ;;  %v10295_v63 = vld [vmem:[#allocation8 + $0x3e4] sm:$0xf0] }
  0x92   :  { %1820 = vmatpush.bf16.msra.mxu2 %v7061_v16  ;;  %v7137_v16 = vor.u32 %v10297_v10, %v7134_v11  ;;  %v10267_v9 = vld [vmem:[#allocation8 + $0x30c] sm:$0xf]  ;;  %v7233_v10 = vor.u32 %v10321_v0, %v7230_v1  ;;  %v7014_v11 = vld [vmem:[#allocation8 + $0x320] sm:$0xf0]  ;;  %v7308_v0 = vld [vmem:[#allocation8 + $0x550] sm:$0xf] }
  0x93   :  { %1833 = vmatpush.bf16.msra.mxu3 %v7253_v20  ;;  %v7329_v20 = vor.u32 %v10345_v12, %v7326_v13  ;;  %v10315_v12 = vld [vmem:[#allocation8 + $0x48c] sm:$0xf]  ;;  %v7206_v13 = vld [vmem:[#allocation8 + $0x4a0] sm:$0xf0]  ;;  %v7017_v22 = vor.u32 %v10267_v9, %v7014_v11  ;;  %v10343_v1 = vld [vmem:[#allocation8 + $0x564] sm:$0xf0] }
  0x94   :  { %1795 = vmatpush.bf16.msra.mxu0 %v6653_v26  ;;  %v6729_v26 = vor.u32 %v10195_v17, %v6726_v18  ;;  %v10265_v18 = vld [vmem:[#allocation8 + $0x2f4] sm:$0xf0]  ;;  %v7209_v25 = vor.u32 %v10315_v12, %v7206_v13  ;;  %v7284_v12 = vld [vmem:[#allocation8 + $0x520] sm:$0xf] }
  0x95   :  { %1808 = vmatpush.bf16.msra.mxu1 %v6845_v32  ;;  %v10189_v32 = vld [vmem:[#allocation8 + $0x9c] sm:$0xf]  ;;  %v10241_v9 = vld [vmem:[#allocation8 + $0x234] sm:$0xf0] }
  0x96   :  { %1821 = vmatpush.bf16.msra.mxu2 %v7037_v33  ;;  %v6702_v33 = vld [vmem:[#allocation8 + $0xb0] sm:$0xf0]  ;;  %v10289_v11 = vld [vmem:[#allocation8 + $0x3b4] sm:$0xf0] }
  0x97   :  { %1834 = vmatpush.bf16.msra.mxu3 %v7229_v38  ;;  %v10285_v38 = vld [vmem:[#allocation8 + $0x39c] sm:$0xf]  ;;  %v6705_v42 = vor.u32 %v10189_v32, %v6702_v33  ;;  %v6780_v32 = vld [vmem:[#allocation8 + $0x130] sm:$0xf]  ;;  %v10211_v33 = vld [vmem:[#allocation8 + $0x144] sm:$0xf0] }
  0x98   :  { %1796 = vmatpush.bf16.msra.mxu0 %v6629_v45  ;;  %v7089_v44 = vor.u32 %v10285_v38, %v7086_v39  ;;  %v10183_v45 = vld [vmem:[#allocation8 + $0x6c] sm:$0xf]  ;;  %v7164_v38 = vld [vmem:[#allocation8 + $0x430] sm:$0xf]  ;;  %v10307_v39 = vld [vmem:[#allocation8 + $0x444] sm:$0xf0] }
  0x99   :  { %1809 = vmatpush.bf16.msra.mxu1 %v6821_v49  ;;  %v6870_v49 = vld [vmem:[#allocation8 + $0x200] sm:$0xf0]  ;;  %v10337_v13 = vld [vmem:[#allocation8 + $0x534] sm:$0xf0] }
  0x9a   :  { %1822 = vmatpush.bf16.msra.mxu2 %v7013_v50  ;;  %v10279_v50 = vld [vmem:[#allocation8 + $0x36c] sm:$0xf] }
  0x9b   :  { %1835 = vmatpush.bf16.msra.mxu3 %v7205_v53  ;;  %1797 = vmatmul.bf16.vlgmr.msra.gmra.mxu0 %v11219_v30  ;;  %v7254_v53 = vld [vmem:[#allocation8 + $0x500] sm:$0xf0] }
  0x9c   :  { %1841 = vmatpush.bf16.msrb.mxu0 %v6801_v54  ;;  %1810 = vmatmul.bf16.vlgmr.msra.gmra.mxu1 %v11223_v36  ;;  %v6681_v54 = vor.u32 %v10183_v45, %v6678_v46  ;;  %v6756_v45 = vld [vmem:[#allocation8 + $0x100] sm:$0xf]  ;;  %v10205_v46 = vld [vmem:[#allocation8 + $0x114] sm:$0xf0] }
  0x9d   :  { %1854 = vmatpush.bf16.msrb.mxu1 %v6993_v55  ;;  %1823 = vmatmul.bf16.vlgmr.msra.gmra.mxu2 %v11217_v29  ;;  %v6873_v55 = vor.u32 %v10231_v47, %v6870_v49  ;;  %v6948_v47 = vld [vmem:[#allocation8 + $0x280] sm:$0xf]  ;;  %v10253_v49 = vld [vmem:[#allocation8 + $0x294] sm:$0xf0] }
  0x9e   :  { %1867 = vmatpush.bf16.msrb.mxu2 %v7185_v56  ;;  %1836 = vmatmul.bf16.vlgmr.msra.gmra.mxu3 %v11221_v31  ;;  %v7065_v56 = vor.u32 %v10279_v50, %v7062_v51  ;;  %v7140_v50 = vld [vmem:[#allocation8 + $0x400] sm:$0xf]  ;;  %v10301_v51 = vld [vmem:[#allocation8 + $0x414] sm:$0xf0] }
  0x9f   :  { %1880 = vmatpush.bf16.msrb.mxu3 %v7377_v60  ;;  %v7257_v60 = vor.u32 %v10327_v52, %v7254_v53  ;;  %v7332_v52 = vld [vmem:[#allocation8 + $0x580] sm:$0xf]  ;;  %v10349_v53 = vld [vmem:[#allocation8 + $0x594] sm:$0xf0] }
  0xa0   :  { %1842 = vmatpush.bf16.msrb.mxu0 %v6777_v2  ;;  %v6657_v2 = vor.u32 %v10177_v57, %v6654_v58  ;;  %v6732_v57 = vld [vmem:[#allocation8 + $0xd0] sm:$0xf]  ;;  %v10199_v58 = vld [vmem:[#allocation8 + $0xe4] sm:$0xf0] }
  0xa1   :  { %1855 = vmatpush.bf16.msrb.mxu1 %v6969_v3  ;;  %v10171_v3 = vld [vmem:[#allocation8 + $0xc] sm:$0xf] }
  0xa2   :  { %1868 = vmatpush.bf16.msrb.mxu2 %v7161_v4  ;;  %v6630_v4 = vld [vmem:[#allocation8 + $0x20] sm:$0xf0] }
  0xa3   :  { %1881 = vmatpush.bf16.msrb.mxu3 %v7353_v8  ;;  %v6822_v8 = vld [vmem:[#allocation8 + $0x1a0] sm:$0xf0]  ;;  %v6633_v17 = vor.u32 %v10171_v3, %v6630_v4  ;;  %v6925_v3 = vor.u32 %v10247_v61, %v6924_v59  ;;  %v7117_v4 = vor.u32 %v10295_v63, %v7116_v62 }
  0xa4   :  { %1843 = vmatpush.bf16.msrb.mxu0 %v6753_v14  ;;  %v6804_v14 = vld [vmem:[#allocation8 + $0x160] sm:$0xf]  ;;  %v6825_v21 = vor.u32 %v10219_v7, %v6822_v8  ;;  %v7309_v8 = vor.u32 %v10343_v1, %v7308_v0  ;;  %v10310_v59 = vld [vmem:[#allocation8 + $0x464] sm:$0xf]  ;;  %v7382_v0 = vld [vmem:[#allocation8 + $0x5f8] sm:$0xf0] }
  0xa5   :  { %1856 = vmatpush.bf16.msrb.mxu1 %v6945_v15  ;;  %v10217_v15 = vld [vmem:[#allocation8 + $0x174] sm:$0xf0]  ;;  %v6900_v7 = vld [vmem:[#allocation8 + $0x220] sm:$0xf]  ;;  %v10358_v63 = vld [vmem:[#allocation8 + $0x5e4] sm:$0xf] }
  0xa6   :  { %1869 = vmatpush.bf16.msrb.mxu2 %v7137_v16  ;;  %v6996_v16 = vld [vmem:[#allocation8 + $0x2e0] sm:$0xf] }
  0xa7   :  { %1882 = vmatpush.bf16.msrb.mxu3 %v7329_v20  ;;  %v10313_v20 = vld [vmem:[#allocation8 + $0x474] sm:$0xf0] }
  0xa8   :  { %1844 = vmatpush.bf16.msrb.mxu0 %v6729_v26  ;;  %v6805_v26 = vor.u32 %v10217_v15, %v6804_v14  ;;  %v6901_v15 = vor.u32 %v10241_v9, %v6900_v7  ;;  %v10256_v7 = vld [vmem:[#allocation8 + $0x2b4] sm:$0xf]  ;;  %v6974_v9 = vld [vmem:[#allocation8 + $0x2c8] sm:$0xf0] }
  0xa9   :  { %1857 = vmatpush.bf16.msrb.mxu1 %v6921_v27  ;;  %v6997_v27 = vor.u32 %v10265_v18, %v6996_v16  ;;  %v10187_v18 = vld [vmem:[#allocation8 + $0x84] sm:$0xf0] }
  0xaa   :  { %1870 = vmatpush.bf16.msrb.mxu2 %v7113_v28  ;;  %v7189_v28 = vor.u32 %v10313_v20, %v7188_v19  ;;  %v6876_v19 = vld [vmem:[#allocation8 + $0x1f0] sm:$0xf]  ;;  %v7285_v20 = vor.u32 %v10337_v13, %v7284_v12  ;;  %v10352_v12 = vld [vmem:[#allocation8 + $0x5b4] sm:$0xf]  ;;  %v7358_v13 = vld [vmem:[#allocation8 + $0x5c8] sm:$0xf0] }
  0xab   :  { %1883 = vmatpush.bf16.msrb.mxu3 %v7305_v35  ;;  %v7381_v35 = vor.u32 %v10361_v24, %v7380_v23  ;;  %v10283_v23 = vld [vmem:[#allocation8 + $0x384] sm:$0xf0]  ;;  %v7260_v24 = vld [vmem:[#allocation8 + $0x4f0] sm:$0xf] }
  0xac   :  { %1845 = vmatpush.bf16.msrb.mxu0 %v6705_v42  ;;  %v6781_v42 = vor.u32 %v10211_v33, %v6780_v32  ;;  %v6660_v32 = vld [vmem:[#allocation8 + $0x40] sm:$0xf]  ;;  %v10181_v33 = vld [vmem:[#allocation8 + $0x54] sm:$0xf0] }
  0xad   :  { %1858 = vmatpush.bf16.msrb.mxu1 %v6897_v43  ;;  %v6973_v43 = vor.u32 %v10259_v37, %v6972_v34  ;;  %v6852_v34 = vld [vmem:[#allocation8 + $0x1c0] sm:$0xf]  ;;  %v10229_v37 = vld [vmem:[#allocation8 + $0x1d4] sm:$0xf0] }
  0xae   :  { %1871 = vmatpush.bf16.msrb.mxu2 %v7089_v44  ;;  %v7165_v44 = vor.u32 %v10307_v39, %v7164_v38  ;;  %v7044_v38 = vld [vmem:[#allocation8 + $0x340] sm:$0xf]  ;;  %v10277_v39 = vld [vmem:[#allocation8 + $0x354] sm:$0xf0] }
  0xaf   :  { %1884 = vmatpush.bf16.msrb.mxu3 %v7281_v48  ;;  %v7357_v48 = vor.u32 %v10355_v41, %v7356_v40  ;;  %v7236_v40 = vld [vmem:[#allocation8 + $0x4c0] sm:$0xf]  ;;  %v10325_v41 = vld [vmem:[#allocation8 + $0x4d4] sm:$0xf0] }
  0xb0   :  { %1846 = vmatpush.bf16.msrb.mxu0 %v6681_v54  ;;  %v6757_v54 = vor.u32 %v10205_v46, %v6756_v45  ;;  %v6853_v45 = vor.u32 %v10229_v37, %v6852_v34  ;;  %v7045_v46 = vor.u32 %v10277_v39, %v7044_v38  ;;  %v10244_v34 = vld [vmem:[#allocation8 + $0x254] sm:$0xf]  ;;  %v6926_v37 = vld [vmem:[#allocation8 + $0x268] sm:$0xf0] }
  0xb1   :  { %1859 = vmatpush.bf16.msrb.mxu1 %v6873_v55  ;;  %v6949_v55 = vor.u32 %v10253_v49, %v6948_v47  ;;  %v6828_v47 = vld [vmem:[#allocation8 + $0x190] sm:$0xf]  ;;  %v10292_v38 = vld [vmem:[#allocation8 + $0x3d4] sm:$0xf]  ;;  %v7118_v39 = vld [vmem:[#allocation8 + $0x3e8] sm:$0xf0] }
  0xb2   :  { %1872 = vmatpush.bf16.msrb.mxu2 %v7065_v56  ;;  %v7141_v56 = vor.u32 %v10301_v51, %v7140_v50  ;;  %v7020_v49 = vld [vmem:[#allocation8 + $0x310] sm:$0xf]  ;;  %v7237_v50 = vor.u32 %v10325_v41, %v7236_v40  ;;  %v10271_v51 = vld [vmem:[#allocation8 + $0x324] sm:$0xf0]  ;;  %v10340_v40 = vld [vmem:[#allocation8 + $0x554] sm:$0xf] }
  0xb3   :  { %1885 = vmatpush.bf16.msrb.mxu3 %v7257_v60  ;;  %v7333_v60 = vor.u32 %v10349_v53, %v7332_v52  ;;  %v7212_v52 = vld [vmem:[#allocation8 + $0x490] sm:$0xf]  ;;  %v10319_v53 = vld [vmem:[#allocation8 + $0x4a4] sm:$0xf0]  ;;  %v7021_v62 = vor.u32 %v10271_v51, %v7020_v49  ;;  %v7310_v41 = vld [vmem:[#allocation8 + $0x568] sm:$0xf0] }
  0xb4   :  { %1847 = vmatpush.bf16.msrb.mxu0 %v6657_v2  ;;  %v6733_v2 = vor.u32 %v10199_v58, %v6732_v57  ;;  %v6998_v58 = vld [vmem:[#allocation8 + $0x2f8] sm:$0xf0]  ;;  %v7213_v1 = vor.u32 %v10319_v53, %v7212_v52  ;;  %v10334_v52 = vld [vmem:[#allocation8 + $0x524] sm:$0xf] }
  0xb5   :  { %1860 = vmatpush.bf16.msrb.mxu1 %v6849_v5  ;;  %v6708_v5 = vld [vmem:[#allocation8 + $0xa0] sm:$0xf]  ;;  %v6902_v49 = vld [vmem:[#allocation8 + $0x238] sm:$0xf0] }
  0xb6   :  { %1873 = vmatpush.bf16.msrb.mxu2 %v7041_v6  ;;  %v10193_v6 = vld [vmem:[#allocation8 + $0xb4] sm:$0xf0]  ;;  %v7094_v51 = vld [vmem:[#allocation8 + $0x3b8] sm:$0xf0] }
  0xb7   :  { %1886 = vmatpush.bf16.msrb.mxu3 %v7233_v10  ;;  %v7092_v10 = vld [vmem:[#allocation8 + $0x3a0] sm:$0xf]  ;;  %v6709_v14 = vor.u32 %v10193_v6, %v6708_v5  ;;  %v10208_v5 = vld [vmem:[#allocation8 + $0x134] sm:$0xf]  ;;  %v6782_v6 = vld [vmem:[#allocation8 + $0x148] sm:$0xf0] }
  0xb8   :  { %1848 = vmatpush.bf16.msrb.mxu0 %v6633_v17  ;;  %v7093_v16 = vor.u32 %v10289_v11, %v7092_v10  ;;  %v6684_v17 = vld [vmem:[#allocation8 + $0x70] sm:$0xf]  ;;  %v10304_v10 = vld [vmem:[#allocation8 + $0x434] sm:$0xf]  ;;  %v7166_v11 = vld [vmem:[#allocation8 + $0x448] sm:$0xf0] }
  0xb9   :  { %1861 = vmatpush.bf16.msrb.mxu1 %v6825_v21  ;;  %v10235_v21 = vld [vmem:[#allocation8 + $0x204] sm:$0xf0]  ;;  %v7286_v53 = vld [vmem:[#allocation8 + $0x538] sm:$0xf0] }
  0xba   :  { %1874 = vmatpush.bf16.msrb.mxu2 %v7017_v22  ;;  %v7068_v22 = vld [vmem:[#allocation8 + $0x370] sm:$0xf] }
  0xbb   :  { %1887 = vmatpush.bf16.msrb.mxu3 %v7209_v25  ;;  %1849 = vmatmul.bf16.vlgmr.msrb.gmra.mxu0 %v11219_v30  ;;  %v10331_v25 = vld [vmem:[#allocation8 + $0x504] sm:$0xf0] }
  0xbc   :  { %1893 = vmatpush.bf16.msra.mxu0 %v6805_v26  ;;  %1862 = vmatmul.bf16.vlgmr.msrb.gmra.mxu1 %v11223_v36  ;;  %v6685_v26 = vor.u32 %v10187_v18, %v6684_v17  ;;  %v10202_v17 = vld [vmem:[#allocation8 + $0x104] sm:$0xf]  ;;  %v6758_v18 = vld [vmem:[#allocation8 + $0x118] sm:$0xf0] }
  0xbd   :  { %1906 = vmatpush.bf16.msra.mxu1 %v6997_v27  ;;  %1875 = vmatmul.bf16.vlgmr.msrb.gmra.mxu2 %v11217_v29  ;;  %v6877_v27 = vor.u32 %v10235_v21, %v6876_v19  ;;  %v10250_v19 = vld [vmem:[#allocation8 + $0x284] sm:$0xf]  ;;  %v6950_v21 = vld [vmem:[#allocation8 + $0x298] sm:$0xf0] }
  0xbe   :  { %1919 = vmatpush.bf16.msra.mxu2 %v7189_v28  ;;  %1888 = vmatmul.bf16.vlgmr.msrb.gmra.mxu3 %v11221_v31  ;;  %v7069_v28 = vor.u32 %v10283_v23, %v7068_v22  ;;  %v10298_v22 = vld [vmem:[#allocation8 + $0x404] sm:$0xf]  ;;  %v7142_v23 = vld [vmem:[#allocation8 + $0x418] sm:$0xf0] }
  0xbf   :  { %1932 = vmatpush.bf16.msra.mxu3 %v7381_v35  ;;  %v7261_v35 = vor.u32 %v10331_v25, %v7260_v24  ;;  %v10346_v24 = vld [vmem:[#allocation8 + $0x584] sm:$0xf]  ;;  %v7334_v25 = vld [vmem:[#allocation8 + $0x598] sm:$0xf0] }
  0xc0   :  { %1894 = vmatpush.bf16.msra.mxu0 %v6781_v42  ;;  %v6661_v42 = vor.u32 %v10181_v33, %v6660_v32  ;;  %v10196_v32 = vld [vmem:[#allocation8 + $0xd4] sm:$0xf]  ;;  %v6734_v33 = vld [vmem:[#allocation8 + $0xe8] sm:$0xf0] }
  0xc1   :  { %1907 = vmatpush.bf16.msra.mxu1 %v6973_v43  ;;  %v6636_v43 = vld [vmem:[#allocation8 + $0x10] sm:$0xf] }
  0xc2   :  { %1920 = vmatpush.bf16.msra.mxu2 %v7165_v44  ;;  %v10175_v44 = vld [vmem:[#allocation8 + $0x24] sm:$0xf0] }
  0xc3   :  { %1933 = vmatpush.bf16.msra.mxu3 %v7357_v48  ;;  %v10223_v48 = vld [vmem:[#allocation8 + $0x1a4] sm:$0xf0]  ;;  %v6637_v57 = vor.u32 %v10175_v44, %v6636_v43  ;;  %v6929_v43 = vor.u32 %v10244_v34, %v6926_v37  ;;  %v7121_v44 = vor.u32 %v10292_v38, %v7118_v39  ;;  %v7748_v34 = vld [vmem:[#allocation7 + $0x2d0] sm:$0xf] }
  0xc4   :  { %1895 = vmatpush.bf16.msra.mxu0 %v6757_v54  ;;  %v10214_v54 = vld [vmem:[#allocation8 + $0x164] sm:$0xf]  ;;  %v6829_v61 = vor.u32 %v10223_v48, %v6828_v47  ;;  %v7313_v48 = vor.u32 %v10340_v40, %v7310_v41  ;;  %v9975_v37 = vld [vmem:[#allocation7 + $0x2e4] sm:$0xf0]  ;;  %v7940_v38 = vld [vmem:[#allocation7 + $0x450] sm:$0xf] }
  0xc5   :  { %1908 = vmatpush.bf16.msra.mxu1 %v6949_v55  ;;  %v6806_v55 = vld [vmem:[#allocation8 + $0x178] sm:$0xf0]  ;;  %v10238_v47 = vld [vmem:[#allocation8 + $0x224] sm:$0xf]  ;;  %v10023_v39 = vld [vmem:[#allocation7 + $0x464] sm:$0xf0] }
  0xc6   :  { %1921 = vmatpush.bf16.msra.mxu2 %v7141_v56  ;;  %v10262_v56 = vld [vmem:[#allocation8 + $0x2e4] sm:$0xf] }
  0xc7   :  { %1934 = vmatpush.bf16.msra.mxu3 %v7333_v60  ;;  %v7190_v60 = vld [vmem:[#allocation8 + $0x478] sm:$0xf0] }
  0xc8   :  { %1896 = vmatpush.bf16.msra.mxu0 %v6733_v2  ;;  %v6809_v2 = vor.u32 %v10214_v54, %v6806_v55  ;;  %v6905_v55 = vor.u32 %v10238_v47, %v6902_v49  ;;  %v7749_v49 = vor.u32 %v9975_v37, %v7748_v34  ;;  %v7844_v34 = vld [vmem:[#allocation7 + $0x390] sm:$0xf] }
  0xc9   :  { %1909 = vmatpush.bf16.msra.mxu1 %v6925_v3  ;;  %v7001_v3 = vor.u32 %v10262_v56, %v6998_v58  ;;  %v6686_v58 = vld [vmem:[#allocation8 + $0x88] sm:$0xf0] }
  0xca   :  { %1922 = vmatpush.bf16.msra.mxu2 %v7117_v4  ;;  %v7193_v4 = vor.u32 %v10310_v59, %v7190_v60  ;;  %v10232_v59 = vld [vmem:[#allocation8 + $0x1f4] sm:$0xf]  ;;  %v7289_v60 = vor.u32 %v10334_v52, %v7286_v53  ;;  %v9921_v52 = vld [vmem:[#allocation7 + $0x134] sm:$0xf0]  ;;  %v7724_v53 = vld [vmem:[#allocation7 + $0x2a0] sm:$0xf] }
  0xcb   :  { %1935 = vmatpush.bf16.msra.mxu3 %v7309_v8  ;;  %v7385_v8 = vor.u32 %v10358_v63, %v7382_v0  ;;  %v7070_v63 = vld [vmem:[#allocation8 + $0x388] sm:$0xf0]  ;;  %v10328_v0 = vld [vmem:[#allocation8 + $0x4f4] sm:$0xf] }
  0xcc   :  { %1897 = vmatpush.bf16.msra.mxu0 %v6709_v14  ;;  %v6785_v14 = vor.u32 %v10208_v5, %v6782_v6  ;;  %v10178_v5 = vld [vmem:[#allocation8 + $0x44] sm:$0xf]  ;;  %v6662_v6 = vld [vmem:[#allocation8 + $0x58] sm:$0xf0] }
  0xcd   :  { %1910 = vmatpush.bf16.msra.mxu1 %v6901_v15  ;;  %v6977_v15 = vor.u32 %v10256_v7, %v6974_v9  ;;  %v10226_v7 = vld [vmem:[#allocation8 + $0x1c4] sm:$0xf]  ;;  %v6854_v9 = vld [vmem:[#allocation8 + $0x1d8] sm:$0xf0] }
  0xce   :  { %1923 = vmatpush.bf16.msra.mxu2 %v7093_v16  ;;  %v7169_v16 = vor.u32 %v10304_v10, %v7166_v11  ;;  %v10274_v10 = vld [vmem:[#allocation8 + $0x344] sm:$0xf]  ;;  %v7046_v11 = vld [vmem:[#allocation8 + $0x358] sm:$0xf0] }
  0xcf   :  { %1936 = vmatpush.bf16.msra.mxu3 %v7285_v20  ;;  %v7361_v20 = vor.u32 %v10352_v12, %v7358_v13  ;;  %v10322_v12 = vld [vmem:[#allocation8 + $0x4c4] sm:$0xf]  ;;  %v7238_v13 = vld [vmem:[#allocation8 + $0x4d8] sm:$0xf0] }
  0xd0   :  { %1898 = vmatpush.bf16.msra.mxu0 %v6685_v26  ;;  %v6761_v26 = vor.u32 %v10202_v17, %v6758_v18  ;;  %v6857_v18 = vor.u32 %v10226_v7, %v6854_v9  ;;  %v7892_v7 = vld [vmem:[#allocation7 + $0x3f0] sm:$0xf] }
  0xd1   :  { %1911 = vmatpush.bf16.msra.mxu1 %v6877_v27  ;;  %v6953_v27 = vor.u32 %v10250_v19, %v6950_v21  ;;  %v7049_v19 = vor.u32 %v10274_v10, %v7046_v11  ;;  %v6830_v21 = vld [vmem:[#allocation8 + $0x1a8] sm:$0xf0]  ;;  %v8084_v9 = vld [vmem:[#allocation7 + $0x570] sm:$0xf]  ;;  %v10059_v10 = vld [vmem:[#allocation7 + $0x584] sm:$0xf0] }
  0xd2   :  { %1924 = vmatpush.bf16.msra.mxu2 %v7069_v28  ;;  %v7145_v28 = vor.u32 %v10298_v22, %v7142_v23  ;;  %v10268_v22 = vld [vmem:[#allocation8 + $0x314] sm:$0xf] }
  0xd3   :  { %1937 = vmatpush.bf16.msra.mxu3 %v7261_v35  ;;  %v7337_v35 = vor.u32 %v10346_v24, %v7334_v25  ;;  %v7241_v24 = vor.u32 %v10322_v12, %v7238_v13  ;;  %v7022_v25 = vld [vmem:[#allocation8 + $0x328] sm:$0xf0] }
  0xd4   :  { %1899 = vmatpush.bf16.msra.mxu0 %v6661_v42  ;;  %v6737_v42 = vor.u32 %v10196_v32, %v6734_v33  ;;  %v7556_v32 = vld [vmem:[#allocation7 + $0x150] sm:$0xf]  ;;  %v9927_v33 = vld [vmem:[#allocation7 + $0x164] sm:$0xf0]  ;;  %v7025_v41 = vor.u32 %v10268_v22, %v7022_v25  ;;  %v10053_v22 = vld [vmem:[#allocation7 + $0x554] sm:$0xf0] }
  0xd5   :  { %1912 = vmatpush.bf16.msra.mxu1 %v6853_v45  ;;  %v10190_v45 = vld [vmem:[#allocation8 + $0xa4] sm:$0xf]  ;;  %v7460_v25 = vld [vmem:[#allocation7 + $0x90] sm:$0xf] }
  0xd6   :  { %1925 = vmatpush.bf16.msra.mxu2 %v7045_v46  ;;  %v6710_v46 = vld [vmem:[#allocation8 + $0xb8] sm:$0xf0] }
  0xd7   :  { %1938 = vmatpush.bf16.msra.mxu3 %v7237_v50  ;;  %v10286_v50 = vld [vmem:[#allocation8 + $0x3a4] sm:$0xf]  ;;  %v6713_v54 = vor.u32 %v10190_v45, %v6710_v46  ;;  %v7557_v46 = vor.u32 %v9927_v33, %v7556_v32  ;;  %v9951_v33 = vld [vmem:[#allocation7 + $0x224] sm:$0xf0] }
  0xd8   :  { %1900 = vmatpush.bf16.msra.mxu0 %v6637_v57  ;;  %v7097_v56 = vor.u32 %v10286_v50, %v7094_v51  ;;  %v10184_v57 = vld [vmem:[#allocation8 + $0x74] sm:$0xf]  ;;  %v7941_v50 = vor.u32 %v10023_v39, %v7940_v38  ;;  %v7532_v51 = vld [vmem:[#allocation7 + $0x120] sm:$0xf]  ;;  %v8036_v38 = vld [vmem:[#allocation7 + $0x510] sm:$0xf] }
  0xd9   :  { %1913 = vmatpush.bf16.msra.mxu1 %v6829_v61  ;;  %v6878_v61 = vld [vmem:[#allocation8 + $0x208] sm:$0xf0]  ;;  %v10047_v39 = vld [vmem:[#allocation7 + $0x524] sm:$0xf0] }
  0xda   :  { %1926 = vmatpush.bf16.msra.mxu2 %v7021_v62  ;;  %v10280_v62 = vld [vmem:[#allocation8 + $0x374] sm:$0xf] }
  0xdb   :  { %1939 = vmatpush.bf16.msra.mxu3 %v7213_v1  ;;  %1901 = vmatmul.bf16.vlgmr.msra.gmra.mxu0 %v11219_v30  ;;  %v7262_v1 = vld [vmem:[#allocation8 + $0x508] sm:$0xf0] }
  0xdc   :  { %1945 = vmatpush.bf16.msrb.mxu0 %v6809_v2  ;;  %1914 = vmatmul.bf16.vlgmr.msra.gmra.mxu1 %v11223_v36  ;;  %v6689_v2 = vor.u32 %v10184_v57, %v6686_v58  ;;  %v10017_v57 = vld [vmem:[#allocation7 + $0x434] sm:$0xf0] }
  0xdd   :  { %1958 = vmatpush.bf16.msrb.mxu1 %v7001_v3  ;;  %1927 = vmatmul.bf16.vlgmr.msra.gmra.mxu2 %v11217_v29  ;;  %v6881_v3 = vor.u32 %v10232_v59, %v6878_v61  ;;  %v10065_v61 = vld [vmem:[#allocation7 + $0x5b4] sm:$0xf0] }
  0xde   :  { %1971 = vmatpush.bf16.msrb.mxu2 %v7193_v4  ;;  %1940 = vmatmul.bf16.vlgmr.msra.gmra.mxu3 %v11221_v31  ;;  %v7073_v4 = vor.u32 %v10280_v62, %v7070_v63  ;;  %v1694_v17 = vpop.f32.mrf.mxu0  ;;  %v7533_v63 = vor.u32 %v9921_v52, %v7532_v51 }
  0xdf   :  { %1984 = vmatpush.bf16.msrb.mxu3 %v7385_v8  ;;  %v7265_v8 = vor.u32 %v10328_v0, %v7262_v1 }
  0xe0   :  { %1946 = vmatpush.bf16.msrb.mxu0 %v6785_v14  ;;  %v6665_v14 = vor.u32 %v10178_v5, %v6662_v6  ;;  %v1707_v23 = vpop.f32.mrf.mxu1  ;;  %v9963_v6 = vld [vmem:[#allocation7 + $0x284] sm:$0xf0] }
  0xe1   :  { %1959 = vmatpush.bf16.msrb.mxu1 %v6977_v15  ;;  %v10172_v15 = vld [vmem:[#allocation8 + $0x14] sm:$0xf] }
  0xe2   :  { %1972 = vmatpush.bf16.msrb.mxu2 %v7169_v16  ;;  %v6638_v16 = vld [vmem:[#allocation8 + $0x28] sm:$0xf0] }
  0xe3   :  { %1985 = vmatpush.bf16.msrb.mxu3 %v7361_v20  ;;  %v10220_v20 = vld [vmem:[#allocation8 + $0x194] sm:$0xf] }
  0xe4   :  { %1947 = vmatpush.bf16.msrb.mxu0 %v6761_v26  ;;  %v10316_v26 = vld [vmem:[#allocation8 + $0x494] sm:$0xf]  ;;  %v6833_v40 = vor.u32 %v10220_v20, %v6830_v21  ;;  %v7868_v20 = vld [vmem:[#allocation7 + $0x3c0] sm:$0xf]  ;;  %v10005_v21 = vld [vmem:[#allocation7 + $0x3d4] sm:$0xf0] }
  0xe5   :  { %1960 = vmatpush.bf16.msrb.mxu1 %v6953_v27  ;;  %v7214_v27 = vld [vmem:[#allocation8 + $0x4a8] sm:$0xf0] }
  0xe6   :  { %1973 = vmatpush.bf16.msrb.mxu2 %v7145_v28  ;;  %v1708_v28 = vadd.f32 %v1707_v23, %v1694_v17  ;;  %v7217_v45 = vor.u32 %v10316_v26, %v7214_v27  ;;  %v1696_v59 = vpop.f32.mrf.mxu0  ;;  %v9909_v17 = vld [vmem:[#allocation7 + $0xd4] sm:$0xf0]  ;;  %v9903_v26 = vld [vmem:[#allocation7 + $0xa4] sm:$0xf0]  ;;  %v7652_v27 = vld [vmem:[#allocation7 + $0x210] sm:$0xf] }
  0xe7   :  { %1986 = vmatpush.bf16.msrb.mxu3 %v7337_v35  ;;  %v6641_v35 = vor.u32 %v10172_v15, %v6638_v16  ;;  %v7484_v16 = vld [vmem:[#allocation7 + $0xc0] sm:$0xf] }
  0xe8   :  { %1948 = vmatpush.bf16.msrb.mxu0 %v6737_v42  ;;  %v8132_v42 = vld [vmem:[#allocation7 + $0x5d0] sm:$0xf]  ;;  %v1709_v62 = vpop.f32.mrf.mxu1 }
  0xe9   :  { %1961 = vmatpush.bf16.msrb.mxu1 %v6929_v43  ;;  %v10071_v43 = vld [vmem:[#allocation7 + $0x5e4] sm:$0xf0] }
  0xea   :  { %1974 = vmatpush.bf16.msrb.mxu2 %v7121_v44  ;;  %v1720_v44 = vpop.f32.mrf.mxu2  ;;  %v9891_v62 = vld [vmem:[#allocation7 + $0x44] sm:$0xf0] }
  0xeb   :  { %1987 = vmatpush.bf16.msrb.mxu3 %v7313_v48  ;;  %v1721_v47 = vadd.f32 %v1720_v44, %v1708_v28  ;;  %v1733_v48 = vpop.f32.mrf.mxu3  ;;  %v9897_v44 = vld [vmem:[#allocation7 + $0x74] sm:$0xf0] }
  0xec   :  { %1949 = vmatpush.bf16.msrb.mxu0 %v6713_v54  ;;  %v8133_v54 = vor.u32 %v10071_v43, %v8132_v42  ;;  %v7436_v43 = vld [vmem:[#allocation7 + $0x60] sm:$0xf] }
  0xed   :  { %1962 = vmatpush.bf16.msrb.mxu1 %v6905_v55  ;;  %v9969_v55 = vld [vmem:[#allocation7 + $0x2b4] sm:$0xf0]  ;;  %v11245_v58 = vadd.f32 %v1733_v48, %v1721_v47  ;;  %v8037_v47 = vor.u32 %v10047_v39, %v8036_v38  ;;  %v8492_v38 = vld [vmem:[#allocation7 + $0x8a0] sm:$0xf] }
  0xee   :  { %1975 = vmatpush.bf16.msrb.mxu2 %v7097_v56  ;;  %v7916_v56 = vld [vmem:[#allocation7 + $0x420] sm:$0xf]  ;;  %v7725_v0 = vor.u32 %v9969_v55, %v7724_v53  ;;  %v9945_v48 = vld [vmem:[#allocation7 + $0x1f4] sm:$0xf0]  ;;  %v7437_v55 = vor.u32 %v9897_v44, %v7436_v43  ;;  %v11253_v43 = vld [vmem:[#allocation1] sm:$0xff] }
  0xef   :  { %1988 = vmatpush.bf16.msrb.mxu3 %v7289_v60  ;;  %v8108_v60 = vld [vmem:[#allocation7 + $0x5a0] sm:$0xf]  ;;  %v7917_v1 = vor.u32 %v10017_v57, %v7916_v56  ;;  %v9966_v44 = vld [vmem:[#allocation7 + $0x2a4] sm:$0xf] }
  0xf0   :  { %1950 = vmatpush.bf16.msrb.mxu0 %v6689_v2  ;;  %v7508_v2 = vld [vmem:[#allocation7 + $0xf0] sm:$0xf]  ;;  %v8109_v5 = vor.u32 %v10065_v61, %v8108_v60  ;;  %v8012_v53 = vld [vmem:[#allocation7 + $0x4e0] sm:$0xf] }
  0xf1   :  { %1963 = vmatpush.bf16.msrb.mxu1 %v6881_v3  ;;  %v9915_v3 = vld [vmem:[#allocation7 + $0x104] sm:$0xf0]  ;;  %v7412_v61 = vld [vmem:[#allocation7 + $0x30] sm:$0xf] }
  0xf2   :  { %1976 = vmatpush.bf16.msrb.mxu2 %v7073_v4  ;;  %v7700_v4 = vld [vmem:[#allocation7 + $0x270] sm:$0xf]  ;;  %v1722_v11 = vpop.f32.mrf.mxu2  ;;  %v7509_v12 = vor.u32 %v9915_v3, %v7508_v2  ;;  %v9939_v2 = vld [vmem:[#allocation7 + $0x1c4] sm:$0xf0] }
  0xf3   :  { %1989 = vmatpush.bf16.msrb.mxu3 %v7265_v8  ;;  %v10011_v8 = vld [vmem:[#allocation7 + $0x404] sm:$0xf0]  ;;  %v1735_v13 = vpop.f32.mrf.mxu3  ;;  %v7796_v3 = vld [vmem:[#allocation7 + $0x330] sm:$0xf] }
  0xf4   :  { %1951 = vmatpush.bf16.msrb.mxu0 %v6665_v14  ;;  %v7701_v14 = vor.u32 %v9963_v6, %v7700_v4  ;;  %v7893_v15 = vor.u32 %v10011_v8, %v7892_v7  ;;  %v9987_v4 = vld [vmem:[#allocation7 + $0x344] sm:$0xf0]  ;;  %v7413_v7 = vor.u32 %v9891_v62, %v7412_v61  ;;  %v7388_v8 = vld [vmem:[#allocation7] sm:$0xf]  ;;  %v9933_v13 = vld [vmem:[#allocation7 + $0x194] sm:$0xf0] }
  0xf5   :  { %1964 = vmatpush.bf16.msrb.mxu1 %v6857_v18  ;;  %v7676_v18 = vld [vmem:[#allocation7 + $0x240] sm:$0xf]  ;;  %v10035_v6 = vld [vmem:[#allocation7 + $0x4c4] sm:$0xf0]  ;;  %v7797_v11 = vor.u32 %v9987_v4, %v7796_v3  ;;  %v9960_v61 = vld [vmem:[#allocation7 + $0x274] sm:$0xf] }
  0xf6   :  { %1977 = vmatpush.bf16.msrb.mxu2 %v7049_v19  ;;  %v9957_v19 = vld [vmem:[#allocation7 + $0x254] sm:$0xf0]  ;;  %v7702_v62 = vld [vmem:[#allocation7 + $0x288] sm:$0xf0]  ;;  %v8444_v4 = vld [vmem:[#allocation7 + $0x840] sm:$0xf] }
  0xf7   :  { %1990 = vmatpush.bf16.msrb.mxu3 %v7241_v24  ;;  %v7869_v24 = vor.u32 %v10005_v21, %v7868_v20  ;;  %v8324_v20 = vld [vmem:[#allocation7 + $0x750] sm:$0xf]  ;;  %v10119_v21 = vld [vmem:[#allocation7 + $0x764] sm:$0xf0]  ;;  %v10101_v3 = vld [vmem:[#allocation7 + $0x6d4] sm:$0xf0] }
  0xf8   :  { %1952 = vmatpush.bf16.msrb.mxu0 %v6641_v35  ;;  %v1746_v23 = vpop.f32.mrf.mxu0  ;;  %v9999_v35 = vld [vmem:[#allocation7 + $0x3a4] sm:$0xf0] }
  0xf9   :  { %1965 = vmatpush.bf16.msrb.mxu1 %v6833_v40  ;;  %v1759_v28 = vpop.f32.mrf.mxu1  ;;  %v7461_v40 = vor.u32 %v9903_v26, %v7460_v25  ;;  %v7845_v42 = vor.u32 %v9999_v35, %v7844_v34  ;;  %v9972_v26 = vld [vmem:[#allocation7 + $0x2d4] sm:$0xf]  ;;  %v8300_v35 = vld [vmem:[#allocation7 + $0x720] sm:$0xf] }
  0xfa   :  { %1978 = vmatpush.bf16.msrb.mxu2 %v7025_v41  ;;  %v1760_v37 = vadd.f32 %v1759_v28, %v1746_v23  ;;  %v7653_v41 = vor.u32 %v9951_v33, %v7652_v27  ;;  %v9924_v23 = vld [vmem:[#allocation7 + $0x154] sm:$0xf]  ;;  %v7750_v27 = vld [vmem:[#allocation7 + $0x2e8] sm:$0xf0] }
  0xfb   :  { %1991 = vmatpush.bf16.msrb.mxu3 %v7217_v45  ;;  %1953 = vmatmul.bf16.vlgmr.msrb.gmra.mxu0 %v11219_v30  ;;  %v8085_v30 = vor.u32 %v10059_v10, %v8084_v9  ;;  %v7628_v45 = vld [vmem:[#allocation7 + $0x1e0] sm:$0xf]  ;;  %v9885_v9 = vld [vmem:[#allocation7 + $0x14] sm:$0xf0]  ;;  %v7753_v39 = vor.u32 %v9972_v26, %v7750_v27 }
  0xfc   :  { %3451 = vmatpush.bf16.msra.mxu0 %v7557_v46  ;;  %1966 = vmatmul.bf16.vlgmr.msrb.gmra.mxu1 %v11223_v36  ;;  %v7485_v36 = vor.u32 %v9909_v17, %v7484_v16  ;;  %v7629_v59 = vor.u32 %v9945_v48, %v7628_v45  ;;  %v9981_v17 = vld [vmem:[#allocation7 + $0x314] sm:$0xf0]  ;;  %v7726_v45 = vld [vmem:[#allocation7 + $0x2b8] sm:$0xf0]  ;;  %v11259_v48 = vld [vmem:[#allocation1 + $0x1b] sm:$0xff] }
  0xfd   :  { %3464 = vmatpush.bf16.msra.mxu1 %v7749_v49  ;;  %1979 = vmatmul.bf16.vlgmr.msrb.gmra.mxu2 %v11217_v29  ;;  %v8060_v29 = vld [vmem:[#allocation7 + $0x540] sm:$0xf]  ;;  %v10089_v26 = vld [vmem:[#allocation7 + $0x674] sm:$0xf0] }
  0xfe   :  { %3477 = vmatpush.bf16.msra.mxu2 %v7941_v50  ;;  %1992 = vmatmul.bf16.vlgmr.msrb.gmra.mxu3 %v11221_v31  ;;  %v7677_v31 = vor.u32 %v9957_v19, %v7676_v18  ;;  %v8061_v32 = vor.u32 %v10053_v22, %v8060_v29  ;;  %v7820_v49 = vld [vmem:[#allocation7 + $0x360] sm:$0xf]  ;;  %v9993_v50 = vld [vmem:[#allocation7 + $0x374] sm:$0xf0]  ;;  %v8516_v29 = vld [vmem:[#allocation7 + $0x8d0] sm:$0xf]  ;;  %v7389_v22 = vor.u32 %v9885_v9, %v7388_v8 }
  0xff   :  { %3490 = vmatpush.bf16.msra.mxu3 %v8133_v54  ;;  %v10041_v54 = vld [vmem:[#allocation7 + $0x4f4] sm:$0xf0]  ;;  %v7821_v60 = vor.u32 %v9993_v50, %v7820_v49  ;;  %v7964_v18 = vld [vmem:[#allocation7 + $0x480] sm:$0xf]  ;;  %v7486_v8 = vld [vmem:[#allocation7 + $0xd8] sm:$0xf0] }
 0x100   :  { %3452 = vmatpush.bf16.msra.mxu0 %v7533_v63  ;;  %v1772_v46 = vpop.f32.mrf.mxu2  ;;  %v1748_v57 = vpop.f32.mrf.mxu0  ;;  %v7604_v63 = vld [vmem:[#allocation7 + $0x1b0] sm:$0xf]  ;;  %v9954_v9 = vld [vmem:[#allocation7 + $0x244] sm:$0xf]  ;;  %v8396_v27 = vld [vmem:[#allocation7 + $0x7e0] sm:$0xf] }
 0x101   :  { %3465 = vmatpush.bf16.msra.mxu1 %v7725_v0  ;;  %v1773_v51 = vadd.f32 %v1772_v46, %v1760_v37  ;;  %v1785_v52 = vpop.f32.mrf.mxu3  ;;  %v1761_v0 = vpop.f32.mrf.mxu1  ;;  %v7605_v10 = vor.u32 %v9939_v2, %v7604_v63  ;;  %v10113_v37 = vld [vmem:[#allocation7 + $0x734] sm:$0xf0]  ;;  %v11255_v46 = vld [vmem:[#allocation1 + $0x12] sm:$0xff]  ;;  %v10155_v57 = vld [vmem:[#allocation7 + $0x884] sm:$0xf0] }
 0x102   :  { %3478 = vmatpush.bf16.msra.mxu2 %v7917_v1  ;;  %v8013_v1 = vor.u32 %v10041_v54, %v8012_v53  ;;  %v8301_v49 = vor.u32 %v10113_v37, %v8300_v35  ;;  %v10107_v53 = vld [vmem:[#allocation7 + $0x704] sm:$0xf0]  ;;  %v8468_v54 = vld [vmem:[#allocation7 + $0x870] sm:$0xf]  ;;  %v8252_v2 = vld [vmem:[#allocation7 + $0x6c0] sm:$0xf] }
 0x103   :  { %3491 = vmatpush.bf16.msra.mxu3 %v8109_v5  ;;  %v11251_v56 = vadd.f32 %v1785_v52, %v1773_v51  ;;  %v7988_v5 = vld [vmem:[#allocation7 + $0x4b0] sm:$0xf]  ;;  %v8469_v0 = vor.u32 %v10155_v57, %v8468_v54  ;;  %v7438_v35 = vld [vmem:[#allocation7 + $0x78] sm:$0xf0]  ;;  %v9888_v57 = vld [vmem:[#allocation7 + $0x34] sm:$0xf] }
 0x104   :  { %3453 = vmatpush.bf16.msra.mxu0 %v7509_v12  ;;  %v7580_v12 = vld [vmem:[#allocation7 + $0x180] sm:$0xf]  ;;  %v7989_v16 = vor.u32 %v10035_v6, %v7988_v5  ;;  %v8276_v52 = vld [vmem:[#allocation7 + $0x6f0] sm:$0xf]  ;;  %v7705_v5 = vor.u32 %v9960_v61, %v7702_v62  ;;  %v10149_v6 = vld [vmem:[#allocation7 + $0x854] sm:$0xf0] }
 0x105   :  { %3466 = vmatpush.bf16.msra.mxu1 %v7701_v14  ;;  %v7772_v14 = vld [vmem:[#allocation7 + $0x300] sm:$0xf]  ;;  %v8277_v63 = vor.u32 %v10107_v53, %v8276_v52  ;;  %v8372_v52 = vld [vmem:[#allocation7 + $0x7b0] sm:$0xf]  ;;  %v7606_v61 = vld [vmem:[#allocation7 + $0x1c8] sm:$0xf0] }
 0x106   :  { %3479 = vmatpush.bf16.msra.mxu2 %v7893_v15  ;;  %v7773_v25 = vor.u32 %v9981_v17, %v7772_v14  ;;  %v8420_v17 = vld [vmem:[#allocation7 + $0x810] sm:$0xf] }
 0x107   :  { %3492 = vmatpush.bf16.msra.mxu3 %v8085_v30  ;;  %v10029_v30 = vld [vmem:[#allocation7 + $0x494] sm:$0xf0] }
 0x108   :  { %3454 = vmatpush.bf16.msra.mxu0 %v7485_v36  ;;  %v1774_v15 = vpop.f32.mrf.mxu2  ;;  %v10167_v36 = vld [vmem:[#allocation7 + $0x8e4] sm:$0xf0]  ;;  %v7965_v28 = vor.u32 %v10029_v30, %v7964_v18 }
 0x109   :  { %3467 = vmatpush.bf16.msra.mxu1 %v7677_v31  ;;  %v1787_v19 = vpop.f32.mrf.mxu3  ;;  %v7558_v31 = vld [vmem:[#allocation7 + $0x168] sm:$0xf0]  ;;  %v8517_v33 = vor.u32 %v10167_v36, %v8516_v29  ;;  %v8228_v15 = vld [vmem:[#allocation7 + $0x690] sm:$0xf] }
 0x10a   :  { %3480 = vmatpush.bf16.msra.mxu2 %v7869_v24  ;;  %v7581_v24 = vor.u32 %v9933_v13, %v7580_v12  ;;  %v7561_v34 = vor.u32 %v9924_v23, %v7558_v31  ;;  %v8445_v13 = vor.u32 %v10149_v6, %v8444_v4  ;;  %v10143_v19 = vld [vmem:[#allocation7 + $0x824] sm:$0xf0]  ;;  %v7654_v36 = vld [vmem:[#allocation7 + $0x228] sm:$0xf0]  ;;  %v10125_v4 = vld [vmem:[#allocation7 + $0x794] sm:$0xf0] }
 0x10b   :  { %3493 = vmatpush.bf16.msra.mxu3 %v8061_v32  ;;  %v8325_v32 = vor.u32 %v10119_v21, %v8324_v20  ;;  %v9900_v20 = vld [vmem:[#allocation7 + $0x94] sm:$0xf]  ;;  %v7462_v21 = vld [vmem:[#allocation7 + $0xa8] sm:$0xf0]  ;;  %v8421_v31 = vor.u32 %v10143_v19, %v8420_v17 }
 0x10c   :  { %3455 = vmatpush.bf16.msra.mxu0 %v7461_v40  ;;  %v10161_v40 = vld [vmem:[#allocation7 + $0x8b4] sm:$0xf0]  ;;  %v10116_v17 = vld [vmem:[#allocation7 + $0x754] sm:$0xf] }
 0x10d   :  { %3468 = vmatpush.bf16.msra.mxu1 %v7653_v41  ;;  %v9918_v41 = vld [vmem:[#allocation7 + $0x124] sm:$0xf]  ;;  %v8493_v50 = vor.u32 %v10161_v40, %v8492_v38  ;;  %v7630_v40 = vld [vmem:[#allocation7 + $0x1f8] sm:$0xf0] }
 0x10e   :  { %3481 = vmatpush.bf16.msra.mxu2 %v7845_v42  ;;  %v7534_v42 = vld [vmem:[#allocation7 + $0x138] sm:$0xf0] }
 0x10f   :  { %3494 = vmatpush.bf16.msra.mxu3 %v8037_v47  ;;  %v11257_v47 = vld [vmem:[#allocation1 + $0x9] sm:$0xff]  ;;  %v7537_v51 = vor.u32 %v9918_v41, %v7534_v42 }
 0x110   :  { %3456 = vmatpush.bf16.msra.mxu0 %v7437_v55  ;;  %v7729_v55 = vor.u32 %v9966_v44, %v7726_v45 }
 0x111   :  { %3469 = vmatpush.bf16.msra.mxu1 %v7629_v59  ;;  %v9912_v59 = vld [vmem:[#allocation7 + $0xf4] sm:$0xf] }
 0x112   :  { %3482 = vmatpush.bf16.msra.mxu2 %v7821_v60  ;;  %v7510_v60 = vld [vmem:[#allocation7 + $0x108] sm:$0xf0] }
 0x113   :  { %3495 = vmatpush.bf16.msra.mxu3 %v8013_v1  ;;  %v7513_v1 = vor.u32 %v9912_v59, %v7510_v60  ;;  %v7414_v59 = vld [vmem:[#allocation7 + $0x48] sm:$0xf0]  ;;  %v9936_v60 = vld [vmem:[#allocation7 + $0x1b4] sm:$0xf] }
 0x114   :  { %3457 = vmatpush.bf16.msra.mxu0 %v7413_v7  ;;  %v9906_v7 = vld [vmem:[#allocation7 + $0xc4] sm:$0xf] }
 0x115   :  { %3470 = vmatpush.bf16.msra.mxu1 %v7605_v10  ;;  %v7678_v10 = vld [vmem:[#allocation7 + $0x258] sm:$0xf0]  ;;  %v7489_v14 = vor.u32 %v9906_v7, %v7486_v8  ;;  %v7609_v7 = vor.u32 %v9936_v60, %v7606_v61  ;;  %v10002_v60 = vld [vmem:[#allocation7 + $0x3c4] sm:$0xf] }
 0x116   :  { %3483 = vmatpush.bf16.msra.mxu2 %v7797_v11  ;;  %v8253_v11 = vor.u32 %v10101_v3, %v8252_v2  ;;  %v7681_v30 = vor.u32 %v9954_v9, %v7678_v10  ;;  %v7417_v2 = vor.u32 %v9888_v57, %v7414_v59  ;;  %v8348_v3 = vld [vmem:[#allocation7 + $0x780] sm:$0xf]  ;;  %v7390_v8 = vld [vmem:[#allocation7 + $0x18] sm:$0xf0]  ;;  %v9930_v9 = vld [vmem:[#allocation7 + $0x184] sm:$0xf] }
 0x117   :  { %3496 = vmatpush.bf16.msra.mxu3 %v7989_v16  ;;  %v10095_v16 = vld [vmem:[#allocation7 + $0x6a4] sm:$0xf0]  ;;  %v7582_v10 = vld [vmem:[#allocation7 + $0x198] sm:$0xf0] }
 0x118   :  { %3458 = vmatpush.bf16.msra.mxu0 %v7389_v22  ;;  %v1798_v12 = vpop.f32.mrf.mxu0  ;;  %v9948_v22 = vld [vmem:[#allocation7 + $0x214] sm:$0xf]  ;;  %v8229_v23 = vor.u32 %v10095_v16, %v8228_v15  ;;  %v8134_v16 = vld [vmem:[#allocation7 + $0x5e8] sm:$0xf0]  ;;  %v7870_v61 = vld [vmem:[#allocation7 + $0x3d8] sm:$0xf0] }
 0x119   :  { %3471 = vmatpush.bf16.msra.mxu1 %v7581_v24  ;;  %v1811_v18 = vpop.f32.mrf.mxu1  ;;  %v7465_v24 = vor.u32 %v9900_v20, %v7462_v21  ;;  %v10164_v20 = vld [vmem:[#allocation7 + $0x8d4] sm:$0xf]  ;;  %v8518_v21 = vld [vmem:[#allocation7 + $0x8e8] sm:$0xf0] }
 0x11a   :  { %3484 = vmatpush.bf16.msra.mxu2 %v7773_v25  ;;  %v1812_v29 = vadd.f32 %v1811_v18, %v1798_v12  ;;  %v8204_v25 = vld [vmem:[#allocation7 + $0x660] sm:$0xf]  ;;  %v10020_v12 = vld [vmem:[#allocation7 + $0x454] sm:$0xf]  ;;  %v8326_v18 = vld [vmem:[#allocation7 + $0x768] sm:$0xf0] }
 0x11b   :  { %3497 = vmatpush.bf16.msra.mxu3 %v7965_v28  ;;  %3459 = vmatmul.bf16.vlgmr.msra.gmra.mxu0 %v11253_v43  ;;  %v8205_v41 = vor.u32 %v10089_v26, %v8204_v25  ;;  %v10062_v25 = vld [vmem:[#allocation7 + $0x5a4] sm:$0xf]  ;;  %v8521_v26 = vor.u32 %v10164_v20, %v8518_v21 }
 0x11c   :  { %3503 = vmatpush.bf16.msrb.mxu0 %v8325_v32  ;;  %3472 = vmatmul.bf16.vlgmr.msra.gmra.mxu1 %v11257_v47  ;;  %v7657_v32 = vor.u32 %v9948_v22, %v7654_v36 }
 0x11d   :  { %3516 = vmatpush.bf16.msrb.mxu1 %v8517_v33  ;;  %3485 = vmatmul.bf16.vlgmr.msra.gmra.mxu2 %v11255_v46  ;;  %v10137_v33 = vld [vmem:[#allocation7 + $0x7f4] sm:$0xf0] }
 0x11e   :  { %3529 = vmatpush.bf16.msrb.mxu2 %v7561_v34  ;;  %3498 = vmatmul.bf16.vlgmr.msra.gmra.mxu3 %v11259_v48  ;;  %v9894_v34 = vld [vmem:[#allocation7 + $0x64] sm:$0xf]  ;;  %v8397_v45 = vor.u32 %v10137_v33, %v8396_v27  ;;  %v8110_v27 = vld [vmem:[#allocation7 + $0x5b8] sm:$0xf0]  ;;  %v11267_v33 = vld [vmem:[#allocation1 + $0x24] sm:$0xff] }
 0x11f   :  { %3542 = vmatpush.bf16.msrb.mxu3 %v7753_v39  ;;  %v9942_v39 = vld [vmem:[#allocation7 + $0x1e4] sm:$0xf] }
 0x120   :  { %3504 = vmatpush.bf16.msrb.mxu0 %v8301_v49  ;;  %v1824_v28 = vpop.f32.mrf.mxu2  ;;  %v1800_v44 = vpop.f32.mrf.mxu0  ;;  %v7441_v49 = vor.u32 %v9894_v34, %v7438_v35  ;;  %v7633_v54 = vor.u32 %v9942_v39, %v7630_v40  ;;  %v10158_v34 = vld [vmem:[#allocation7 + $0x8a4] sm:$0xf]  ;;  %v8494_v35 = vld [vmem:[#allocation7 + $0x8b8] sm:$0xf0]  ;;  %v8113_v39 = vor.u32 %v10062_v25, %v8110_v27 }
 0x121   :  { %3517 = vmatpush.bf16.msrb.mxu1 %v8493_v50  ;;  %v1825_v37 = vadd.f32 %v1824_v28, %v1812_v29  ;;  %v1837_v38 = vpop.f32.mrf.mxu3  ;;  %v8180_v50 = vld [vmem:[#allocation7 + $0x630] sm:$0xf]  ;;  %v1813_v53 = vpop.f32.mrf.mxu1  ;;  %v7585_v29 = vor.u32 %v9930_v9, %v7582_v10  ;;  %v10110_v28 = vld [vmem:[#allocation7 + $0x724] sm:$0xf]  ;;  %v7894_v44 = vld [vmem:[#allocation7 + $0x408] sm:$0xf0] }
 0x122   :  { %3530 = vmatpush.bf16.msrb.mxu2 %v7537_v51  ;;  %v10083_v51 = vld [vmem:[#allocation7 + $0x644] sm:$0xf0]  ;;  %v10152_v53 = vld [vmem:[#allocation7 + $0x874] sm:$0xf]  ;;  %v7846_v10 = vld [vmem:[#allocation7 + $0x3a8] sm:$0xf0] }
 0x123   :  { %3543 = vmatpush.bf16.msrb.mxu3 %v7729_v55  ;;  %v11265_v42 = vadd.f32 %v1837_v38, %v1825_v37  ;;  %v10131_v55 = vld [vmem:[#allocation7 + $0x7c4] sm:$0xf0]  ;;  %v8181_v62 = vor.u32 %v10083_v51, %v8180_v50  ;;  %v11269_v37 = vld [vmem:[#allocation1 + $0x2d] sm:$0xff]  ;;  %v8086_v50 = vld [vmem:[#allocation7 + $0x588] sm:$0xf0] }
 0x124   :  { %3505 = vmatpush.bf16.msrb.mxu0 %v8277_v63  ;;  %v8156_v63 = vld [vmem:[#allocation7 + $0x600] sm:$0xf]  ;;  %v10104_v51 = vld [vmem:[#allocation7 + $0x6f4] sm:$0xf]  ;;  %v10086_v25 = vld [vmem:[#allocation7 + $0x664] sm:$0xf] }
 0x125   :  { %3518 = vmatpush.bf16.msrb.mxu1 %v8469_v0  ;;  %v10077_v0 = vld [vmem:[#allocation7 + $0x614] sm:$0xf0]  ;;  %v9996_v9 = vld [vmem:[#allocation7 + $0x394] sm:$0xf] }
 0x126   :  { %3531 = vmatpush.bf16.msrb.mxu2 %v7513_v1  ;;  %v8373_v1 = vor.u32 %v10131_v55, %v8372_v52  ;;  %v8157_v15 = vor.u32 %v10077_v0, %v8156_v63  ;;  %v8278_v52 = vld [vmem:[#allocation7 + $0x708] sm:$0xf0]  ;;  %v8062_v0 = vld [vmem:[#allocation7 + $0x558] sm:$0xf0] }
 0x127   :  { %3544 = vmatpush.bf16.msrb.mxu3 %v7705_v5  ;;  %v9882_v5 = vld [vmem:[#allocation7 + $0x4] sm:$0xf]  ;;  %v8281_v59 = vor.u32 %v10104_v51, %v8278_v52  ;;  %v7990_v52 = vld [vmem:[#allocation7 + $0x4c8] sm:$0xf0] }
 0x128   :  { %3506 = vmatpush.bf16.msrb.mxu0 %v8253_v11  ;;  %v1826_v6 = vpop.f32.mrf.mxu2  ;;  %v7393_v19 = vor.u32 %v9882_v5, %v7390_v8  ;;  %v7873_v5 = vor.u32 %v10002_v60, %v7870_v61  ;;  %v9978_v60 = vld [vmem:[#allocation7 + $0x304] sm:$0xf]  ;;  %v7774_v61 = vld [vmem:[#allocation7 + $0x318] sm:$0xf0] }
 0x129   :  { %3519 = vmatpush.bf16.msrb.mxu1 %v8445_v13  ;;  %v1839_v11 = vpop.f32.mrf.mxu3  ;;  %v7942_v13 = vld [vmem:[#allocation7 + $0x468] sm:$0xf0] }
 0x12a   :  { %3532 = vmatpush.bf16.msrb.mxu2 %v7489_v14  ;;  %v10068_v14 = vld [vmem:[#allocation7 + $0x5d4] sm:$0xf]  ;;  %v7945_v22 = vor.u32 %v10020_v12, %v7942_v13 }
 0x12b   :  { %3545 = vmatpush.bf16.msrb.mxu3 %v7681_v30  ;;  %v8349_v30 = vor.u32 %v10125_v4, %v8348_v3  ;;  %v8137_v36 = vor.u32 %v10068_v14, %v8134_v16  ;;  %v10146_v3 = vld [vmem:[#allocation7 + $0x844] sm:$0xf]  ;;  %v8446_v4 = vld [vmem:[#allocation7 + $0x858] sm:$0xf0]  ;;  %v10044_v11 = vld [vmem:[#allocation7 + $0x514] sm:$0xf] }
 0x12c   :  { %3507 = vmatpush.bf16.msrb.mxu0 %v8229_v23  ;;  %v8329_v23 = vor.u32 %v10116_v17, %v8326_v18  ;;  %v8449_v13 = vor.u32 %v10146_v3, %v8446_v4  ;;  %v8038_v14 = vld [vmem:[#allocation7 + $0x528] sm:$0xf0]  ;;  %v10140_v18 = vld [vmem:[#allocation7 + $0x814] sm:$0xf] }
 0x12d   :  { %3520 = vmatpush.bf16.msrb.mxu1 %v8421_v31  ;;  %v10014_v31 = vld [vmem:[#allocation7 + $0x424] sm:$0xf]  ;;  %v8230_v16 = vld [vmem:[#allocation7 + $0x6a8] sm:$0xf0]  ;;  %v8041_v20 = vor.u32 %v10044_v11, %v8038_v14  ;;  %v7756_v11 = vld [vmem:[#allocation7 + $0x2d8] sm:$0xf] }
 0x12e   :  { %3533 = vmatpush.bf16.msrb.mxu2 %v7465_v24  ;;  %v7918_v24 = vld [vmem:[#allocation7 + $0x438] sm:$0xf0]  ;;  %v7948_v14 = vld [vmem:[#allocation7 + $0x458] sm:$0xf] }
 0x12f   :  { %3546 = vmatpush.bf16.msrb.mxu3 %v7657_v32  ;;  %v8302_v32 = vld [vmem:[#allocation7 + $0x738] sm:$0xf0]  ;;  %v7921_v38 = vor.u32 %v10014_v31, %v7918_v24 }
 0x130   :  { %3508 = vmatpush.bf16.msrb.mxu0 %v8205_v41  ;;  %v8305_v40 = vor.u32 %v10110_v28, %v8302_v32  ;;  %v10008_v41 = vld [vmem:[#allocation7 + $0x3f4] sm:$0xf]  ;;  %v8014_v24 = vld [vmem:[#allocation7 + $0x4f8] sm:$0xf0]  ;;  %v10134_v32 = vld [vmem:[#allocation7 + $0x7e4] sm:$0xf] }
 0x131   :  { %3521 = vmatpush.bf16.msrb.mxu1 %v8397_v45  ;;  %v10056_v45 = vld [vmem:[#allocation7 + $0x574] sm:$0xf]  ;;  %v7897_v55 = vor.u32 %v10008_v41, %v7894_v44 }
 0x132   :  { %3534 = vmatpush.bf16.msrb.mxu2 %v7441_v49  ;;  %v8497_v49 = vor.u32 %v10158_v34, %v8494_v35  ;;  %v8089_v57 = vor.u32 %v10056_v45, %v8086_v50  ;;  %v8398_v34 = vld [vmem:[#allocation7 + $0x7f8] sm:$0xf0]  ;;  %v9984_v44 = vld [vmem:[#allocation7 + $0x334] sm:$0xf]  ;;  %v7798_v45 = vld [vmem:[#allocation7 + $0x348] sm:$0xf0] }
 0x133   :  { %3547 = vmatpush.bf16.msrb.mxu3 %v7633_v54  ;;  %v8470_v54 = vld [vmem:[#allocation7 + $0x888] sm:$0xf0]  ;;  %v8401_v51 = vor.u32 %v10134_v32, %v8398_v34 }
 0x134   :  { %3509 = vmatpush.bf16.msrb.mxu0 %v8181_v62  ;;  %v10050_v62 = vld [vmem:[#allocation7 + $0x544] sm:$0xf]  ;;  %v8473_v63 = vor.u32 %v10152_v53, %v8470_v54  ;;  %v10080_v53 = vld [vmem:[#allocation7 + $0x634] sm:$0xf]  ;;  %v8182_v54 = vld [vmem:[#allocation7 + $0x648] sm:$0xf0] }
 0x135   :  { %3522 = vmatpush.bf16.msrb.mxu1 %v8373_v1  ;;  %v10098_v1 = vld [vmem:[#allocation7 + $0x6c4] sm:$0xf] }
 0x136   :  { %3535 = vmatpush.bf16.msrb.mxu2 %v7417_v2  ;;  %v8254_v2 = vld [vmem:[#allocation7 + $0x6d8] sm:$0xf0] }
 0x137   :  { %3548 = vmatpush.bf16.msrb.mxu3 %v7609_v7  ;;  %v8065_v7 = vor.u32 %v10050_v62, %v8062_v0  ;;  %v8257_v8 = vor.u32 %v10098_v1, %v8254_v2  ;;  %v10026_v0 = vld [vmem:[#allocation7 + $0x484] sm:$0xf]  ;;  %v7966_v1 = vld [vmem:[#allocation7 + $0x498] sm:$0xf0] }
 0x138   :  { %3510 = vmatpush.bf16.msrb.mxu0 %v8157_v15  ;;  %v1850_v6 = vpop.f32.mrf.mxu0  ;;  %v10092_v15 = vld [vmem:[#allocation7 + $0x694] sm:$0xf]  ;;  %v10074_v2 = vld [vmem:[#allocation7 + $0x604] sm:$0xf] }
 0x139   :  { %3523 = vmatpush.bf16.msrb.mxu1 %v8349_v30  ;;  %v1863_v12 = vpop.f32.mrf.mxu1  ;;  %v8422_v30 = vld [vmem:[#allocation7 + $0x828] sm:$0xf0]  ;;  %v8233_v21 = vor.u32 %v10092_v15, %v8230_v16  ;;  %v10024_v15 = vld [vmem:[#allocation7 + $0x46c] sm:$0xf0]  ;;  %v7969_v16 = vor.u32 %v10026_v0, %v7966_v1  ;;  %v10006_v0 = vld [vmem:[#allocation7 + $0x3dc] sm:$0xf0] }
 0x13a   :  { %3536 = vmatpush.bf16.msrb.mxu2 %v7393_v19  ;;  %v1864_v17 = vadd.f32 %v1863_v12, %v1850_v6  ;;  %v7849_v19 = vor.u32 %v9996_v9, %v7846_v10  ;;  %v8425_v31 = vor.u32 %v10140_v18, %v8422_v30  ;;  %v10122_v6 = vld [vmem:[#allocation7 + $0x784] sm:$0xf]  ;;  %v7564_v9 = vld [vmem:[#allocation7 + $0x158] sm:$0xf]  ;;  %v9928_v10 = vld [vmem:[#allocation7 + $0x16c] sm:$0xf0]  ;;  %v7777_v12 = vor.u32 %v9978_v60, %v7774_v61 }
 0x13b   :  { %3549 = vmatpush.bf16.msrb.mxu3 %v7585_v29  ;;  %3511 = vmatmul.bf16.vlgmr.msrb.gmra.mxu0 %v11267_v33  ;;  %v9990_v29 = vld [vmem:[#allocation7 + $0x364] sm:$0xf]  ;;  %v8140_v18 = vld [vmem:[#allocation7 + $0x5d8] sm:$0xf]  ;;  %v10072_v30 = vld [vmem:[#allocation7 + $0x5ec] sm:$0xf0] }
 0x13c   :  { %3555 = vmatpush.bf16.msra.mxu0 %v7945_v22  ;;  %3524 = vmatmul.bf16.vlgmr.msrb.gmra.mxu1 %v11269_v37  ;;  %v7822_v22 = vld [vmem:[#allocation7 + $0x378] sm:$0xf0]  ;;  %v7684_v60 = vld [vmem:[#allocation7 + $0x248] sm:$0xf] }
 0x13d   :  { %3568 = vmatpush.bf16.msra.mxu1 %v8137_v36  ;;  %3537 = vmatmul.bf16.vlgmr.msrb.gmra.mxu2 %v11253_v43  ;;  %v10038_v36 = vld [vmem:[#allocation7 + $0x4e4] sm:$0xf]  ;;  %v7825_v35 = vor.u32 %v9990_v29, %v7822_v22  ;;  %v7949_v29 = vor.u32 %v10024_v15, %v7948_v14  ;;  %v7540_v22 = vld [vmem:[#allocation7 + $0x128] sm:$0xf]  ;;  %v10000_v14 = vld [vmem:[#allocation7 + $0x3ac] sm:$0xf0] }
 0x13e   :  { %3581 = vmatpush.bf16.msra.mxu2 %v8329_v23  ;;  %3550 = vmatmul.bf16.vlgmr.msrb.gmra.mxu3 %v11257_v47  ;;  %v8068_v1 = vld [vmem:[#allocation7 + $0x548] sm:$0xf] }
 0x13f   :  { %3594 = vmatpush.bf16.msra.mxu3 %v8521_v26  ;;  %v8206_v26 = vld [vmem:[#allocation7 + $0x678] sm:$0xf0] }
 0x140   :  { %3556 = vmatpush.bf16.msra.mxu0 %v7921_v38  ;;  %v1876_v23 = vpop.f32.mrf.mxu2  ;;  %v8209_v41 = vor.u32 %v10086_v25, %v8206_v26  ;;  %v7924_v25 = vld [vmem:[#allocation7 + $0x428] sm:$0xf]  ;;  %v10018_v26 = vld [vmem:[#allocation7 + $0x43c] sm:$0xf0] }
 0x141   :  { %3569 = vmatpush.bf16.msra.mxu1 %v8113_v39  ;;  %v1877_v27 = vadd.f32 %v1876_v23, %v1864_v17  ;;  %v1889_v28 = vpop.f32.mrf.mxu3  ;;  %v1852_v39 = vpop.f32.mrf.mxu0  ;;  %v7732_v23 = vld [vmem:[#allocation7 + $0x2a8] sm:$0xf] }
 0x142   :  { %3582 = vmatpush.bf16.msra.mxu2 %v8305_v40  ;;  %v8017_v40 = vor.u32 %v10038_v36, %v8014_v24  ;;  %v1865_v50 = vpop.f32.mrf.mxu1  ;;  %v9922_v36 = vld [vmem:[#allocation7 + $0x13c] sm:$0xf0]  ;;  %v7516_v39 = vld [vmem:[#allocation7 + $0xf8] sm:$0xf] }
 0x143   :  { %3595 = vmatpush.bf16.msra.mxu3 %v8497_v49  ;;  %v11275_v38 = vadd.f32 %v1889_v28, %v1877_v27  ;;  %v10032_v49 = vld [vmem:[#allocation7 + $0x4b4] sm:$0xf]  ;;  %v9970_v24 = vld [vmem:[#allocation7 + $0x2bc] sm:$0xf0]  ;;  %v8116_v27 = vld [vmem:[#allocation7 + $0x5a8] sm:$0xf]  ;;  %v7541_v32 = vor.u32 %v9922_v36, %v7540_v22 }
 0x144   :  { %3557 = vmatpush.bf16.msra.mxu0 %v7897_v55  ;;  %v10128_v55 = vld [vmem:[#allocation7 + $0x7b4] sm:$0xf]  ;;  %v7993_v62 = vor.u32 %v10032_v49, %v7990_v52  ;;  %v10066_v28 = vld [vmem:[#allocation7 + $0x5bc] sm:$0xf0]  ;;  %v7733_v34 = vor.u32 %v9970_v24, %v7732_v23  ;;  %v7900_v49 = vld [vmem:[#allocation7 + $0x3f8] sm:$0xf] }
 0x145   :  { %3570 = vmatpush.bf16.msra.mxu1 %v8089_v57  ;;  %v8374_v57 = vld [vmem:[#allocation7 + $0x7c8] sm:$0xf0]  ;;  %v10012_v50 = vld [vmem:[#allocation7 + $0x40c] sm:$0xf0]  ;;  %v9946_v23 = vld [vmem:[#allocation7 + $0x1fc] sm:$0xf0] }
 0x146   :  { %3583 = vmatpush.bf16.msra.mxu2 %v8281_v59  ;;  %v7801_v59 = vor.u32 %v9984_v44, %v7798_v45  ;;  %v8377_v4 = vor.u32 %v10128_v55, %v8374_v57  ;;  %v8117_v44 = vor.u32 %v10066_v28, %v8116_v27  ;;  %v9964_v45 = vld [vmem:[#allocation7 + $0x28c] sm:$0xf0]  ;;  %v7901_v55 = vor.u32 %v10012_v50, %v7900_v49  ;;  %v7492_v57 = vld [vmem:[#allocation7 + $0xc8] sm:$0xf]  ;;  %v9994_v24 = vld [vmem:[#allocation7 + $0x37c] sm:$0xf0] }
 0x147   :  { %3596 = vmatpush.bf16.msra.mxu3 %v8473_v63  ;;  %v8185_v63 = vor.u32 %v10080_v53, %v8182_v54  ;;  %v10060_v52 = vld [vmem:[#allocation7 + $0x58c] sm:$0xf0]  ;;  %v8020_v27 = vld [vmem:[#allocation7 + $0x4e8] sm:$0xf]  ;;  %v10042_v28 = vld [vmem:[#allocation7 + $0x4fc] sm:$0xf0] }
 0x148   :  { %3558 = vmatpush.bf16.msra.mxu0 %v7873_v5  ;;  %v1878_v3 = vpop.f32.mrf.mxu2  ;;  %v8158_v5 = vld [vmem:[#allocation7 + $0x618] sm:$0xf0]  ;;  %v8021_v50 = vor.u32 %v10042_v28, %v8020_v27  ;;  %v7734_v27 = vld [vmem:[#allocation7 + $0x2c0] sm:$0xf0] }
 0x149   :  { %3571 = vmatpush.bf16.msra.mxu1 %v8065_v7  ;;  %v8350_v7 = vld [vmem:[#allocation7 + $0x798] sm:$0xf0]  ;;  %v8161_v17 = vor.u32 %v10074_v2, %v8158_v5  ;;  %v10054_v2 = vld [vmem:[#allocation7 + $0x55c] sm:$0xf0] }
 0x14a   :  { %3584 = vmatpush.bf16.msra.mxu2 %v8257_v8  ;;  %v1891_v8 = vpop.f32.mrf.mxu3 }
 0x14b   :  { %3597 = vmatpush.bf16.msra.mxu3 %v8449_v13  ;;  %v9976_v13 = vld [vmem:[#allocation7 + $0x2ec] sm:$0xf0] }
 0x14c   :  { %3559 = vmatpush.bf16.msra.mxu0 %v7849_v19  ;;  %v8353_v19 = vor.u32 %v10122_v6, %v8350_v7  ;;  %v7468_v7 = vld [vmem:[#allocation7 + $0x98] sm:$0xf]  ;;  %v9904_v8 = vld [vmem:[#allocation7 + $0xac] sm:$0xf0] }
 0x14d   :  { %3572 = vmatpush.bf16.msra.mxu1 %v8041_v20  ;;  %v7565_v20 = vor.u32 %v9928_v10, %v7564_v9  ;;  %v7660_v9 = vld [vmem:[#allocation7 + $0x218] sm:$0xf] }
 0x14e   :  { %3585 = vmatpush.bf16.msra.mxu2 %v8233_v21  ;;  %v7757_v21 = vor.u32 %v9976_v13, %v7756_v11  ;;  %v8069_v11 = vor.u32 %v10054_v2, %v8068_v1  ;;  %v7852_v13 = vld [vmem:[#allocation7 + $0x398] sm:$0xf]  ;;  %v7780_v1 = vld [vmem:[#allocation7 + $0x308] sm:$0xf] }
 0x14f   :  { %3598 = vmatpush.bf16.msra.mxu3 %v8425_v31  ;;  %v8141_v31 = vor.u32 %v10072_v30, %v8140_v18  ;;  %v7469_v18 = vor.u32 %v9904_v8, %v7468_v7  ;;  %v8332_v8 = vld [vmem:[#allocation7 + $0x758] sm:$0xf] }
 0x150   :  { %3560 = vmatpush.bf16.msra.mxu0 %v7825_v35  ;;  %v7925_v35 = vor.u32 %v10018_v26, %v7924_v25 }
 0x151   :  { %3573 = vmatpush.bf16.msra.mxu1 %v8017_v40  ;;  %v9916_v40 = vld [vmem:[#allocation7 + $0x10c] sm:$0xf0] }
 0x152   :  { %3586 = vmatpush.bf16.msra.mxu2 %v8209_v41  ;;  %v7708_v41 = vld [vmem:[#allocation7 + $0x278] sm:$0xf]  ;;  %v7517_v53 = vor.u32 %v9916_v40, %v7516_v39 }
 0x153   :  { %3599 = vmatpush.bf16.msra.mxu3 %v8401_v51  ;;  %v8092_v51 = vld [vmem:[#allocation7 + $0x578] sm:$0xf]  ;;  %v7709_v54 = vor.u32 %v9964_v45, %v7708_v41 }
 0x154   :  { %3561 = vmatpush.bf16.msra.mxu0 %v7801_v59  ;;  %v9910_v59 = vld [vmem:[#allocation7 + $0xdc] sm:$0xf0]  ;;  %v8093_v61 = vor.u32 %v10060_v52, %v8092_v51  ;;  %v7420_v41 = vld [vmem:[#allocation7 + $0x38] sm:$0xf]  ;;  %v9940_v51 = vld [vmem:[#allocation7 + $0x1cc] sm:$0xf0] }
 0x155   :  { %3574 = vmatpush.bf16.msra.mxu1 %v7993_v62  ;;  %v9958_v62 = vld [vmem:[#allocation7 + $0x25c] sm:$0xf0]  ;;  %v7493_v3 = vor.u32 %v9910_v59, %v7492_v57  ;;  %v7612_v45 = vld [vmem:[#allocation7 + $0x1b8] sm:$0xf]  ;;  %v7396_v59 = vld [vmem:[#allocation7 + $0x8] sm:$0xf] }
 0x156   :  { %3587 = vmatpush.bf16.msra.mxu2 %v8185_v63  ;;  %v7876_v63 = vld [vmem:[#allocation7 + $0x3c8] sm:$0xf]  ;;  %v7685_v5 = vor.u32 %v9958_v62, %v7684_v60  ;;  %v7804_v52 = vld [vmem:[#allocation7 + $0x338] sm:$0xf]  ;;  %v9886_v60 = vld [vmem:[#allocation7 + $0x1c] sm:$0xf0] }
 0x157   :  { %3600 = vmatpush.bf16.msra.mxu3 %v8377_v4  ;;  %v7877_v6 = vor.u32 %v10006_v0, %v7876_v63  ;;  %v7588_v63 = vld [vmem:[#allocation7 + $0x188] sm:$0xf]  ;;  %v9934_v0 = vld [vmem:[#allocation7 + $0x19c] sm:$0xf0] }
 0x158   :  { %3562 = vmatpush.bf16.msra.mxu0 %v7777_v12  ;;  %v1902_v4 = vpop.f32.mrf.mxu0  ;;  %v9952_v12 = vld [vmem:[#allocation7 + $0x22c] sm:$0xf0] }
 0x159   :  { %3575 = vmatpush.bf16.msra.mxu1 %v7969_v16  ;;  %v1915_v10 = vpop.f32.mrf.mxu1  ;;  %v8044_v16 = vld [vmem:[#allocation7 + $0x518] sm:$0xf]  ;;  %v7661_v30 = vor.u32 %v9952_v12, %v7660_v9  ;;  %v10120_v9 = vld [vmem:[#allocation7 + $0x76c] sm:$0xf0] }
 0x15a   :  { %3588 = vmatpush.bf16.msra.mxu2 %v8161_v17  ;;  %v1916_v15 = vadd.f32 %v1915_v10, %v1902_v4  ;;  %v10048_v17 = vld [vmem:[#allocation7 + $0x52c] sm:$0xf0]  ;;  %v9982_v4 = vld [vmem:[#allocation7 + $0x31c] sm:$0xf0]  ;;  %v8524_v10 = vld [vmem:[#allocation7 + $0x8d8] sm:$0xf] }
 0x15b   :  { %3601 = vmatpush.bf16.msra.mxu3 %v8353_v19  ;;  %3563 = vmatmul.bf16.vlgmr.msra.gmra.mxu0 %v11255_v46  ;;  %v7853_v19 = vor.u32 %v10000_v14, %v7852_v13  ;;  %v8045_v36 = vor.u32 %v10048_v17, %v8044_v16  ;;  %v10168_v12 = vld [vmem:[#allocation7 + $0x8ec] sm:$0xf0]  ;;  %v9925_v13 = vld [vmem:[#allocation7 + $0x15c] sm:$0xf]  ;;  %v7566_v14 = vld [vmem:[#allocation7 + $0x170] sm:$0xf0]  ;;  %v7781_v16 = vor.u32 %v9982_v4, %v7780_v1 }
 0x15c   :  { %3607 = vmatpush.bf16.msrb.mxu0 %v7565_v20  ;;  %3576 = vmatmul.bf16.vlgmr.msra.gmra.mxu1 %v11259_v48  ;;  %v7444_v20 = vld [vmem:[#allocation7 + $0x68] sm:$0xf]  ;;  %v9973_v17 = vld [vmem:[#allocation7 + $0x2dc] sm:$0xf]  ;;  %v8236_v4 = vld [vmem:[#allocation7 + $0x698] sm:$0xf] }
 0x15d   :  { %3620 = vmatpush.bf16.msrb.mxu1 %v7757_v21  ;;  %3589 = vmatmul.bf16.vlgmr.msra.gmra.mxu2 %v11267_v33  ;;  %v9898_v21 = vld [vmem:[#allocation7 + $0x7c] sm:$0xf0] }
 0x15e   :  { %3633 = vmatpush.bf16.msrb.mxu2 %v7949_v29  ;;  %3602 = vmatmul.bf16.vlgmr.msra.gmra.mxu3 %v11269_v37  ;;  %v7636_v29 = vld [vmem:[#allocation7 + $0x1e8] sm:$0xf] }
 0x15f   :  { %3646 = vmatpush.bf16.msrb.mxu3 %v8141_v31  ;;  %v7828_v31 = vld [vmem:[#allocation7 + $0x368] sm:$0xf]  ;;  %v7637_v39 = vor.u32 %v9946_v23, %v7636_v29 }
 0x160   :  { %3608 = vmatpush.bf16.msrb.mxu0 %v7541_v32  ;;  %v1928_v22 = vpop.f32.mrf.mxu2  ;;  %v7445_v32 = vor.u32 %v9898_v21, %v7444_v20  ;;  %v7829_v40 = vor.u32 %v9994_v24, %v7828_v31  ;;  %v8525_v20 = vor.u32 %v10168_v12, %v8524_v10  ;;  %v7569_v21 = vor.u32 %v9925_v13, %v7566_v14  ;;  %v8308_v29 = vld [vmem:[#allocation7 + $0x728] sm:$0xf]  ;;  %v10162_v31 = vld [vmem:[#allocation7 + $0x8bc] sm:$0xf0]  ;;  %v9919_v24 = vld [vmem:[#allocation7 + $0x12c] sm:$0xf] }
 0x161   :  { %3621 = vmatpush.bf16.msrb.mxu1 %v7733_v34  ;;  %v1929_v25 = vadd.f32 %v1928_v22, %v1916_v15  ;;  %v1941_v26 = vpop.f32.mrf.mxu3  ;;  %v1917_v49 = vpop.f32.mrf.mxu1  ;;  %v7589_v15 = vor.u32 %v9934_v0, %v7588_v63  ;;  %v10114_v22 = vld [vmem:[#allocation7 + $0x73c] sm:$0xf0]  ;;  %v9955_v63 = vld [vmem:[#allocation7 + $0x24c] sm:$0xf]  ;;  %v9901_v10 = vld [vmem:[#allocation7 + $0x9c] sm:$0xf] }
 0x162   :  { %3634 = vmatpush.bf16.msrb.mxu2 %v7925_v35  ;;  %v1904_v35 = vpop.f32.mrf.mxu0  ;;  %v8309_v28 = vor.u32 %v10114_v22, %v8308_v29  ;;  %v9913_v49 = vld [vmem:[#allocation7 + $0xfc] sm:$0xf]  ;;  %v7662_v13 = vld [vmem:[#allocation7 + $0x230] sm:$0xf0]  ;;  %v7446_v29 = vld [vmem:[#allocation7 + $0x80] sm:$0xf0] }
 0x163   :  { %3647 = vmatpush.bf16.msrb.mxu3 %v8117_v44  ;;  %v11281_v34 = vadd.f32 %v1941_v26, %v1929_v25  ;;  %v9892_v44 = vld [vmem:[#allocation7 + $0x4c] sm:$0xf0]  ;;  %v7542_v25 = vld [vmem:[#allocation7 + $0x140] sm:$0xf0]  ;;  %v9967_v26 = vld [vmem:[#allocation7 + $0x2ac] sm:$0xf] }
 0x164   :  { %3609 = vmatpush.bf16.msrb.mxu0 %v7517_v53  ;;  %v9988_v53 = vld [vmem:[#allocation7 + $0x34c] sm:$0xf0]  ;;  %v7421_v57 = vor.u32 %v9892_v44, %v7420_v41  ;;  %v7545_v35 = vor.u32 %v9919_v24, %v7542_v25  ;;  %v8476_v41 = vld [vmem:[#allocation7 + $0x878] sm:$0xf]  ;;  %v7737_v44 = vor.u32 %v9967_v26, %v7734_v27  ;;  %v9949_v12 = vld [vmem:[#allocation7 + $0x21c] sm:$0xf] }
 0x165   :  { %3622 = vmatpush.bf16.msrb.mxu1 %v7709_v54  ;;  %v7996_v54 = vld [vmem:[#allocation7 + $0x4b8] sm:$0xf]  ;;  %v7805_v62 = vor.u32 %v9988_v53, %v7804_v52  ;;  %v7710_v52 = vld [vmem:[#allocation7 + $0x290] sm:$0xf0] }
 0x166   :  { %3635 = vmatpush.bf16.msrb.mxu2 %v7901_v55  ;;  %v10036_v55 = vld [vmem:[#allocation7 + $0x4cc] sm:$0xf0] }
 0x167   :  { %3648 = vmatpush.bf16.msrb.mxu3 %v8093_v61  ;;  %v7613_v61 = vor.u32 %v9940_v51, %v7612_v45  ;;  %v10156_v45 = vld [vmem:[#allocation7 + $0x88c] sm:$0xf0]  ;;  %v9961_v51 = vld [vmem:[#allocation7 + $0x27c] sm:$0xf] }
 0x168   :  { %3610 = vmatpush.bf16.msrb.mxu0 %v7493_v3  ;;  %v1930_v2 = vpop.f32.mrf.mxu2  ;;  %v7997_v3 = vor.u32 %v10036_v55, %v7996_v54  ;;  %v8477_v54 = vor.u32 %v10156_v45, %v8476_v41  ;;  %v10132_v45 = vld [vmem:[#allocation7 + $0x7cc] sm:$0xf0] }
 0x169   :  { %3623 = vmatpush.bf16.msrb.mxu1 %v7685_v5  ;;  %v7972_v5 = vld [vmem:[#allocation7 + $0x488] sm:$0xf]  ;;  %v1943_v7 = vpop.f32.mrf.mxu3 }
 0x16a   :  { %3636 = vmatpush.bf16.msrb.mxu2 %v7877_v6  ;;  %v10030_v6 = vld [vmem:[#allocation7 + $0x49c] sm:$0xf0] }
 0x16b   :  { %3649 = vmatpush.bf16.msrb.mxu3 %v8069_v11  ;;  %v7397_v11 = vor.u32 %v9886_v60, %v7396_v59  ;;  %v8452_v59 = vld [vmem:[#allocation7 + $0x848] sm:$0xf]  ;;  %v7713_v60 = vor.u32 %v9961_v51, %v7710_v52  ;;  %v9937_v51 = vld [vmem:[#allocation7 + $0x1bc] sm:$0xf]  ;;  %v7614_v52 = vld [vmem:[#allocation7 + $0x1d0] sm:$0xf0] }
 0x16c   :  { %3611 = vmatpush.bf16.msrb.mxu0 %v7469_v18  ;;  %v7758_v18 = vld [vmem:[#allocation7 + $0x2f0] sm:$0xf0] }
 0x16d   :  { %3624 = vmatpush.bf16.msrb.mxu1 %v7661_v30  ;;  %v7973_v30 = vor.u32 %v10030_v6, %v7972_v5  ;;  %v7761_v23 = vor.u32 %v9973_v17, %v7758_v18  ;;  %v10096_v5 = vld [vmem:[#allocation7 + $0x6ac] sm:$0xf0]  ;;  %v8428_v6 = vld [vmem:[#allocation7 + $0x818] sm:$0xf]  ;;  %v8212_v17 = vld [vmem:[#allocation7 + $0x668] sm:$0xf] }
 0x16e   :  { %3637 = vmatpush.bf16.msrb.mxu2 %v7853_v19  ;;  %v8333_v19 = vor.u32 %v10120_v9, %v8332_v8  ;;  %v10144_v9 = vld [vmem:[#allocation7 + $0x82c] sm:$0xf0]  ;;  %v8237_v14 = vor.u32 %v10096_v5, %v8236_v4  ;;  %v10090_v18 = vld [vmem:[#allocation7 + $0x67c] sm:$0xf0]  ;;  %v8142_v5 = vld [vmem:[#allocation7 + $0x5f0] sm:$0xf0] }
 0x16f   :  { %3650 = vmatpush.bf16.msrb.mxu3 %v8045_v36  ;;  %v8500_v36 = vld [vmem:[#allocation7 + $0x8a8] sm:$0xf]  ;;  %v8213_v26 = vor.u32 %v10090_v18, %v8212_v17  ;;  %v7926_v17 = vld [vmem:[#allocation7 + $0x440] sm:$0xf0]  ;;  %v10063_v18 = vld [vmem:[#allocation7 + $0x5ac] sm:$0xf] }
 0x170   :  { %3612 = vmatpush.bf16.msrb.mxu0 %v7445_v32  ;;  %v8501_v32 = vor.u32 %v10162_v31, %v8500_v36  ;;  %v9943_v36 = vld [vmem:[#allocation7 + $0x1ec] sm:$0xf] }
 0x171   :  { %3625 = vmatpush.bf16.msrb.mxu1 %v7637_v39  ;;  %v8284_v39 = vld [vmem:[#allocation7 + $0x6f8] sm:$0xf] }
 0x172   :  { %3638 = vmatpush.bf16.msrb.mxu2 %v7829_v40  ;;  %v10108_v40 = vld [vmem:[#allocation7 + $0x70c] sm:$0xf0] }
 0x173   :  { %3651 = vmatpush.bf16.msrb.mxu3 %v8021_v50  ;;  %v7518_v50 = vld [vmem:[#allocation7 + $0x110] sm:$0xf0]  ;;  %v8285_v53 = vor.u32 %v10108_v40, %v8284_v39  ;;  %v10084_v39 = vld [vmem:[#allocation7 + $0x64c] sm:$0xf0]  ;;  %v8380_v40 = vld [vmem:[#allocation7 + $0x7b8] sm:$0xf] }
 0x174   :  { %3613 = vmatpush.bf16.msrb.mxu0 %v7421_v57  ;;  %v7521_v55 = vor.u32 %v9913_v49, %v7518_v50  ;;  %v8260_v57 = vld [vmem:[#allocation7 + $0x6c8] sm:$0xf]  ;;  %v9889_v49 = vld [vmem:[#allocation7 + $0x3c] sm:$0xf]  ;;  %v7422_v50 = vld [vmem:[#allocation7 + $0x50] sm:$0xf0] }
 0x175   :  { %3626 = vmatpush.bf16.msrb.mxu1 %v7613_v61  ;;  %v10150_v61 = vld [vmem:[#allocation7 + $0x85c] sm:$0xf0] }
 0x176   :  { %3639 = vmatpush.bf16.msrb.mxu2 %v7805_v62  ;;  %v9907_v62 = vld [vmem:[#allocation7 + $0xcc] sm:$0xf]  ;;  %v8453_v2 = vor.u32 %v10150_v61, %v8452_v59  ;;  %v8356_v59 = vld [vmem:[#allocation7 + $0x788] sm:$0xf] }
 0x177   :  { %3652 = vmatpush.bf16.msrb.mxu3 %v7997_v3  ;;  %v9883_v61 = vld [vmem:[#allocation7 + $0xc] sm:$0xf] }
 0x178   :  { %3614 = vmatpush.bf16.msrb.mxu0 %v7397_v11  ;;  %v1954_v0 = vpop.f32.mrf.mxu0  ;;  %v7470_v11 = vld [vmem:[#allocation7 + $0xb0] sm:$0xf0] }
 0x179   :  { %3627 = vmatpush.bf16.msrb.mxu1 %v7589_v15  ;;  %v8429_v15 = vor.u32 %v10144_v9, %v8428_v6  ;;  %v10117_v6 = vld [vmem:[#allocation7 + $0x75c] sm:$0xf] }
 0x17a   :  { %3640 = vmatpush.bf16.msrb.mxu2 %v7781_v16  ;;  %v7473_v16 = vor.u32 %v9901_v10, %v7470_v11  ;;  %v10165_v10 = vld [vmem:[#allocation7 + $0x8dc] sm:$0xf]  ;;  %v8526_v11 = vld [vmem:[#allocation7 + $0x8f0] sm:$0xf0] }
 0x17b   :  { %3653 = vmatpush.bf16.msrb.mxu3 %v7973_v30  ;;  %3615 = vmatmul.bf16.vlgmr.msrb.gmra.mxu0 %v11253_v43  ;;  %v10102_v43 = vld [vmem:[#allocation7 + $0x6dc] sm:$0xf0]  ;;  %v8404_v30 = vld [vmem:[#allocation7 + $0x7e8] sm:$0xf] }
 0x17c   :  { %3659 = vmatpush.bf16.msra.mxu0 %v8333_v19  ;;  %3628 = vmatmul.bf16.vlgmr.msrb.gmra.mxu1 %v11257_v47  ;;  %v7686_v47 = vld [vmem:[#allocation7 + $0x260] sm:$0xf0]  ;;  %v8261_v1 = vor.u32 %v10102_v43, %v8260_v57  ;;  %v7665_v19 = vor.u32 %v9949_v12, %v7662_v13  ;;  %v8381_v57 = vor.u32 %v10132_v45, %v8380_v40  ;;  %v10153_v40 = vld [vmem:[#allocation7 + $0x87c] sm:$0xf] }
 0x17d   :  { %3672 = vmatpush.bf16.msra.mxu1 %v8525_v20  ;;  %3641 = vmatmul.bf16.vlgmr.msrb.gmra.mxu2 %v11255_v46  ;;  %v7494_v46 = vld [vmem:[#allocation7 + $0xe0] sm:$0xf0]  ;;  %v7689_v8 = vor.u32 %v9955_v63, %v7686_v47  ;;  %v10138_v20 = vld [vmem:[#allocation7 + $0x7fc] sm:$0xf0]  ;;  %v7425_v43 = vor.u32 %v9889_v49, %v7422_v50  ;;  %v9931_v63 = vld [vmem:[#allocation7 + $0x18c] sm:$0xf] }
 0x17e   :  { %3685 = vmatpush.bf16.msra.mxu2 %v7569_v21  ;;  %3654 = vmatmul.bf16.vlgmr.msrb.gmra.mxu3 %v11259_v48  ;;  %v1967_v48 = vpop.f32.mrf.mxu1  ;;  %v7497_v3 = vor.u32 %v9907_v62, %v7494_v46  ;;  %v9895_v21 = vld [vmem:[#allocation7 + $0x6c] sm:$0xf]  ;;  %v7617_v62 = vor.u32 %v9937_v51, %v7614_v52  ;;  %v7398_v46 = vld [vmem:[#allocation7 + $0x20] sm:$0xf0]  ;;  %v11294_v45 = vld [vmem:[#allocation1 + $0x9] sm:$0xff] }
 0x17f   :  { %3698 = vmatpush.bf16.msra.mxu3 %v7761_v23  ;;  %v1968_v7 = vadd.f32 %v1967_v48, %v1954_v0  ;;  %v7638_v23 = vld [vmem:[#allocation7 + $0x200] sm:$0xf0]  ;;  %v7950_v48 = vld [vmem:[#allocation7 + $0x470] sm:$0xf0]  ;;  %v7401_v9 = vor.u32 %v9883_v61, %v7398_v46  ;;  %v10003_v51 = vld [vmem:[#allocation7 + $0x3cc] sm:$0xf] }
 0x180   :  { %3660 = vmatpush.bf16.msra.mxu0 %v8309_v28  ;;  %v1980_v22 = vpop.f32.mrf.mxu2  ;;  %v1956_v24 = vpop.f32.mrf.mxu0  ;;  %v8405_v28 = vor.u32 %v10138_v20, %v8404_v30  ;;  %v7590_v47 = vld [vmem:[#allocation7 + $0x1a0] sm:$0xf0]  ;;  %v8529_v30 = vor.u32 %v10165_v10, %v8526_v11  ;;  %v10111_v20 = vld [vmem:[#allocation7 + $0x72c] sm:$0xf] }
 0x181   :  { %3673 = vmatpush.bf16.msra.mxu1 %v8501_v32  ;;  %v1981_v31 = vadd.f32 %v1980_v22, %v1968_v7  ;;  %v1993_v25 = vpop.f32.mrf.mxu3  ;;  %v7449_v32 = vor.u32 %v9895_v21, %v7446_v29  ;;  %v8334_v7 = vld [vmem:[#allocation7 + $0x770] sm:$0xf0]  ;;  %v7593_v12 = vor.u32 %v9931_v63, %v7590_v47  ;;  %v8310_v21 = vld [vmem:[#allocation7 + $0x740] sm:$0xf0]  ;;  %v10159_v29 = vld [vmem:[#allocation7 + $0x8ac] sm:$0xf] }
 0x182   :  { %3686 = vmatpush.bf16.msra.mxu2 %v7545_v35  ;;  %v8188_v35 = vld [vmem:[#allocation7 + $0x638] sm:$0xf]  ;;  %v8502_v22 = vld [vmem:[#allocation7 + $0x8c0] sm:$0xf0]  ;;  %v10009_v24 = vld [vmem:[#allocation7 + $0x3fc] sm:$0xf] }
 0x183   :  { %3699 = vmatpush.bf16.msra.mxu3 %v7737_v44  ;;  %v11287_v41 = vadd.f32 %v1993_v25, %v1981_v31  ;;  %v7641_v44 = vor.u32 %v9943_v36, %v7638_v23  ;;  %v8313_v31 = vor.u32 %v10111_v20, %v8310_v21  ;;  %v7902_v25 = vld [vmem:[#allocation7 + $0x410] sm:$0xf0]  ;;  %v7878_v52 = vld [vmem:[#allocation7 + $0x3e0] sm:$0xf0]  ;;  %v9991_v11 = vld [vmem:[#allocation7 + $0x36c] sm:$0xf] }
 0x184   :  { %3661 = vmatpush.bf16.msra.mxu0 %v8285_v53  ;;  %v8189_v53 = vor.u32 %v10084_v39, %v8188_v35  ;;  %v8286_v35 = vld [vmem:[#allocation7 + $0x710] sm:$0xf0]  ;;  %v7905_v49 = vor.u32 %v10009_v24, %v7902_v25  ;;  %v10135_v20 = vld [vmem:[#allocation7 + $0x7ec] sm:$0xf]  ;;  %v8406_v21 = vld [vmem:[#allocation7 + $0x800] sm:$0xf0] }
 0x185   :  { %3674 = vmatpush.bf16.msra.mxu1 %v8477_v54  ;;  %v8164_v54 = vld [vmem:[#allocation7 + $0x608] sm:$0xf]  ;;  %v11290_v39 = vld [vmem:[#allocation1] sm:$0xff]  ;;  %v9985_v25 = vld [vmem:[#allocation7 + $0x33c] sm:$0xf] }
 0x186   :  { %3687 = vmatpush.bf16.msra.mxu2 %v7521_v55  ;;  %v1969_v27 = vpop.f32.mrf.mxu1  ;;  %v10078_v55 = vld [vmem:[#allocation7 + $0x61c] sm:$0xf0] }
 0x187   :  { %3700 = vmatpush.bf16.msra.mxu3 %v7713_v60  ;;  %v10126_v60 = vld [vmem:[#allocation7 + $0x79c] sm:$0xf0]  ;;  %v8165_v4 = vor.u32 %v10078_v55, %v8164_v54  ;;  %v8505_v27 = vor.u32 %v10159_v29, %v8502_v22  ;;  %v8070_v55 = vld [vmem:[#allocation7 + $0x560] sm:$0xf0] }
 0x188   :  { %3662 = vmatpush.bf16.msra.mxu0 %v8261_v1  ;;  %v1982_v0 = vpop.f32.mrf.mxu2  ;;  %v10021_v1 = vld [vmem:[#allocation7 + $0x45c] sm:$0xf] }
 0x189   :  { %3675 = vmatpush.bf16.msra.mxu1 %v8453_v2  ;;  %v10069_v2 = vld [vmem:[#allocation7 + $0x5dc] sm:$0xf]  ;;  %v7953_v13 = vor.u32 %v10021_v1, %v7950_v48  ;;  %v7854_v1 = vld [vmem:[#allocation7 + $0x3b0] sm:$0xf0] }
 0x18a   :  { %3688 = vmatpush.bf16.msra.mxu2 %v7497_v3  ;;  %v1995_v3 = vpop.f32.mrf.mxu3  ;;  %v9997_v0 = vld [vmem:[#allocation7 + $0x39c] sm:$0xf] }
 0x18b   :  { %3701 = vmatpush.bf16.msra.mxu3 %v7689_v8  ;;  %v8357_v8 = vor.u32 %v10126_v60, %v8356_v59  ;;  %v10147_v59 = vld [vmem:[#allocation7 + $0x84c] sm:$0xf]  ;;  %v8454_v60 = vld [vmem:[#allocation7 + $0x860] sm:$0xf0]  ;;  %v10045_v48 = vld [vmem:[#allocation7 + $0x51c] sm:$0xf] }
 0x18c   :  { %3663 = vmatpush.bf16.msra.mxu0 %v8237_v14  ;;  %v8145_v14 = vor.u32 %v10069_v2, %v8142_v5  ;;  %v8457_v2 = vor.u32 %v10147_v59, %v8454_v60  ;;  %v10093_v5 = vld [vmem:[#allocation7 + $0x69c] sm:$0xf]  ;;  %v10123_v59 = vld [vmem:[#allocation7 + $0x78c] sm:$0xf]  ;;  %v8358_v60 = vld [vmem:[#allocation7 + $0x7a0] sm:$0xf0] }
 0x18d   :  { %3676 = vmatpush.bf16.msra.mxu1 %v8429_v15  ;;  %v8337_v15 = vor.u32 %v10117_v6, %v8334_v7  ;;  %v8238_v6 = vld [vmem:[#allocation7 + $0x6b0] sm:$0xf0]  ;;  %v10141_v7 = vld [vmem:[#allocation7 + $0x81c] sm:$0xf] }
 0x18e   :  { %3689 = vmatpush.bf16.msra.mxu2 %v7473_v16  ;;  %v10015_v16 = vld [vmem:[#allocation7 + $0x42c] sm:$0xf]  ;;  %v8241_v10 = vor.u32 %v10093_v5, %v8238_v6  ;;  %v8148_v5 = vld [vmem:[#allocation7 + $0x5e0] sm:$0xf]  ;;  %v10073_v6 = vld [vmem:[#allocation7 + $0x5f4] sm:$0xf0] }
 0x18f   :  { %3702 = vmatpush.bf16.msra.mxu3 %v7665_v19  ;;  %v8118_v19 = vld [vmem:[#allocation7 + $0x5c0] sm:$0xf0]  ;;  %v7929_v36 = vor.u32 %v10015_v16, %v7926_v17  ;;  %v10087_v17 = vld [vmem:[#allocation7 + $0x66c] sm:$0xf] }
 0x190   :  { %3664 = vmatpush.bf16.msra.mxu0 %v8213_v26  ;;  %v8121_v23 = vor.u32 %v10063_v18, %v8118_v19  ;;  %v10057_v26 = vld [vmem:[#allocation7 + $0x57c] sm:$0xf]  ;;  %v8022_v16 = vld [vmem:[#allocation7 + $0x500] sm:$0xf0] }
 0x191   :  { %3677 = vmatpush.bf16.msra.mxu1 %v8405_v28  ;;  %v8094_v28 = vld [vmem:[#allocation7 + $0x590] sm:$0xf0]  ;;  %v8214_v18 = vld [vmem:[#allocation7 + $0x680] sm:$0xf0] }
 0x192   :  { %3690 = vmatpush.bf16.msra.mxu2 %v7449_v32  ;;  %v10105_v32 = vld [vmem:[#allocation7 + $0x6fc] sm:$0xf]  ;;  %v8217_v24 = vor.u32 %v10087_v17, %v8214_v18  ;;  %v8124_v17 = vld [vmem:[#allocation7 + $0x5b0] sm:$0xf]  ;;  %v10067_v18 = vld [vmem:[#allocation7 + $0x5c4] sm:$0xf0] }
 0x193   :  { %3703 = vmatpush.bf16.msra.mxu3 %v7641_v44  ;;  %v8478_v44 = vld [vmem:[#allocation7 + $0x890] sm:$0xf0]  ;;  %v8289_v50 = vor.u32 %v10105_v32, %v8286_v35  ;;  %v10081_v35 = vld [vmem:[#allocation7 + $0x63c] sm:$0xf] }
 0x194   :  { %3665 = vmatpush.bf16.msra.mxu0 %v8189_v53  ;;  %v10051_v53 = vld [vmem:[#allocation7 + $0x54c] sm:$0xf]  ;;  %v8481_v54 = vor.u32 %v10153_v40, %v8478_v44  ;;  %v7998_v32 = vld [vmem:[#allocation7 + $0x4d0] sm:$0xf0]  ;;  %v10129_v44 = vld [vmem:[#allocation7 + $0x7bc] sm:$0xf] }
 0x195   :  { %3678 = vmatpush.bf16.msra.mxu1 %v8381_v57  ;;  %v10099_v57 = vld [vmem:[#allocation7 + $0x6cc] sm:$0xf]  ;;  %v8073_v63 = vor.u32 %v10051_v53, %v8070_v55  ;;  %v8190_v40 = vld [vmem:[#allocation7 + $0x650] sm:$0xf0]  ;;  %v7974_v55 = vld [vmem:[#allocation7 + $0x4a0] sm:$0xf0] }
 0x196   :  { %3691 = vmatpush.bf16.msra.mxu2 %v7425_v43  ;;  %v8193_v53 = vor.u32 %v10081_v35, %v8190_v40  ;;  %v10061_v35 = vld [vmem:[#allocation7 + $0x594] sm:$0xf0] }
 0x197   :  { %3704 = vmatpush.bf16.msra.mxu3 %v7617_v62  ;;  %v7881_v62 = vor.u32 %v10003_v51, %v7878_v52  ;;  %v7782_v51 = vld [vmem:[#allocation7 + $0x320] sm:$0xf0]  ;;  %v11309_v40 = vld [vmem:[#allocation1 + $0x2d] sm:$0xff] }
 0x198   :  { %3666 = vmatpush.bf16.msra.mxu0 %v8165_v4  ;;  %v3460_v43 = vpop.f32.mrf.mxu0  ;;  %v8046_v4 = vld [vmem:[#allocation7 + $0x530] sm:$0xf0] }
 0x199   :  { %3679 = vmatpush.bf16.msra.mxu1 %v8357_v8  ;;  %v3461_v61 = vadd.f32 %v3460_v43, %v11245_v58  ;;  %v3473_v46 = vpop.f32.mrf.mxu1  ;;  %v8430_v8 = vld [vmem:[#allocation7 + $0x830] sm:$0xf0]  ;;  %v8049_v58 = vor.u32 %v10045_v48, %v8046_v4  ;;  %v8166_v43 = vld [vmem:[#allocation7 + $0x620] sm:$0xf0]  ;;  %v7956_v48 = vld [vmem:[#allocation7 + $0x460] sm:$0xf] }
 0x19a   :  { %3692 = vmatpush.bf16.msra.mxu2 %v7401_v9  ;;  %v7857_v9 = vor.u32 %v9997_v0, %v7854_v1  ;;  %v9977_v1 = vld [vmem:[#allocation7 + $0x2f4] sm:$0xf0] }
 0x19b   :  { %3705 = vmatpush.bf16.msra.mxu3 %v7593_v12  ;;  %3667 = vmatmul.bf16.vlgmr.msra.gmra.mxu0 %v11267_v33  ;;  %v8097_v33 = vor.u32 %v10057_v26, %v8094_v28  ;;  %v3474_v3 = vadd.f32 %v3473_v46, %v3461_v61  ;;  %v7830_v12 = vld [vmem:[#allocation7 + $0x380] sm:$0xf0]  ;;  %v7806_v26 = vld [vmem:[#allocation7 + $0x350] sm:$0xf0]  ;;  %v8409_v28 = vor.u32 %v10135_v20, %v8406_v21  ;;  %v9929_v46 = vld [vmem:[#allocation7 + $0x174] sm:$0xf0] }
 0x19c   :  { %3711 = vmatpush.bf16.msrb.mxu0 %v7953_v13  ;;  %3680 = vmatmul.bf16.vlgmr.msra.gmra.mxu1 %v11269_v37  ;;  %v8262_v37 = vld [vmem:[#allocation7 + $0x6e0] sm:$0xf0]  ;;  %v10039_v13 = vld [vmem:[#allocation7 + $0x4ec] sm:$0xf]  ;;  %v7833_v22 = vor.u32 %v9991_v11, %v7830_v12  ;;  %v9923_v11 = vld [vmem:[#allocation7 + $0x144] sm:$0xf0] }
 0x19d   :  { %3724 = vmatpush.bf16.msrb.mxu1 %v8145_v14  ;;  %3693 = vmatmul.bf16.vlgmr.msra.gmra.mxu2 %v11290_v39  ;;  %v8265_v47 = vor.u32 %v10099_v57, %v8262_v37  ;;  %v8433_v14 = vor.u32 %v10141_v7, %v8430_v8  ;;  %v10075_v57 = vld [vmem:[#allocation7 + $0x60c] sm:$0xf]  ;;  %v8361_v7 = vor.u32 %v10123_v59, %v8358_v60  ;;  %v7740_v12 = vld [vmem:[#allocation7 + $0x2b0] sm:$0xf]  ;;  %v7524_v21 = vld [vmem:[#allocation7 + $0x100] sm:$0xf] }
 0x19e   :  { %3737 = vmatpush.bf16.msrb.mxu2 %v8337_v15  ;;  %3706 = vmatmul.bf16.vlgmr.msra.gmra.mxu3 %v11294_v45  ;;  %v8169_v4 = vor.u32 %v10075_v57, %v8166_v43  ;;  %v10007_v57 = vld [vmem:[#allocation7 + $0x3e4] sm:$0xf0]  ;;  %v8076_v43 = vld [vmem:[#allocation7 + $0x550] sm:$0xf] }
 0x19f   :  { %3750 = vmatpush.bf16.msrb.mxu3 %v8529_v30  ;;  %v10055_v59 = vld [vmem:[#allocation7 + $0x564] sm:$0xf0] }
 0x1a0   :  { %3712 = vmatpush.bf16.msrb.mxu0 %v7929_v36  ;;  %v3486_v15 = vpop.f32.mrf.mxu2  ;;  %v3462_v29 = vpop.f32.mrf.mxu0 }
 0x1a1   :  { %3725 = vmatpush.bf16.msrb.mxu1 %v8121_v23  ;;  %v3487_v30 = vadd.f32 %v3486_v15, %v3474_v3  ;;  %v3499_v19 = vpop.f32.mrf.mxu3  ;;  %v3475_v36 = vpop.f32.mrf.mxu1  ;;  %v7932_v15 = vld [vmem:[#allocation7 + $0x430] sm:$0xf]  ;;  %v9917_v29 = vld [vmem:[#allocation7 + $0x114] sm:$0xf0] }
 0x1a2   :  { %3738 = vmatpush.bf16.msrb.mxu2 %v8313_v31  ;;  %v8025_v31 = vor.u32 %v10039_v13, %v8022_v16  ;;  %v8149_v13 = vor.u32 %v10073_v6, %v8148_v5  ;;  %v10019_v16 = vld [vmem:[#allocation7 + $0x444] sm:$0xf0]  ;;  %v11300_v36 = vld [vmem:[#allocation1 + $0x12] sm:$0xff]  ;;  %v10001_v5 = vld [vmem:[#allocation7 + $0x3b4] sm:$0xf0] }
 0x1a3   :  { %3751 = vmatpush.bf16.msrb.mxu3 %v8505_v27  ;;  %v11298_v23 = vadd.f32 %v3499_v19, %v3487_v30  ;;  %v10033_v27 = vld [vmem:[#allocation7 + $0x4bc] sm:$0xf]  ;;  %v7933_v20 = vor.u32 %v10019_v16, %v7932_v15  ;;  %v8052_v6 = vld [vmem:[#allocation7 + $0x520] sm:$0xf]  ;;  %v7836_v15 = vld [vmem:[#allocation7 + $0x370] sm:$0xf] }
 0x1a4   :  { %3713 = vmatpush.bf16.msrb.mxu0 %v7905_v49  ;;  %v8382_v49 = vld [vmem:[#allocation7 + $0x7d0] sm:$0xf0]  ;;  %v8001_v52 = vor.u32 %v10033_v27, %v7998_v32  ;;  %v11303_v27 = vld [vmem:[#allocation1 + $0x1b] sm:$0xff]  ;;  %v8100_v32 = vld [vmem:[#allocation7 + $0x580] sm:$0xf] }
 0x1a5   :  { %3726 = vmatpush.bf16.msrb.mxu1 %v8097_v33  ;;  %v7809_v33 = vor.u32 %v9985_v25, %v7806_v26  ;;  %v8385_v37 = vor.u32 %v10129_v44, %v8382_v49  ;;  %v7908_v25 = vld [vmem:[#allocation7 + $0x400] sm:$0xf]  ;;  %v10013_v26 = vld [vmem:[#allocation7 + $0x414] sm:$0xf0]  ;;  %v7525_v44 = vor.u32 %v9917_v29, %v7524_v21  ;;  %v9995_v16 = vld [vmem:[#allocation7 + $0x384] sm:$0xf0] }
 0x1a6   :  { %3739 = vmatpush.bf16.msrb.mxu2 %v8289_v50  ;;  %v9979_v50 = vld [vmem:[#allocation7 + $0x30c] sm:$0xf] }
 0x1a7   :  { %3752 = vmatpush.bf16.msrb.mxu3 %v8481_v54  ;;  %v10027_v54 = vld [vmem:[#allocation7 + $0x48c] sm:$0xf]  ;;  %v7785_v0 = vor.u32 %v9979_v50, %v7782_v51  ;;  %v7500_v50 = vld [vmem:[#allocation7 + $0xd0] sm:$0xf]  ;;  %v9911_v51 = vld [vmem:[#allocation7 + $0xe4] sm:$0xf0] }
 0x1a8   :  { %3714 = vmatpush.bf16.msrb.mxu0 %v7881_v62  ;;  %v3488_v61 = vpop.f32.mrf.mxu2  ;;  %v7572_v62 = vld [vmem:[#allocation7 + $0x160] sm:$0xf]  ;;  %v7977_v3 = vor.u32 %v10027_v54, %v7974_v55  ;;  %v9959_v54 = vld [vmem:[#allocation7 + $0x264] sm:$0xf0]  ;;  %v7884_v55 = vld [vmem:[#allocation7 + $0x3d0] sm:$0xf] }
 0x1a9   :  { %3727 = vmatpush.bf16.msrb.mxu1 %v8073_v63  ;;  %v7764_v63 = vld [vmem:[#allocation7 + $0x2e0] sm:$0xf]  ;;  %v7573_v8 = vor.u32 %v9929_v46, %v7572_v62  ;;  %v7501_v61 = vor.u32 %v9911_v51, %v7500_v50  ;;  %v10037_v50 = vld [vmem:[#allocation7 + $0x4d4] sm:$0xf0] }
 0x1aa   :  { %3740 = vmatpush.bf16.msrb.mxu2 %v8265_v47  ;;  %v3501_v47 = vpop.f32.mrf.mxu3 }
 0x1ab   :  { %3753 = vmatpush.bf16.msrb.mxu3 %v8457_v2  ;;  %v10025_v2 = vld [vmem:[#allocation7 + $0x474] sm:$0xf0]  ;;  %v7476_v47 = vld [vmem:[#allocation7 + $0xa0] sm:$0xf] }
 0x1ac   :  { %3715 = vmatpush.bf16.msrb.mxu0 %v7857_v9  ;;  %v7765_v9 = vor.u32 %v9977_v1, %v7764_v63  ;;  %v7885_v63 = vor.u32 %v10007_v57, %v7884_v55  ;;  %v7668_v1 = vld [vmem:[#allocation7 + $0x220] sm:$0xf]  ;;  %v7596_v57 = vld [vmem:[#allocation7 + $0x190] sm:$0xf] }
 0x1ad   :  { %3728 = vmatpush.bf16.msrb.mxu1 %v8049_v58  ;;  %v7957_v58 = vor.u32 %v10025_v2, %v7956_v48  ;;  %v8077_v48 = vor.u32 %v10055_v59, %v8076_v43  ;;  %v7788_v43 = vld [vmem:[#allocation7 + $0x310] sm:$0xf] }
 0x1ae   :  { %3741 = vmatpush.bf16.msrb.mxu2 %v8241_v10  ;;  %v7548_v10 = vld [vmem:[#allocation7 + $0x130] sm:$0xf] }
 0x1af   :  { %3754 = vmatpush.bf16.msrb.mxu3 %v8433_v14  ;;  %v9971_v14 = vld [vmem:[#allocation7 + $0x2c4] sm:$0xf0]  ;;  %v7549_v30 = vor.u32 %v9923_v11, %v7548_v10  ;;  %v7644_v11 = vld [vmem:[#allocation7 + $0x1f0] sm:$0xf] }
 0x1b0   :  { %3716 = vmatpush.bf16.msrb.mxu0 %v7833_v22  ;;  %v7741_v19 = vor.u32 %v9971_v14, %v7740_v12  ;;  %v7716_v22 = vld [vmem:[#allocation7 + $0x280] sm:$0xf]  ;;  %v9899_v10 = vld [vmem:[#allocation7 + $0x84] sm:$0xf0] }
 0x1b1   :  { %3729 = vmatpush.bf16.msrb.mxu1 %v8025_v31  ;;  %v8125_v31 = vor.u32 %v10067_v18, %v8124_v17  ;;  %v9947_v14 = vld [vmem:[#allocation7 + $0x204] sm:$0xf0] }
 0x1b2   :  { %3742 = vmatpush.bf16.msrb.mxu2 %v8217_v24  ;;  %v9965_v24 = vld [vmem:[#allocation7 + $0x294] sm:$0xf0] }
 0x1b3   :  { %3755 = vmatpush.bf16.msrb.mxu3 %v8409_v28  ;;  %v11306_v28 = vld [vmem:[#allocation1 + $0x24] sm:$0xff]  ;;  %v7717_v49 = vor.u32 %v9965_v24, %v7716_v22  ;;  %v7837_v24 = vor.u32 %v9995_v16, %v7836_v15  ;;  %v10163_v16 = vld [vmem:[#allocation7 + $0x8c4] sm:$0xf0] }
 0x1b4   :  { %3717 = vmatpush.bf16.msrb.mxu0 %v7809_v33  ;;  %v7909_v33 = vor.u32 %v10013_v26, %v7908_v25  ;;  %v7428_v25 = vld [vmem:[#allocation7 + $0x40] sm:$0xf]  ;;  %v9893_v26 = vld [vmem:[#allocation7 + $0x54] sm:$0xf0] }
 0x1b5   :  { %3730 = vmatpush.bf16.msrb.mxu1 %v8001_v52  ;;  %v7692_v52 = vld [vmem:[#allocation7 + $0x250] sm:$0xf]  ;;  %v7429_v51 = vor.u32 %v9893_v26, %v7428_v25  ;;  %v8484_v25 = vld [vmem:[#allocation7 + $0x880] sm:$0xf] }
 0x1b6   :  { %3743 = vmatpush.bf16.msrb.mxu2 %v8193_v53  ;;  %v8101_v53 = vor.u32 %v10061_v35, %v8100_v32  ;;  %v7693_v46 = vor.u32 %v9959_v54, %v7692_v52  ;;  %v7620_v32 = vld [vmem:[#allocation7 + $0x1c0] sm:$0xf]  ;;  %v7404_v52 = vld [vmem:[#allocation7 + $0x10] sm:$0xf] }
 0x1b7   :  { %3756 = vmatpush.bf16.msrb.mxu3 %v8385_v37 }
 0x1b8   :  { %3718 = vmatpush.bf16.msrb.mxu0 %v7785_v0  ;;  %v3512_v37 = vpop.f32.mrf.mxu0  ;;  %v9905_v0 = vld [vmem:[#allocation7 + $0xb4] sm:$0xf0] }
 0x1b9   :  { %3731 = vmatpush.bf16.msrb.mxu1 %v7977_v3  ;;  %v3513_v60 = vadd.f32 %v3512_v37, %v11298_v23  ;;  %v3525_v62 = vpop.f32.mrf.mxu1  ;;  %v9953_v3 = vld [vmem:[#allocation7 + $0x234] sm:$0xf0]  ;;  %v7477_v23 = vor.u32 %v9905_v0, %v7476_v47  ;;  %v9935_v37 = vld [vmem:[#allocation7 + $0x1a4] sm:$0xf0]  ;;  %v8532_v0 = vld [vmem:[#allocation7 + $0x8e0] sm:$0xf] }
 0x1ba   :  { %3744 = vmatpush.bf16.msrb.mxu2 %v8169_v4  ;;  %v7860_v4 = vld [vmem:[#allocation7 + $0x3a0] sm:$0xf]  ;;  %v10121_v47 = vld [vmem:[#allocation7 + $0x774] sm:$0xf0] }
 0x1bb   :  { %3757 = vmatpush.bf16.msrb.mxu3 %v8361_v7  ;;  %3719 = vmatmul.bf16.vlgmr.msrb.gmra.mxu0 %v11300_v36  ;;  %v11313_v2 = vadd.f32 %v3525_v62, %v3513_v60  ;;  %v10049_v7 = vld [vmem:[#allocation7 + $0x534] sm:$0xf0]  ;;  %v9983_v60 = vld [vmem:[#allocation7 + $0x324] sm:$0xf0] }
 0x1bc   :  { %3763 = vmatpush.bf16.msra.mxu0 %v7573_v8  ;;  %3732 = vmatmul.bf16.vlgmr.msrb.gmra.mxu1 %v11303_v27  ;;  %v7669_v8 = vor.u32 %v9953_v3, %v7668_v1  ;;  %v8053_v12 = vor.u32 %v10049_v7, %v8052_v6  ;;  %v10031_v62 = vld [vmem:[#allocation7 + $0x4a4] sm:$0xf0]  ;;  %v10169_v3 = vld [vmem:[#allocation7 + $0x8f4] sm:$0xf0]  ;;  %v7597_v6 = vor.u32 %v9935_v37, %v7596_v57  ;;  %v9908_v37 = vld [vmem:[#allocation7 + $0xd4] sm:$0xf] }
 0x1bd   :  { %3776 = vmatpush.bf16.msra.mxu1 %v7765_v9  ;;  %3745 = vmatmul.bf16.vlgmr.msrb.gmra.mxu2 %v11306_v28  ;;  %v7861_v9 = vor.u32 %v10001_v5, %v7860_v4  ;;  %v9926_v4 = vld [vmem:[#allocation7 + $0x164] sm:$0xf]  ;;  %v7574_v5 = vld [vmem:[#allocation7 + $0x178] sm:$0xf0]  ;;  %v7789_v7 = vor.u32 %v9983_v60, %v7788_v43  ;;  %v10151_v57 = vld [vmem:[#allocation7 + $0x864] sm:$0xf0] }
 0x1be   :  { %3789 = vmatpush.bf16.msra.mxu2 %v7957_v58  ;;  %3758 = vmatmul.bf16.vlgmr.msrb.gmra.mxu3 %v11309_v40  ;;  %v7452_v58 = vld [vmem:[#allocation7 + $0x70] sm:$0xf]  ;;  %v7502_v43 = vld [vmem:[#allocation7 + $0xe8] sm:$0xf0]  ;;  %v9956_v60 = vld [vmem:[#allocation7 + $0x254] sm:$0xf] }
 0x1bf   :  { %3802 = vmatpush.bf16.msra.mxu3 %v8149_v13  ;;  %v7453_v21 = vor.u32 %v9899_v10, %v7452_v58  ;;  %v8533_v10 = vor.u32 %v10169_v3, %v8532_v0  ;;  %v7505_v0 = vor.u32 %v9908_v37, %v7502_v43  ;;  %v8436_v3 = vld [vmem:[#allocation7 + $0x820] sm:$0xf] }
 0x1c0   :  { %3764 = vmatpush.bf16.msra.mxu0 %v7549_v30  ;;  %v3538_v13 = vpop.f32.mrf.mxu2  ;;  %v8028_v30 = vld [vmem:[#allocation7 + $0x4f0] sm:$0xf] }
 0x1c1   :  { %3777 = vmatpush.bf16.msra.mxu1 %v7741_v19  ;;  %v3539_v17 = vadd.f32 %v3538_v13, %v11251_v56  ;;  %v3551_v18 = vpop.f32.mrf.mxu3  ;;  %v10043_v19 = vld [vmem:[#allocation7 + $0x504] sm:$0xf0]  ;;  %v3527_v29 = vpop.f32.mrf.mxu1  ;;  %v7812_v56 = vld [vmem:[#allocation7 + $0x340] sm:$0xf] }
 0x1c2   :  { %3790 = vmatpush.bf16.msra.mxu2 %v7933_v20  ;;  %v3514_v20 = vpop.f32.mrf.mxu0  ;;  %v8029_v35 = vor.u32 %v10043_v19, %v8028_v30  ;;  %v10115_v13 = vld [vmem:[#allocation7 + $0x744] sm:$0xf0]  ;;  %v9968_v30 = vld [vmem:[#allocation7 + $0x2b4] sm:$0xf]  ;;  %v7742_v19 = vld [vmem:[#allocation7 + $0x2c8] sm:$0xf0] }
 0x1c3   :  { %3803 = vmatpush.bf16.msra.mxu3 %v8125_v31  ;;  %v11316_v22 = vadd.f32 %v3551_v18, %v3539_v17  ;;  %v7645_v31 = vor.u32 %v9947_v14, %v7644_v11  ;;  %v7577_v11 = vor.u32 %v9926_v4, %v7574_v5  ;;  %v8508_v14 = vld [vmem:[#allocation7 + $0x8b0] sm:$0xf]  ;;  %v9920_v17 = vld [vmem:[#allocation7 + $0x134] sm:$0xf]  ;;  %v7550_v18 = vld [vmem:[#allocation7 + $0x148] sm:$0xf0]  ;;  %v7745_v26 = vor.u32 %v9968_v30, %v7742_v19 }
 0x1c4   :  { %3765 = vmatpush.bf16.msra.mxu0 %v7525_v44  ;;  %v9941_v44 = vld [vmem:[#allocation7 + $0x1d4] sm:$0xf0]  ;;  %v7553_v29 = vor.u32 %v9920_v17, %v7550_v18  ;;  %v9896_v17 = vld [vmem:[#allocation7 + $0x74] sm:$0xf]  ;;  %v7454_v18 = vld [vmem:[#allocation7 + $0x88] sm:$0xf0] }
 0x1c5   :  { %3778 = vmatpush.bf16.msra.mxu1 %v7717_v49  ;;  %v9989_v49 = vld [vmem:[#allocation7 + $0x354] sm:$0xf0]  ;;  %v7621_v54 = vor.u32 %v9941_v44, %v7620_v32  ;;  %v7526_v44 = vld [vmem:[#allocation7 + $0x118] sm:$0xf0] }
 0x1c6   :  { %3791 = vmatpush.bf16.msra.mxu2 %v7909_v33  ;;  %v8004_v33 = vld [vmem:[#allocation7 + $0x4c0] sm:$0xf]  ;;  %v7813_v55 = vor.u32 %v9989_v49, %v7812_v56  ;;  %v10157_v32 = vld [vmem:[#allocation7 + $0x894] sm:$0xf0]  ;;  %v9962_v56 = vld [vmem:[#allocation7 + $0x284] sm:$0xf] }
 0x1c7   :  { %3804 = vmatpush.bf16.msra.mxu3 %v8101_v53  ;;  %v9887_v53 = vld [vmem:[#allocation7 + $0x24] sm:$0xf0]  ;;  %v8005_v59 = vor.u32 %v10037_v50, %v8004_v33  ;;  %v7718_v49 = vld [vmem:[#allocation7 + $0x298] sm:$0xf0]  ;;  %v8485_v50 = vor.u32 %v10157_v32, %v8484_v25  ;;  %v7457_v32 = vor.u32 %v9896_v17, %v7454_v18  ;;  %v8126_v18 = vld [vmem:[#allocation7 + $0x5c8] sm:$0xf0] }
 0x1c8   :  { %3766 = vmatpush.bf16.msra.mxu0 %v7501_v61  ;;  %v7980_v61 = vld [vmem:[#allocation7 + $0x490] sm:$0xf] }
 0x1c9   :  { %3779 = vmatpush.bf16.msra.mxu1 %v7693_v46  ;;  %v3540_v46 = vpop.f32.mrf.mxu2  ;;  %v3553_v1 = vpop.f32.mrf.mxu3 }
 0x1ca   :  { %3792 = vmatpush.bf16.msra.mxu2 %v7885_v63  ;;  %v8340_v63 = vld [vmem:[#allocation7 + $0x760] sm:$0xf] }
 0x1cb   :  { %3805 = vmatpush.bf16.msra.mxu3 %v8077_v48  ;;  %v7405_v48 = vor.u32 %v9887_v53, %v7404_v52  ;;  %v8341_v58 = vor.u32 %v10121_v47, %v8340_v63  ;;  %v8268_v52 = vld [vmem:[#allocation7 + $0x6d0] sm:$0xf]  ;;  %v10103_v53 = vld [vmem:[#allocation7 + $0x6e4] sm:$0xf0]  ;;  %v8244_v1 = vld [vmem:[#allocation7 + $0x6a0] sm:$0xf] }
 0x1cc   :  { %3767 = vmatpush.bf16.msra.mxu0 %v7477_v23  ;;  %v9974_v23 = vld [vmem:[#allocation7 + $0x2e4] sm:$0xf]  ;;  %v8269_v46 = vor.u32 %v10103_v53, %v8268_v52  ;;  %v7622_v53 = vld [vmem:[#allocation7 + $0x1d8] sm:$0xf0] }
 0x1cd   :  { %3780 = vmatpush.bf16.msra.mxu1 %v7669_v8  ;;  %v7766_v8 = vld [vmem:[#allocation7 + $0x2f8] sm:$0xf0]  ;;  %v9938_v52 = vld [vmem:[#allocation7 + $0x1c4] sm:$0xf] }
 0x1ce   :  { %3793 = vmatpush.bf16.msra.mxu2 %v7861_v9  ;;  %v7981_v9 = vor.u32 %v10031_v62, %v7980_v61  ;;  %v7769_v15 = vor.u32 %v9974_v23, %v7766_v8  ;;  %v7694_v61 = vld [vmem:[#allocation7 + $0x268] sm:$0xf0]  ;;  %v7478_v23 = vld [vmem:[#allocation7 + $0xb8] sm:$0xf0]  ;;  %v9950_v8 = vld [vmem:[#allocation7 + $0x224] sm:$0xf] }
 0x1cf   :  { %3806 = vmatpush.bf16.msra.mxu3 %v8053_v12  ;;  %v8316_v12 = vld [vmem:[#allocation7 + $0x730] sm:$0xf]  ;;  %v7697_v4 = vor.u32 %v9956_v60, %v7694_v61  ;;  %v10127_v60 = vld [vmem:[#allocation7 + $0x7a4] sm:$0xf0]  ;;  %v9884_v61 = vld [vmem:[#allocation7 + $0x14] sm:$0xf] }
 0x1d0   :  { %3768 = vmatpush.bf16.msra.mxu0 %v7453_v21  ;;  %v8317_v20 = vor.u32 %v10115_v13, %v8316_v12  ;;  %v8509_v21 = vor.u32 %v10163_v16, %v8508_v14  ;;  %v10091_v12 = vld [vmem:[#allocation7 + $0x684] sm:$0xf0]  ;;  %v8412_v13 = vld [vmem:[#allocation7 + $0x7f0] sm:$0xf] }
 0x1d1   :  { %3781 = vmatpush.bf16.msra.mxu1 %v7645_v31  ;;  %v8292_v31 = vld [vmem:[#allocation7 + $0x700] sm:$0xf]  ;;  %v10139_v16 = vld [vmem:[#allocation7 + $0x804] sm:$0xf0] }
 0x1d2   :  { %3794 = vmatpush.bf16.msra.mxu2 %v7837_v24  ;;  %v10109_v24 = vld [vmem:[#allocation7 + $0x714] sm:$0xf0] }
 0x1d3   :  { %3807 = vmatpush.bf16.msra.mxu3 %v8029_v35  ;;  %v9914_v35 = vld [vmem:[#allocation7 + $0x104] sm:$0xf]  ;;  %v8293_v33 = vor.u32 %v10109_v24, %v8292_v31 }
 0x1d4   :  { %3769 = vmatpush.bf16.msra.mxu0 %v7429_v51  ;;  %v7529_v51 = vor.u32 %v9914_v35, %v7526_v44  ;;  %v8196_v35 = vld [vmem:[#allocation7 + $0x640] sm:$0xf]  ;;  %v10085_v44 = vld [vmem:[#allocation7 + $0x654] sm:$0xf0] }
 0x1d5   :  { %3782 = vmatpush.bf16.msra.mxu1 %v7621_v54  ;;  %v8460_v54 = vld [vmem:[#allocation7 + $0x850] sm:$0xf] }
 0x1d6   :  { %3795 = vmatpush.bf16.msra.mxu2 %v7813_v55  ;;  %v7721_v55 = vor.u32 %v9962_v56, %v7718_v49  ;;  %v8461_v47 = vor.u32 %v10151_v57, %v8460_v54  ;;  %v8388_v56 = vld [vmem:[#allocation7 + $0x7c0] sm:$0xf]  ;;  %v8197_v54 = vor.u32 %v10085_v44, %v8196_v35  ;;  %v10079_v57 = vld [vmem:[#allocation7 + $0x624] sm:$0xf0]  ;;  %v10058_v35 = vld [vmem:[#allocation7 + $0x584] sm:$0xf] }
 0x1d7   :  { %3808 = vmatpush.bf16.msra.mxu3 %v8005_v59 }
 0x1d8   :  { %3770 = vmatpush.bf16.msra.mxu0 %v7405_v48  ;;  %v3564_v59 = vpop.f32.mrf.mxu0  ;;  %v10097_v48 = vld [vmem:[#allocation7 + $0x6b4] sm:$0xf0] }
 0x1d9   :  { %3783 = vmatpush.bf16.msra.mxu1 %v7597_v6  ;;  %v3565_v62 = vadd.f32 %v3564_v59, %v11316_v22  ;;  %v3577_v63 = vpop.f32.mrf.mxu1  ;;  %v10145_v6 = vld [vmem:[#allocation7 + $0x834] sm:$0xf0]  ;;  %v8364_v59 = vld [vmem:[#allocation7 + $0x790] sm:$0xf] }
 0x1da   :  { %3796 = vmatpush.bf16.msra.mxu2 %v7789_v7  ;;  %v9902_v7 = vld [vmem:[#allocation7 + $0xa4] sm:$0xf]  ;;  %v8437_v22 = vor.u32 %v10145_v6, %v8436_v3  ;;  %v8150_v6 = vld [vmem:[#allocation7 + $0x5f8] sm:$0xf0] }
 0x1db   :  { %3809 = vmatpush.bf16.msra.mxu3 %v7981_v9  ;;  %3771 = vmatmul.bf16.vlgmr.msra.gmra.mxu0 %v11290_v39  ;;  %v3578_v5 = vadd.f32 %v3577_v63, %v3565_v62  ;;  %v7670_v9 = vld [vmem:[#allocation7 + $0x238] sm:$0xf0]  ;;  %v7625_v62 = vor.u32 %v9938_v52, %v7622_v53  ;;  %v9932_v63 = vld [vmem:[#allocation7 + $0x194] sm:$0xf]  ;;  %v10070_v3 = vld [vmem:[#allocation7 + $0x5e4] sm:$0xf] }
 0x1dc   :  { %3815 = vmatpush.bf16.msrb.mxu0 %v8341_v58  ;;  %3784 = vmatmul.bf16.vlgmr.msra.gmra.mxu1 %v11294_v45  ;;  %v8245_v58 = vor.u32 %v10097_v48, %v8244_v1  ;;  %v7673_v14 = vor.u32 %v9950_v8, %v7670_v9  ;;  %v10022_v1 = vld [vmem:[#allocation7 + $0x464] sm:$0xf]  ;;  %v7958_v48 = vld [vmem:[#allocation7 + $0x478] sm:$0xf0]  ;;  %v8365_v8 = vor.u32 %v10127_v60, %v8364_v59  ;;  %v8078_v59 = vld [vmem:[#allocation7 + $0x568] sm:$0xf0] }
 0x1dd   :  { %3828 = vmatpush.bf16.msrb.mxu1 %v8533_v10  ;;  %3797 = vmatmul.bf16.vlgmr.msra.gmra.mxu2 %v11300_v36  ;;  %v7481_v10 = vor.u32 %v9902_v7, %v7478_v23  ;;  %v10118_v7 = vld [vmem:[#allocation7 + $0x764] sm:$0xf]  ;;  %v8342_v23 = vld [vmem:[#allocation7 + $0x778] sm:$0xf0]  ;;  %v10100_v60 = vld [vmem:[#allocation7 + $0x6d4] sm:$0xf] }
 0x1de   :  { %3841 = vmatpush.bf16.msrb.mxu2 %v7577_v11  ;;  %3810 = vmatmul.bf16.vlgmr.msra.gmra.mxu3 %v11303_v27  ;;  %v8220_v11 = vld [vmem:[#allocation7 + $0x670] sm:$0xf] }
 0x1df   :  { %3854 = vmatpush.bf16.msrb.mxu3 %v7769_v15  ;;  %v8221_v31 = vor.u32 %v10091_v12, %v8220_v11  ;;  %v7961_v11 = vor.u32 %v10022_v1, %v7958_v48  ;;  %v8153_v12 = vor.u32 %v10070_v3, %v8150_v6  ;;  %v9998_v1 = vld [vmem:[#allocation7 + $0x3a4] sm:$0xf]  ;;  %v7862_v48 = vld [vmem:[#allocation7 + $0x3b8] sm:$0xf0] }
 0x1e0   :  { %3816 = vmatpush.bf16.msrb.mxu0 %v8317_v20  ;;  %v3590_v15 = vpop.f32.mrf.mxu2  ;;  %v9944_v20 = vld [vmem:[#allocation7 + $0x1f4] sm:$0xf]  ;;  %v10046_v3 = vld [vmem:[#allocation7 + $0x524] sm:$0xf] }
 0x1e1   :  { %3829 = vmatpush.bf16.msrb.mxu1 %v8509_v21  ;;  %v3591_v30 = vadd.f32 %v3590_v15, %v3578_v5  ;;  %v3603_v19 = vpop.f32.mrf.mxu3  ;;  %v7646_v21 = vld [vmem:[#allocation7 + $0x208] sm:$0xf0]  ;;  %v3579_v24 = vpop.f32.mrf.mxu1  ;;  %v10094_v6 = vld [vmem:[#allocation7 + $0x6a4] sm:$0xf] }
 0x1e2   :  { %3842 = vmatpush.bf16.msrb.mxu2 %v7553_v29  ;;  %v3566_v29 = vpop.f32.mrf.mxu0  ;;  %v7649_v49 = vor.u32 %v9944_v20, %v7646_v21  ;;  %v7934_v15 = vld [vmem:[#allocation7 + $0x448] sm:$0xf0]  ;;  %v10160_v20 = vld [vmem:[#allocation7 + $0x8b4] sm:$0xf] }
 0x1e3   :  { %3855 = vmatpush.bf16.msrb.mxu3 %v7745_v26  ;;  %v11323_v25 = vadd.f32 %v3603_v19, %v3591_v30  ;;  %v8413_v26 = vor.u32 %v10139_v16, %v8412_v13  ;;  %v8345_v13 = vor.u32 %v10118_v7, %v8342_v23  ;;  %v10064_v16 = vld [vmem:[#allocation7 + $0x5b4] sm:$0xf]  ;;  %v8318_v19 = vld [vmem:[#allocation7 + $0x748] sm:$0xf0]  ;;  %v8246_v7 = vld [vmem:[#allocation7 + $0x6b8] sm:$0xf0] }
 0x1e4   :  { %3817 = vmatpush.bf16.msrb.mxu0 %v8293_v33  ;;  %v10133_v33 = vld [vmem:[#allocation7 + $0x7d4] sm:$0xf0]  ;;  %v10112_v30 = vld [vmem:[#allocation7 + $0x734] sm:$0xf]  ;;  %v8510_v21 = vld [vmem:[#allocation7 + $0x8c8] sm:$0xf0] }
 0x1e5   :  { %3830 = vmatpush.bf16.msrb.mxu1 %v8485_v50  ;;  %v9890_v50 = vld [vmem:[#allocation7 + $0x44] sm:$0xf]  ;;  %v8389_v37 = vor.u32 %v10133_v33, %v8388_v56  ;;  %v8321_v24 = vor.u32 %v10112_v30, %v8318_v19  ;;  %v8513_v44 = vor.u32 %v10160_v20, %v8510_v21  ;;  %v8102_v56 = vld [vmem:[#allocation7 + $0x598] sm:$0xf0]  ;;  %v10136_v30 = vld [vmem:[#allocation7 + $0x7f4] sm:$0xf] }
 0x1e6   :  { %3843 = vmatpush.bf16.msrb.mxu2 %v7529_v51  ;;  %v7430_v51 = vld [vmem:[#allocation7 + $0x58] sm:$0xf0]  ;;  %v8105_v53 = vor.u32 %v10058_v35, %v8102_v56  ;;  %v10142_v23 = vld [vmem:[#allocation7 + $0x824] sm:$0xf]  ;;  %v8414_v19 = vld [vmem:[#allocation7 + $0x808] sm:$0xf0] }
 0x1e7   :  { %3856 = vmatpush.bf16.msrb.mxu3 %v7721_v55  ;;  %v8172_v55 = vld [vmem:[#allocation7 + $0x610] sm:$0xf]  ;;  %v7433_v43 = vor.u32 %v9890_v50, %v7430_v51  ;;  %v8294_v33 = vld [vmem:[#allocation7 + $0x718] sm:$0xf0]  ;;  %v10154_v50 = vld [vmem:[#allocation7 + $0x884] sm:$0xf] }
 0x1e8   :  { %3818 = vmatpush.bf16.msrb.mxu0 %v8269_v46  ;;  %v7406_v46 = vld [vmem:[#allocation7 + $0x28] sm:$0xf0]  ;;  %v8173_v5 = vor.u32 %v10079_v57, %v8172_v55  ;;  %v8486_v51 = vld [vmem:[#allocation7 + $0x898] sm:$0xf0]  ;;  %v10004_v55 = vld [vmem:[#allocation7 + $0x3d4] sm:$0xf] }
 0x1e9   :  { %3831 = vmatpush.bf16.msrb.mxu1 %v8461_v47  ;;  %v7598_v47 = vld [vmem:[#allocation7 + $0x1a8] sm:$0xf0]  ;;  %v7409_v9 = vor.u32 %v9884_v61, %v7406_v46  ;;  %v10034_v35 = vld [vmem:[#allocation7 + $0x4c4] sm:$0xf]  ;;  %v8006_v56 = vld [vmem:[#allocation7 + $0x4d8] sm:$0xf0] }
 0x1ea   :  { %3844 = vmatpush.bf16.msrb.mxu2 %v7505_v0  ;;  %v3592_v0 = vpop.f32.mrf.mxu2  ;;  %v7886_v57 = vld [vmem:[#allocation7 + $0x3e8] sm:$0xf0] }
 0x1eb   :  { %3857 = vmatpush.bf16.msrb.mxu3 %v7697_v4  ;;  %v3605_v4 = vpop.f32.mrf.mxu3  ;;  %v8462_v46 = vld [vmem:[#allocation7 + $0x868] sm:$0xf0] }
 0x1ec   :  { %3819 = vmatpush.bf16.msrb.mxu0 %v8245_v58  ;;  %v10166_v58 = vld [vmem:[#allocation7 + $0x8e4] sm:$0xf] }
 0x1ed   :  { %3832 = vmatpush.bf16.msrb.mxu1 %v8437_v22  ;;  %v8534_v22 = vld [vmem:[#allocation7 + $0x8f8] sm:$0xf0] }
 0x1ee   :  { %3845 = vmatpush.bf16.msrb.mxu2 %v7481_v10  ;;  %v7601_v10 = vor.u32 %v9932_v63, %v7598_v47  ;;  %v8537_v17 = vor.u32 %v10166_v58, %v8534_v22  ;;  %v8249_v22 = vor.u32 %v10094_v6, %v8246_v7  ;;  %v10456_v6 = vld [vmem:[#allocation11 + $0x2ec] sm:$0xf0] }
 0x1ef   :  { %3858 = vmatpush.bf16.msrb.mxu3 %v7673_v14  ;;  %v10016_v14 = vld [vmem:[#allocation7 + $0x434] sm:$0xf] }
 0x1f0   :  { %3820 = vmatpush.bf16.msrb.mxu0 %v8221_v31  ;;  %v7937_v29 = vor.u32 %v10016_v14, %v7934_v15  ;;  %v8129_v31 = vor.u32 %v10064_v16, %v8126_v18  ;;  %v8030_v15 = vld [vmem:[#allocation7 + $0x508] sm:$0xf0]  ;;  %v10088_v16 = vld [vmem:[#allocation7 + $0x674] sm:$0xf] }
 0x1f1   :  { %3833 = vmatpush.bf16.msrb.mxu1 %v8413_v26  ;;  %v10010_v26 = vld [vmem:[#allocation7 + $0x404] sm:$0xf] }
 0x1f2   :  { %3846 = vmatpush.bf16.msrb.mxu2 %v7457_v32  ;;  %v7910_v32 = vld [vmem:[#allocation7 + $0x418] sm:$0xf0] }
 0x1f3   :  { %3859 = vmatpush.bf16.msrb.mxu3 %v7649_v49  ;;  %v10106_v49 = vld [vmem:[#allocation7 + $0x704] sm:$0xf]  ;;  %v7913_v52 = vor.u32 %v10010_v26, %v7910_v32  ;;  %v7814_v32 = vld [vmem:[#allocation7 + $0x358] sm:$0xf0] }
 0x1f4   :  { %3821 = vmatpush.bf16.msrb.mxu0 %v8197_v54  ;;  %v8297_v54 = vor.u32 %v10106_v49, %v8294_v33  ;;  %v9986_v26 = vld [vmem:[#allocation7 + $0x344] sm:$0xf]  ;;  %v8198_v33 = vld [vmem:[#allocation7 + $0x658] sm:$0xf0] }
 0x1f5   :  { %3834 = vmatpush.bf16.msrb.mxu1 %v8389_v37  ;;  %v10052_v37 = vld [vmem:[#allocation7 + $0x554] sm:$0xf]  ;;  %v10082_v49 = vld [vmem:[#allocation7 + $0x644] sm:$0xf] }
 0x1f6   :  { %3847 = vmatpush.bf16.msrb.mxu2 %v7433_v43  ;;  %v8489_v43 = vor.u32 %v10154_v50, %v8486_v51  ;;  %v8081_v47 = vor.u32 %v10052_v37, %v8078_v59  ;;  %v10130_v50 = vld [vmem:[#allocation7 + $0x7c4] sm:$0xf]  ;;  %v8390_v51 = vld [vmem:[#allocation7 + $0x7d8] sm:$0xf0]  ;;  %v10028_v37 = vld [vmem:[#allocation7 + $0x494] sm:$0xf] }
 0x1f7   :  { %3860 = vmatpush.bf16.msrb.mxu3 %v7625_v62  ;;  %v10148_v62 = vld [vmem:[#allocation7 + $0x854] sm:$0xf] }
 0x1f8   :  { %3822 = vmatpush.bf16.msrb.mxu0 %v8173_v5  ;;  %v11329_v61 = vpop.f32.mrf.mxu0  ;;  %v8465_v4 = vor.u32 %v10148_v62, %v8462_v46  ;;  %v8054_v5 = vld [vmem:[#allocation7 + $0x538] sm:$0xf0]  ;;  %v10076_v59 = vld [vmem:[#allocation7 + $0x614] sm:$0xf]  ;;  %v8366_v46 = vld [vmem:[#allocation7 + $0x7a8] sm:$0xf0] }
 0x1f9   :  { %3835 = vmatpush.bf16.msrb.mxu1 %v8365_v8  ;;  %v11331_v63 = vpop.f32.mrf.mxu1  ;;  %v8438_v8 = vld [vmem:[#allocation7 + $0x838] sm:$0xf0]  ;;  %v8057_v58 = vor.u32 %v10046_v3, %v8054_v5  ;;  %v10124_v62 = vld [vmem:[#allocation7 + $0x794] sm:$0xf]  ;;  %v8908_v5 = vld [vmem:[#allocation11 + $0x2e0] sm:$0xf] }
 0x1fa   :  { %3848 = vmatpush.bf16.msrb.mxu2 %v7409_v9  ;;  %v7865_v9 = vor.u32 %v9998_v1, %v7862_v48  ;;  %v8780_v1 = vld [vmem:[#allocation11 + $0x1e0] sm:$0xf] }
 0x1fb   :  { %3861 = vmatpush.bf16.msrb.mxu3 %v7601_v10  ;;  %3823 = vmatmul.bf16.vlgmr.msrb.gmra.mxu0 %v11306_v28  ;;  %v9992_v10 = vld [vmem:[#allocation7 + $0x374] sm:$0xf] }
 0x1fc   :  { %3867 = vmatpush.bf16.msra.mxu0 %v7961_v11  ;;  %3836 = vmatmul.bf16.vlgmr.msrb.gmra.mxu1 %v11309_v40  ;;  %v7838_v11 = vld [vmem:[#allocation7 + $0x388] sm:$0xf0] }
 0x1fd   :  { %3880 = vmatpush.bf16.msra.mxu1 %v8153_v12  ;;  %3849 = vmatmul.bf16.vlgmr.msrb.gmra.mxu2 %v11290_v39  ;;  %v8270_v39 = vld [vmem:[#allocation7 + $0x6e8] sm:$0xf0]  ;;  %v10040_v12 = vld [vmem:[#allocation7 + $0x4f4] sm:$0xf]  ;;  %v7841_v21 = vor.u32 %v9992_v10, %v7838_v11  ;;  %v8909_v11 = vor.u32 %v10456_v6, %v8908_v5  ;;  %v8844_v5 = vld [vmem:[#allocation11 + $0x260] sm:$0xf] }
 0x1fe   :  { %3893 = vmatpush.bf16.msra.mxu2 %v8345_v13  ;;  %3862 = vmatmul.bf16.vlgmr.msrb.gmra.mxu3 %v11294_v45  ;;  %v7889_v45 = vor.u32 %v10004_v55, %v7886_v57  ;;  %v8273_v0 = vor.u32 %v10100_v60, %v8270_v39  ;;  %v8441_v13 = vor.u32 %v10142_v23, %v8438_v8  ;;  %v8174_v39 = vld [vmem:[#allocation7 + $0x628] sm:$0xf0]  ;;  %v9036_v8 = vld [vmem:[#allocation11 + $0x3e0] sm:$0xf] }
 0x1ff   :  { %3906 = vmatpush.bf16.msra.mxu3 %v8537_v17  ;;  %v8222_v17 = vld [vmem:[#allocation7 + $0x688] sm:$0xf0]  ;;  %v8009_v55 = vor.u32 %v10034_v35, %v8006_v56  ;;  %v8201_v57 = vor.u32 %v10082_v49, %v8198_v33  ;;  %v8393_v60 = vor.u32 %v10130_v50, %v8390_v51  ;;  %v8177_v23 = vor.u32 %v10076_v59, %v8174_v39  ;;  %v8748_v35 = vld [vmem:[#allocation11 + $0x1a0] sm:$0xf]  ;;  %v10416_v56 = vld [vmem:[#allocation11 + $0x1ac] sm:$0xf0] }
 0x200   :  { %3868 = vmatpush.bf16.msra.mxu0 %v7937_v29  ;;  %v11333_v14 = vpop.f32.mrf.mxu2  ;;  %v3618_v20 = vpop.f32.mrf.mxu0  ;;  %v8876_v49 = vld [vmem:[#allocation11 + $0x2a0] sm:$0xf]  ;;  %v10448_v33 = vld [vmem:[#allocation11 + $0x2ac] sm:$0xf0]  ;;  %v3617_v50 = vadd.f32 %v11329_v61, %v11265_v42 }
 0x201   :  { %3881 = vmatpush.bf16.msra.mxu1 %v8129_v31  ;;  %v11335_v18 = vpop.f32.mrf.mxu3  ;;  %v3631_v29 = vpop.f32.mrf.mxu1  ;;  %v8033_v31 = vor.u32 %v10040_v12, %v8030_v15  ;;  %v8636_v12 = vld [vmem:[#allocation11 + $0xc0] sm:$0xf]  ;;  %v10412_v42 = vld [vmem:[#allocation11 + $0x18c] sm:$0xf0] }
 0x202   :  { %3894 = vmatpush.bf16.msra.mxu2 %v8321_v24  ;;  %v8225_v24 = vor.u32 %v10088_v16, %v8222_v17  ;;  %v8764_v15 = vld [vmem:[#allocation11 + $0x1c0] sm:$0xf]  ;;  %v10420_v17 = vld [vmem:[#allocation11 + $0x1cc] sm:$0xf0] }
 0x203   :  { %3907 = vmatpush.bf16.msra.mxu3 %v8513_v44  ;;  %v8417_v44 = vor.u32 %v10136_v30, %v8414_v19  ;;  %v8892_v30 = vld [vmem:[#allocation11 + $0x2c0] sm:$0xf]  ;;  %v10452_v19 = vld [vmem:[#allocation11 + $0x2cc] sm:$0xf0] }
 0x204   :  { %3869 = vmatpush.bf16.msra.mxu0 %v7913_v52  ;;  %v7817_v52 = vor.u32 %v9986_v26, %v7814_v32  ;;  %v9020_v20 = vld [vmem:[#allocation11 + $0x3c0] sm:$0xf]  ;;  %v10384_v32 = vld [vmem:[#allocation11 + $0xac] sm:$0xf0] }
 0x205   :  { %3882 = vmatpush.bf16.msra.mxu1 %v8105_v53  ;;  %v9980_v53 = vld [vmem:[#allocation7 + $0x314] sm:$0xf]  ;;  %v8620_v26 = vld [vmem:[#allocation11 + $0xa0] sm:$0xf] }
 0x206   :  { %3895 = vmatpush.bf16.msra.mxu2 %v8297_v54  ;;  %v7790_v54 = vld [vmem:[#allocation7 + $0x328] sm:$0xf0]  ;;  %v9004_v51 = vld [vmem:[#allocation11 + $0x3a0] sm:$0xf]  ;;  %v10476_v39 = vld [vmem:[#allocation11 + $0x38c] sm:$0xf0] }
 0x207   :  { %3908 = vmatpush.bf16.msra.mxu3 %v8489_v43  ;;  %v7982_v43 = vld [vmem:[#allocation7 + $0x4a8] sm:$0xf0]  ;;  %v7793_v3 = vor.u32 %v9980_v53, %v7790_v54  ;;  %v8621_v53 = vor.u32 %v10384_v32, %v8620_v26  ;;  %v8877_v54 = vor.u32 %v10448_v33, %v8876_v49  ;;  %v8860_v61 = vld [vmem:[#allocation11 + $0x280] sm:$0xf] }
 0x208   :  { %3870 = vmatpush.bf16.msra.mxu0 %v7889_v45  ;;  %v3644_v45 = vpop.f32.mrf.mxu2  ;;  %v7985_v7 = vor.u32 %v10028_v37, %v7982_v43  ;;  %v8732_v37 = vld [vmem:[#allocation11 + $0x180] sm:$0xf] }
 0x209   :  { %3883 = vmatpush.bf16.msra.mxu1 %v8081_v47  ;;  %v8652_v47 = vld [vmem:[#allocation11 + $0xe0] sm:$0xf]  ;;  %v3657_v48 = vpop.f32.mrf.mxu3  ;;  %v8733_v45 = vor.u32 %v10412_v42, %v8732_v37 }
 0x20a   :  { %3896 = vmatpush.bf16.msra.mxu2 %v8273_v0  ;;  %v10392_v0 = vld [vmem:[#allocation11 + $0xec] sm:$0xf0]  ;;  %v8716_v48 = vld [vmem:[#allocation11 + $0x160] sm:$0xf] }
 0x20b   :  { %3909 = vmatpush.bf16.msra.mxu3 %v8465_v4  ;;  %v10424_v4 = vld [vmem:[#allocation11 + $0x1ec] sm:$0xf0]  ;;  %v8972_v6 = vld [vmem:[#allocation11 + $0x360] sm:$0xf] }
 0x20c   :  { %3871 = vmatpush.bf16.msra.mxu0 %v7865_v9  ;;  %v10488_v9 = vld [vmem:[#allocation11 + $0x3ec] sm:$0xf0]  ;;  %v8781_v10 = vor.u32 %v10424_v4, %v8780_v1  ;;  %v8684_v49 = vld [vmem:[#allocation11 + $0x120] sm:$0xf] }
 0x20d   :  { %3884 = vmatpush.bf16.msra.mxu1 %v8057_v58  ;;  %v8369_v58 = vor.u32 %v10124_v62, %v8366_v46  ;;  %v9037_v16 = vor.u32 %v10488_v9, %v9036_v8  ;;  %v10376_v1 = vld [vmem:[#allocation11 + $0x6c] sm:$0xf0]  ;;  %v8540_v37 = vld [vmem:[#allocation11] sm:$0xf] }
 0x20e   :  { %3897 = vmatpush.bf16.msra.mxu2 %v8249_v22  ;;  %v8653_v22 = vor.u32 %v10392_v0, %v8652_v47  ;;  %v8588_v0 = vld [vmem:[#allocation11 + $0x60] sm:$0xf]  ;;  %v10408_v4 = vld [vmem:[#allocation11 + $0x16c] sm:$0xf0] }
 0x20f   :  { %3910 = vmatpush.bf16.msra.mxu3 %v8441_v13  ;;  %v10388_v13 = vld [vmem:[#allocation11 + $0xcc] sm:$0xf0]  ;;  %v8589_v8 = vor.u32 %v10376_v1, %v8588_v0  ;;  %v8717_v9 = vor.u32 %v10408_v4, %v8716_v48  ;;  %v10390_v1 = vld [vmem:[#allocation11 + $0xe4] sm:$0xf]  ;;  %v8654_v48 = vld [vmem:[#allocation11 + $0xf0] sm:$0xf0] }
 0x210   :  { %3872 = vmatpush.bf16.msra.mxu0 %v7841_v21  ;;  %v10484_v21 = vld [vmem:[#allocation11 + $0x3cc] sm:$0xf0]  ;;  %v8637_v29 = vor.u32 %v10388_v13, %v8636_v12 }
 0x211   :  { %3885 = vmatpush.bf16.msra.mxu1 %v8033_v31  ;;  %v8765_v31 = vor.u32 %v10420_v17, %v8764_v15  ;;  %v10404_v15 = vld [vmem:[#allocation11 + $0x14c] sm:$0xf0] }
 0x212   :  { %3898 = vmatpush.bf16.msra.mxu2 %v8225_v24  ;;  %v8893_v24 = vor.u32 %v10452_v19, %v8892_v30  ;;  %v10436_v17 = vld [vmem:[#allocation11 + $0x24c] sm:$0xf0] }
 0x213   :  { %3911 = vmatpush.bf16.msra.mxu3 %v8417_v44  ;;  %v9021_v44 = vor.u32 %v10484_v21, %v9020_v20  ;;  %v8956_v20 = vld [vmem:[#allocation11 + $0x340] sm:$0xf]  ;;  %v10468_v21 = vld [vmem:[#allocation11 + $0x34c] sm:$0xf0] }
 0x214   :  { %3873 = vmatpush.bf16.msra.mxu0 %v7817_v52  ;;  %v10480_v52 = vld [vmem:[#allocation11 + $0x3ac] sm:$0xf0]  ;;  %v8957_v33 = vor.u32 %v10468_v21, %v8956_v20  ;;  %v8766_v21 = vld [vmem:[#allocation11 + $0x1d0] sm:$0xf0] }
 0x215   :  { %3886 = vmatpush.bf16.msra.mxu1 %v8009_v55  ;;  %v8604_v55 = vld [vmem:[#allocation11 + $0x80] sm:$0xf]  ;;  %v9005_v43 = vor.u32 %v10480_v52, %v9004_v51  ;;  %v10432_v52 = vld [vmem:[#allocation11 + $0x22c] sm:$0xf0] }
 0x216   :  { %3899 = vmatpush.bf16.msra.mxu2 %v8201_v57  ;;  %v10380_v57 = vld [vmem:[#allocation11 + $0x8c] sm:$0xf0]  ;;  %v8812_v51 = vld [vmem:[#allocation11 + $0x220] sm:$0xf] }
 0x217   :  { %3912 = vmatpush.bf16.msra.mxu3 %v8393_v60  ;;  %v8988_v60 = vld [vmem:[#allocation11 + $0x380] sm:$0xf] }
 0x218   :  { %3874 = vmatpush.bf16.msra.mxu0 %v7793_v3  ;;  %v3668_v59 = vpop.f32.mrf.mxu0  ;;  %v8989_v3 = vor.u32 %v10476_v39, %v8988_v60 }
 0x219   :  { %3887 = vmatpush.bf16.msra.mxu1 %v7985_v7  ;;  %v3681_v62 = vpop.f32.mrf.mxu1  ;;  %v10472_v7 = vld [vmem:[#allocation11 + $0x36c] sm:$0xf0] }
 0x21a   :  { %3900 = vmatpush.bf16.msra.mxu2 %v8177_v23  ;;  %v11345_v23 = vld [vmem:[#allocation10] sm:$0x3f]  ;;  %v8973_v12 = vor.u32 %v10472_v7, %v8972_v6  ;;  %v10454_v6 = vld [vmem:[#allocation11 + $0x2e4] sm:$0xf]  ;;  %v8910_v7 = vld [vmem:[#allocation11 + $0x2f0] sm:$0xf0] }
 0x21b   :  { %3913 = vmatpush.bf16.msra.mxu3 %v8369_v58  ;;  %3875 = vmatmul.bf16.vlgmr.msra.gmra.mxu0 %v11300_v36  ;;  %v8749_v36 = vor.u32 %v10416_v56, %v8748_v35  ;;  %v10368_v56 = vld [vmem:[#allocation11 + $0x2c] sm:$0xf0] }
 0x21c   :  { %4725 = vmatpush.bf16.msrb.mxu0 %v8653_v22  ;;  %3888 = vmatmul.bf16.vlgmr.msra.gmra.mxu1 %v11303_v27  ;;  %v3630_v27 = vadd.f32 %v11331_v63, %v3617_v50  ;;  %v10440_v63 = vld [vmem:[#allocation11 + $0x26c] sm:$0xf0]  ;;  %v8572_v22 = vld [vmem:[#allocation11 + $0x40] sm:$0xf] }
 0x21d   :  { %4738 = vmatpush.bf16.msrb.mxu1 %v8781_v10  ;;  %3901 = vmatmul.bf16.vlgmr.msra.gmra.mxu2 %v11306_v28  ;;  %v10444_v28 = vld [vmem:[#allocation11 + $0x28c] sm:$0xf0]  ;;  %v8845_v58 = vor.u32 %v10440_v63, %v8844_v5  ;;  %v8782_v63 = vld [vmem:[#allocation11 + $0x1f0] sm:$0xf0] }
 0x21e   :  { %4751 = vmatpush.bf16.msrb.mxu2 %v8909_v11  ;;  %3914 = vmatmul.bf16.vlgmr.msra.gmra.mxu3 %v11309_v40  ;;  %v8605_v40 = vor.u32 %v10380_v57, %v8604_v55  ;;  %v3643_v46 = vadd.f32 %v11333_v14, %v3630_v27  ;;  %v8861_v47 = vor.u32 %v10444_v28, %v8860_v61  ;;  %v10372_v10 = vld [vmem:[#allocation11 + $0x4c] sm:$0xf0]  ;;  %v8700_v11 = vld [vmem:[#allocation11 + $0x140] sm:$0xf] }
 0x21f   :  { %4764 = vmatpush.bf16.msrb.mxu3 %v9037_v16  ;;  %v8828_v16 = vld [vmem:[#allocation11 + $0x240] sm:$0xf]  ;;  %v8701_v32 = vor.u32 %v10404_v15, %v8700_v11  ;;  %v10400_v50 = vld [vmem:[#allocation11 + $0x12c] sm:$0xf0]  ;;  %v8813_v61 = vor.u32 %v10432_v52, %v8812_v51  ;;  %v10386_v11 = vld [vmem:[#allocation11 + $0xc4] sm:$0xf] }
 0x220   :  { %4726 = vmatpush.bf16.msrb.mxu0 %v8637_v29  ;;  %v3656_v14 = vadd.f32 %v11335_v18, %v3643_v46  ;;  %v11348_v13 = vpop.f32.mrf.mxu2  ;;  %v3670_v18 = vpop.f32.mrf.mxu0  ;;  %v3921_v29 = vperm.slane %v11345_v23, 0  ;;  %v8829_v35 = vor.u32 %v10436_v17, %v8828_v16  ;;  %v10464_v55 = vld [vmem:[#allocation11 + $0x32c] sm:$0xf0]  ;;  %v8685_v42 = vor.u32 %v10400_v50, %v8684_v49  ;;  %v8668_v28 = vld [vmem:[#allocation11 + $0x100] sm:$0xf] }
 0x221   :  { %4739 = vmatpush.bf16.msrb.mxu1 %v8765_v31  ;;  %v11350_v19 = vpop.f32.mrf.mxu3  ;;  %v3922_v31 = vperm.slane %v11345_v23, 1  ;;  %v3683_v26 = vpop.f32.mrf.mxu1  ;;  %v10396_v27 = vld [vmem:[#allocation11 + $0x10c] sm:$0xf0]  ;;  %v8924_v46 = vld [vmem:[#allocation11 + $0x300] sm:$0xf]  ;;  %v8913_v16 = vor.u32 %v10454_v6, %v8910_v7 }
 0x222   :  { %4752 = vmatpush.bf16.msrb.mxu2 %v8893_v24  ;;  %v3669_v30 = vadd.f32 %v3668_v59, %v3656_v14  ;;  %v8573_v24 = vor.u32 %v10372_v10, %v8572_v22  ;;  %v8796_v59 = vld [vmem:[#allocation11 + $0x200] sm:$0xf]  ;;  %v3933_v60 = vadd.f32 %v3921_v29, %v11313_v2  ;;  %v8669_v2 = vor.u32 %v10396_v27, %v8668_v28  ;;  %v9038_v14 = vld [vmem:[#allocation11 + $0x3f0] sm:$0xf0]  ;;  %v10450_v18 = vld [vmem:[#allocation11 + $0x2c4] sm:$0xf] }
 0x223   :  { %4765 = vmatpush.bf16.msrb.mxu3 %v9021_v44  ;;  %v8556_v44 = vld [vmem:[#allocation11 + $0x20] sm:$0xf]  ;;  %v3934_v39 = vadd.f32 %v3922_v31, %v11323_v25  ;;  %v8657_v10 = vor.u32 %v10390_v1, %v8654_v48  ;;  %v8638_v17 = vld [vmem:[#allocation11 + $0xd0] sm:$0xf0]  ;;  %v10482_v31 = vld [vmem:[#allocation11 + $0x3c4] sm:$0xf] }
 0x224   :  { %4727 = vmatpush.bf16.msrb.mxu0 %v8621_v53  ;;  %v3682_v53 = vadd.f32 %v3681_v62, %v3669_v30  ;;  %v8557_v57 = vor.u32 %v10368_v56, %v8556_v44  ;;  %v10428_v62 = vld [vmem:[#allocation11 + $0x20c] sm:$0xf0]  ;;  %v10418_v30 = vld [vmem:[#allocation11 + $0x1c4] sm:$0xf]  ;;  %v8894_v29 = vld [vmem:[#allocation11 + $0x2d0] sm:$0xf0] }
 0x225   :  { %4740 = vmatpush.bf16.msrb.mxu1 %v8749_v36  ;;  %v3923_v36 = vperm.slane %v11345_v23, 2  ;;  %v8797_v25 = vor.u32 %v10428_v62, %v8796_v59  ;;  %v8769_v56 = vor.u32 %v10418_v30, %v8766_v21  ;;  %v8897_v49 = vor.u32 %v10450_v18, %v8894_v29  ;;  %v8622_v50 = vld [vmem:[#allocation11 + $0xb0] sm:$0xf0]  ;;  %v10414_v51 = vld [vmem:[#allocation11 + $0x1a4] sm:$0xf] }
 0x226   :  { %4753 = vmatpush.bf16.msrb.mxu2 %v8877_v54  ;;  %v8940_v54 = vld [vmem:[#allocation11 + $0x320] sm:$0xf]  ;;  %v10378_v28 = vld [vmem:[#allocation11 + $0x84] sm:$0xf]  ;;  %v8606_v27 = vld [vmem:[#allocation11 + $0x90] sm:$0xf0] }
 0x227   :  { %4766 = vmatpush.bf16.msrb.mxu3 %v9005_v43  ;;  %v10364_v43 = vld [vmem:[#allocation11 + $0xc] sm:$0xf0]  ;;  %v3935_v0 = vadd.f32 %v3923_v36, %v3682_v53  ;;  %v8750_v53 = vld [vmem:[#allocation11 + $0x1b0] sm:$0xf0]  ;;  %v10446_v36 = vld [vmem:[#allocation11 + $0x2a4] sm:$0xf] }
 0x228   :  { %4728 = vmatpush.bf16.msrb.mxu0 %v8605_v40  ;;  %v8941_v40 = vor.u32 %v10464_v55, %v8940_v54  ;;  %v8541_v5 = vor.u32 %v10364_v43, %v8540_v37  ;;  %v8878_v54 = vld [vmem:[#allocation11 + $0x2b0] sm:$0xf0]  ;;  %v3695_v55 = vadd.f32 %v11348_v13, %v11275_v38  ;;  %v10410_v59 = vld [vmem:[#allocation11 + $0x184] sm:$0xf]  ;;  %v3924_v29 = vperm.slane %v11345_v23, 3 }
 0x229   :  { %4741 = vmatpush.bf16.msrb.mxu1 %v8733_v45  ;;  %v10460_v45 = vld [vmem:[#allocation11 + $0x30c] sm:$0xf0]  ;;  %v3709_v4 = vpop.f32.mrf.mxu3  ;;  %v9006_v37 = vld [vmem:[#allocation11 + $0x3b0] sm:$0xf0]  ;;  %v10434_v30 = vld [vmem:[#allocation11 + $0x244] sm:$0xf] }
 0x22a   :  { %4754 = vmatpush.bf16.msrb.mxu2 %v8861_v47  ;;  %v3696_v47 = vpop.f32.mrf.mxu2  ;;  %v8925_v22 = vor.u32 %v10460_v45, %v8924_v46  ;;  %v8862_v38 = vld [vmem:[#allocation11 + $0x290] sm:$0xf0]  ;;  %v3708_v13 = vadd.f32 %v11350_v19, %v3695_v55  ;;  %v10474_v46 = vld [vmem:[#allocation11 + $0x384] sm:$0xf] }
 0x22b   :  { %4767 = vmatpush.bf16.msrb.mxu3 %v8989_v3  ;;  %v10422_v3 = vld [vmem:[#allocation11 + $0x1e4] sm:$0xf]  ;;  %v8990_v45 = vld [vmem:[#allocation11 + $0x390] sm:$0xf0] }
 0x22c   :  { %4729 = vmatpush.bf16.msrb.mxu0 %v8589_v8  ;;  %v10486_v8 = vld [vmem:[#allocation11 + $0x3e4] sm:$0xf]  ;;  %v8785_v15 = vor.u32 %v10422_v3, %v8782_v63  ;;  %v8993_v6 = vor.u32 %v10474_v46, %v8990_v45  ;;  %v8718_v7 = vld [vmem:[#allocation11 + $0x170] sm:$0xf0] }
 0x22d   :  { %4742 = vmatpush.bf16.msrb.mxu1 %v8717_v9  ;;  %v3939_v9 = vmax.f32 %v3933_v60, 0.0  ;;  %v9041_v20 = vor.u32 %v10486_v8, %v9038_v14  ;;  %v10374_v4 = vld [vmem:[#allocation11 + $0x64] sm:$0xf]  ;;  %v8974_v8 = vld [vmem:[#allocation11 + $0x370] sm:$0xf0] }
 0x22e   :  { %4755 = vmatpush.bf16.msrb.mxu2 %v8845_v58  ;;  %v3940_v58 = vmax.f32 %v3934_v39, 0.0  ;;  %v8734_v39 = vld [vmem:[#allocation11 + $0x190] sm:$0xf0]  ;;  %v10406_v63 = vld [vmem:[#allocation11 + $0x164] sm:$0xf] }
 0x22f   :  { %4768 = vmatpush.bf16.msrb.mxu3 %v8973_v12  ;;  %v3941_v12 = vmax.f32 %v3935_v0, 0.0  ;;  %v11357_v26 = vpack.c.bf16 %v3939_v9, %v3939_v9  ;;  %v8609_v0 = vor.u32 %v10378_v28, %v8606_v27  ;;  %v8737_v48 = vor.u32 %v10410_v59, %v8734_v39  ;;  %v10470_v19 = vld [vmem:[#allocation11 + $0x364] sm:$0xf]  ;;  %v8686_v55 = vld [vmem:[#allocation11 + $0x130] sm:$0xf0] }
 0x230   :  { %4730 = vmatpush.bf16.msrb.mxu0 %v8573_v24  ;;  %v9022_v24 = vld [vmem:[#allocation11 + $0x3d0] sm:$0xf0]  ;;  %v10362_v28 = vld [vmem:[#allocation11 + $0x4] sm:$0xf] }
 0x231   :  { %4743 = vmatpush.bf16.msrb.mxu1 %v8701_v32  ;;  %v11359_v32 = vpack.c.bf16 %v3940_v58, %v3940_v58  ;;  %v11361_v44 = vpack.c.bf16 %v3941_v12, %v3941_v12  ;;  %v9025_v52 = vor.u32 %v10482_v31, %v9022_v24  ;;  %v8721_v58 = vor.u32 %v10406_v63, %v8718_v7  ;;  %v10402_v12 = vld [vmem:[#allocation11 + $0x144] sm:$0xf]  ;;  %v8542_v27 = vld [vmem:[#allocation11 + $0x10] sm:$0xf0]  ;;  %v8916_v7 = vld [vmem:[#allocation11 + $0x2e8] sm:$0xf] }
 0x232   :  { %4756 = vmatpush.bf16.msrb.mxu2 %v8829_v35  ;;  %v8641_v35 = vor.u32 %v10386_v11, %v8638_v17  ;;  %v8574_v11 = vld [vmem:[#allocation11 + $0x50] sm:$0xf0]  ;;  %v10466_v24 = vld [vmem:[#allocation11 + $0x344] sm:$0xf]  ;;  %v8545_v63 = vor.u32 %v10362_v28, %v8542_v27  ;;  %v8868_v28 = vld [vmem:[#allocation11 + $0x288] sm:$0xf] }
 0x233   :  { %4769 = vmatpush.bf16.msrb.mxu3 %v8957_v33  ;;  %v10382_v33 = vld [vmem:[#allocation11 + $0xa4] sm:$0xf]  ;;  %v8702_v17 = vld [vmem:[#allocation11 + $0x150] sm:$0xf0]  ;;  %v10445_v27 = vld [vmem:[#allocation11 + $0x294] sm:$0xf0] }
 0x234   :  { %4731 = vmatpush.bf16.msrb.mxu0 %v8557_v57  ;;  %v10478_v57 = vld [vmem:[#allocation11 + $0x3a4] sm:$0xf]  ;;  %v8625_v43 = vor.u32 %v10382_v33, %v8622_v50  ;;  %v8705_v50 = vor.u32 %v10402_v12, %v8702_v17  ;;  %v8798_v45 = vld [vmem:[#allocation11 + $0x210] sm:$0xf0]  ;;  %v10389_v12 = vld [vmem:[#allocation11 + $0xd4] sm:$0xf0] }
 0x235   :  { %4744 = vmatpush.bf16.msrb.mxu1 %v8685_v42  ;;  %v8753_v42 = vor.u32 %v10414_v51, %v8750_v53  ;;  %v9009_v60 = vor.u32 %v10478_v57, %v9006_v37  ;;  %v8558_v53 = vld [vmem:[#allocation11 + $0x30] sm:$0xf0]  ;;  %v10430_v57 = vld [vmem:[#allocation11 + $0x224] sm:$0xf]  ;;  %v10421_v17 = vld [vmem:[#allocation11 + $0x1d4] sm:$0xf0] }
 0x236   :  { %4757 = vmatpush.bf16.msrb.mxu2 %v8813_v61  ;;  %v8881_v61 = vor.u32 %v10446_v36, %v8878_v54  ;;  %v10398_v36 = vld [vmem:[#allocation11 + $0x124] sm:$0xf]  ;;  %v8814_v37 = vld [vmem:[#allocation11 + $0x230] sm:$0xf0] }
 0x237   :  { %4770 = vmatpush.bf16.msrb.mxu3 %v8941_v40  ;;  %v10442_v40 = vld [vmem:[#allocation11 + $0x284] sm:$0xf]  ;;  %v8689_v39 = vor.u32 %v10398_v36, %v8686_v55  ;;  %v10481_v36 = vld [vmem:[#allocation11 + $0x3b4] sm:$0xf0] }
 0x238   :  { %4732 = vmatpush.bf16.msrb.mxu0 %v8541_v5  ;;  %v3720_v62 = vpop.f32.mrf.mxu0  ;;  %v8865_v3 = vor.u32 %v10442_v40, %v8862_v38  ;;  %v8590_v5 = vld [vmem:[#allocation11 + $0x70] sm:$0xf0]  ;;  %v10394_v59 = vld [vmem:[#allocation11 + $0x104] sm:$0xf]  ;;  %v8817_v40 = vor.u32 %v10430_v57, %v8814_v37  ;;  %v8612_v37 = vld [vmem:[#allocation11 + $0x88] sm:$0xf] }
 0x239   :  { %4745 = vmatpush.bf16.msrb.mxu1 %v8669_v2  ;;  %v3733_v47 = vpop.f32.mrf.mxu1  ;;  %v3721_v1 = vadd.f32 %v3720_v62, %v3708_v13  ;;  %v10438_v2 = vld [vmem:[#allocation11 + $0x264] sm:$0xf]  ;;  %v8593_v14 = vor.u32 %v10374_v4, %v8590_v5  ;;  %v8670_v38 = vld [vmem:[#allocation11 + $0x110] sm:$0xf0]  ;;  %v10393_v4 = vld [vmem:[#allocation11 + $0xf4] sm:$0xf0] }
 0x23a   :  { %4758 = vmatpush.bf16.msrb.mxu2 %v8797_v25  ;;  %v8846_v25 = vld [vmem:[#allocation11 + $0x270] sm:$0xf0]  ;;  %v10426_v13 = vld [vmem:[#allocation11 + $0x204] sm:$0xf]  ;;  %v8788_v5 = vld [vmem:[#allocation11 + $0x1e8] sm:$0xf] }
 0x23b   :  { %4771 = vmatpush.bf16.msrb.mxu3 %v8925_v22  ;;  %4733 = vmatmul.bf16.vlgmr.msrb.gmra.mxu0 %v11357_v26  ;;  %v3734_v9 = vadd.f32 %v3733_v47, %v3721_v1  ;;  %v8849_v22 = vor.u32 %v10438_v2, %v8846_v25  ;;  %v10458_v47 = vld [vmem:[#allocation11 + $0x304] sm:$0xf]  ;;  %v10457_v2 = vld [vmem:[#allocation11 + $0x2f4] sm:$0xf0]  ;;  %v8673_v25 = vor.u32 %v10394_v59, %v8670_v38 }
 0x23c   :  { %4777 = vmatpush.bf16.msra.mxu0 %v8657_v10  ;;  %4746 = vmatmul.bf16.vlgmr.msrb.gmra.mxu1 %v11359_v32  ;;  %v10370_v10 = vld [vmem:[#allocation11 + $0x44] sm:$0xf] }
 0x23d   :  { %4790 = vmatpush.bf16.msra.mxu1 %v8785_v15  ;;  %4759 = vmatmul.bf16.vlgmr.msrb.gmra.mxu2 %v11361_v44  ;;  %v8977_v15 = vor.u32 %v10470_v19, %v8974_v8  ;;  %v8801_v19 = vor.u32 %v10426_v13, %v8798_v45  ;;  %v9044_v8 = vld [vmem:[#allocation11 + $0x3e8] sm:$0xf] }
 0x23e   :  { %4803 = vmatpush.bf16.msra.mxu2 %v8913_v16  ;;  %v8596_v45 = vld [vmem:[#allocation11 + $0x68] sm:$0xf] }
 0x23f   :  { %4816 = vmatpush.bf16.msra.mxu3 %v9041_v20  ;;  %v8830_v20 = vld [vmem:[#allocation11 + $0x250] sm:$0xf0] }
 0x240   :  { %4778 = vmatpush.bf16.msra.mxu0 %v8641_v35  ;;  %v3746_v16 = vpop.f32.mrf.mxu2  ;;  %v3722_v31 = vpop.f32.mrf.mxu0  ;;  %v8958_v35 = vld [vmem:[#allocation11 + $0x350] sm:$0xf0]  ;;  %v8833_v51 = vor.u32 %v10434_v30, %v8830_v20  ;;  %v8900_v30 = vld [vmem:[#allocation11 + $0x2c8] sm:$0xf]  ;;  %v10453_v20 = vld [vmem:[#allocation11 + $0x2d4] sm:$0xf0] }
 0x241   :  { %4791 = vmatpush.bf16.msra.mxu1 %v8769_v56  ;;  %v3747_v21 = vadd.f32 %v3746_v16, %v3734_v9  ;;  %v3759_v18 = vpop.f32.mrf.mxu3  ;;  %v3735_v56 = vpop.f32.mrf.mxu1  ;;  %v8961_v54 = vor.u32 %v10466_v24, %v8958_v35  ;;  %v8901_v24 = vor.u32 %v10453_v20, %v8900_v30  ;;  %v8628_v35 = vld [vmem:[#allocation11 + $0xa8] sm:$0xf] }
 0x242   :  { %4804 = vmatpush.bf16.msra.mxu2 %v8897_v49  ;;  %v8577_v49 = vor.u32 %v10370_v10, %v8574_v11  ;;  %v8917_v10 = vor.u32 %v10457_v2, %v8916_v7  ;;  %v8644_v11 = vld [vmem:[#allocation11 + $0xc8] sm:$0xf]  ;;  %v10385_v56 = vld [vmem:[#allocation11 + $0xb4] sm:$0xf0] }
 0x243   :  { %4817 = vmatpush.bf16.msra.mxu3 %v9025_v52  ;;  %v3760_v33 = vadd.f32 %v3759_v18, %v3747_v21  ;;  %v10366_v52 = vld [vmem:[#allocation11 + $0x24] sm:$0xf]  ;;  %v9028_v21 = vld [vmem:[#allocation11 + $0x3c8] sm:$0xf]  ;;  %v10485_v18 = vld [vmem:[#allocation11 + $0x3d4] sm:$0xf0] }
 0x244   :  { %4779 = vmatpush.bf16.msra.mxu0 %v8625_v43  ;;  %v10462_v43 = vld [vmem:[#allocation11 + $0x324] sm:$0xf]  ;;  %v10473_v7 = vld [vmem:[#allocation11 + $0x374] sm:$0xf0] }
 0x245   :  { %4792 = vmatpush.bf16.msra.mxu1 %v8753_v42  ;;  %v3936_v23 = vadd.f32 %v3924_v29, %v3760_v33  ;;  %v8942_v42 = vld [vmem:[#allocation11 + $0x330] sm:$0xf0]  ;;  %v8645_v29 = vor.u32 %v10389_v12, %v8644_v11  ;;  %v9029_v33 = vor.u32 %v10485_v18, %v9028_v21  ;;  %v10437_v11 = vld [vmem:[#allocation11 + $0x254] sm:$0xf0] }
 0x246   :  { %4805 = vmatpush.bf16.msra.mxu2 %v8881_v61  ;;  %v8561_v61 = vor.u32 %v10366_v52, %v8558_v53  ;;  %v8945_v62 = vor.u32 %v10462_v43, %v8942_v42  ;;  %v10449_v52 = vld [vmem:[#allocation11 + $0x2b4] sm:$0xf0]  ;;  %v9012_v53 = vld [vmem:[#allocation11 + $0x3a8] sm:$0xf] }
 0x247   :  { %4818 = vmatpush.bf16.msra.mxu3 %v9009_v60  ;;  %v3942_v60 = vmax.f32 %v3936_v23, 0.0  ;;  %v10381_v23 = vld [vmem:[#allocation11 + $0x94] sm:$0xf0]  ;;  %v8740_v43 = vld [vmem:[#allocation11 + $0x188] sm:$0xf]  ;;  %v9013_v42 = vor.u32 %v10481_v36, %v9012_v53 }
 0x248   :  { %4780 = vmatpush.bf16.msra.mxu0 %v8609_v0  ;;  %v3748_v46 = vpop.f32.mrf.mxu2  ;;  %v8926_v0 = vld [vmem:[#allocation11 + $0x310] sm:$0xf0]  ;;  %v8613_v38 = vor.u32 %v10381_v23, %v8612_v37  ;;  %v10465_v53 = vld [vmem:[#allocation11 + $0x334] sm:$0xf0]  ;;  %v8676_v23 = vld [vmem:[#allocation11 + $0x108] sm:$0xf] }
 0x249   :  { %4793 = vmatpush.bf16.msra.mxu1 %v8737_v48  ;;  %v11370_v1 = vpack.c.bf16 %v3942_v60, %v3942_v60  ;;  %v3761_v48 = vpop.f32.mrf.mxu3  ;;  %v8929_v9 = vor.u32 %v10458_v47, %v8926_v0  ;;  %v8996_v60 = vld [vmem:[#allocation11 + $0x388] sm:$0xf]  ;;  %v8869_v46 = vor.u32 %v10445_v27, %v8868_v28  ;;  %v10377_v47 = vld [vmem:[#allocation11 + $0x74] sm:$0xf0] }
 0x24a   :  { %4806 = vmatpush.bf16.msra.mxu2 %v8865_v3  ;;  %v8660_v3 = vld [vmem:[#allocation11 + $0xe8] sm:$0xf]  ;;  %v8597_v2 = vor.u32 %v10377_v47, %v8596_v45  ;;  %v10429_v28 = vld [vmem:[#allocation11 + $0x214] sm:$0xf0]  ;;  %v10455_v45 = vld [vmem:[#allocation11 + $0x2ec] sm:$0xf] }
 0x24b   :  { %4819 = vmatpush.bf16.msra.mxu3 %v8993_v6  ;;  %v10425_v6 = vld [vmem:[#allocation11 + $0x1f4] sm:$0xf0]  ;;  %v8724_v0 = vld [vmem:[#allocation11 + $0x168] sm:$0xf]  ;;  %v8918_v47 = vld [vmem:[#allocation11 + $0x2f8] sm:$0xf0] }
 0x24c   :  { %4781 = vmatpush.bf16.msra.mxu0 %v8593_v14  ;;  %v10489_v14 = vld [vmem:[#allocation11 + $0x3f4] sm:$0xf0]  ;;  %4772 = vmatmul.bf16.vlgmr.msrb.gmra.mxu3 %v11370_v1  ;;  %v8932_v27 = vld [vmem:[#allocation11 + $0x308] sm:$0xf] }
 0x24d   :  { %4794 = vmatpush.bf16.msra.mxu1 %v8721_v58  ;;  %v8661_v58 = vor.u32 %v10393_v4, %v8660_v3  ;;  %v9045_v16 = vor.u32 %v10489_v14, %v9044_v8  ;;  %v10409_v4 = vld [vmem:[#allocation11 + $0x174] sm:$0xf0]  ;;  %v8708_v14 = vld [vmem:[#allocation11 + $0x148] sm:$0xf] }
 0x24e   :  { %4807 = vmatpush.bf16.msra.mxu2 %v8849_v22  ;;  %v8789_v22 = vor.u32 %v10425_v6, %v8788_v5  ;;  %v8852_v5 = vld [vmem:[#allocation11 + $0x268] sm:$0xf]  ;;  %v10373_v8 = vld [vmem:[#allocation11 + $0x54] sm:$0xf0] }
 0x24f   :  { %4820 = vmatpush.bf16.msra.mxu3 %v8977_v15  ;;  %v8772_v15 = vld [vmem:[#allocation11 + $0x1c8] sm:$0xf] }
 0x250   :  { %4782 = vmatpush.bf16.msra.mxu0 %v8577_v49  ;;  %v8773_v31 = vor.u32 %v10421_v17, %v8772_v15  ;;  %v8756_v49 = vld [vmem:[#allocation11 + $0x1a8] sm:$0xf]  ;;  %v10469_v17 = vld [vmem:[#allocation11 + $0x354] sm:$0xf0] }
 0x251   :  { %4795 = vmatpush.bf16.msra.mxu1 %v8705_v50  ;;  %v10417_v50 = vld [vmem:[#allocation11 + $0x1b4] sm:$0xf0]  ;;  %v8980_v6 = vld [vmem:[#allocation11 + $0x368] sm:$0xf] }
 0x252   :  { %4808 = vmatpush.bf16.msra.mxu2 %v8833_v51  ;;  %v8884_v51 = vld [vmem:[#allocation11 + $0x2a8] sm:$0xf]  ;;  %v8757_v55 = vor.u32 %v10417_v50, %v8756_v49 }
 0x253   :  { %4821 = vmatpush.bf16.msra.mxu3 %v8961_v54  ;;  %v8629_v54 = vor.u32 %v10385_v56, %v8628_v35  ;;  %v8885_v57 = vor.u32 %v10449_v52, %v8884_v51  ;;  %v10369_v35 = vld [vmem:[#allocation11 + $0x34] sm:$0xf0]  ;;  %v8692_v56 = vld [vmem:[#allocation11 + $0x128] sm:$0xf] }
 0x254   :  { %4783 = vmatpush.bf16.msra.mxu0 %v8561_v61  ;;  %v10413_v61 = vld [vmem:[#allocation11 + $0x194] sm:$0xf0]  ;;  %v8820_v50 = vld [vmem:[#allocation11 + $0x228] sm:$0xf] }
 0x255   :  { %4796 = vmatpush.bf16.msra.mxu1 %v8689_v39  ;;  %v10477_v39 = vld [vmem:[#allocation11 + $0x394] sm:$0xf0]  ;;  %v8948_v52 = vld [vmem:[#allocation11 + $0x328] sm:$0xf] }
 0x256   :  { %4809 = vmatpush.bf16.msra.mxu2 %v8817_v40  ;;  %v8997_v48 = vor.u32 %v10477_v39, %v8996_v60  ;;  %v10433_v51 = vld [vmem:[#allocation11 + $0x234] sm:$0xf0]  ;;  %v10391_v39 = vld [vmem:[#allocation11 + $0xec] sm:$0xf] }
 0x257   :  { %4822 = vmatpush.bf16.msra.mxu3 %v8945_v62  ;;  %v8741_v62 = vor.u32 %v10413_v61, %v8740_v43  ;;  %v8821_v37 = vor.u32 %v10433_v51, %v8820_v50  ;;  %v10397_v43 = vld [vmem:[#allocation11 + $0x114] sm:$0xf0]  ;;  %v8949_v61 = vor.u32 %v10465_v53, %v8948_v52  ;;  %v8614_v50 = vld [vmem:[#allocation11 + $0x98] sm:$0xf0]  ;;  %v10411_v51 = vld [vmem:[#allocation11 + $0x18c] sm:$0xf] }
 0x258   :  { %4784 = vmatpush.bf16.msra.mxu0 %v8545_v63  ;;  %v3772_v59 = vpop.f32.mrf.mxu0  ;;  %v10441_v63 = vld [vmem:[#allocation11 + $0x274] sm:$0xf0]  ;;  %v8742_v53 = vld [vmem:[#allocation11 + $0x198] sm:$0xf0] }
 0x259   :  { %4797 = vmatpush.bf16.msra.mxu1 %v8673_v25  ;;  %v3773_v40 = vadd.f32 %v3772_v59, %v11281_v34  ;;  %v3785_v13 = vpop.f32.mrf.mxu1  ;;  %v8725_v34 = vor.u32 %v10409_v4, %v8724_v0  ;;  %v8853_v25 = vor.u32 %v10441_v63, %v8852_v5  ;;  %v10461_v59 = vld [vmem:[#allocation11 + $0x314] sm:$0xf0]  ;;  %v8677_v0 = vor.u32 %v10397_v43, %v8676_v23  ;;  %v9046_v4 = vld [vmem:[#allocation11 + $0x3f8] sm:$0xf0] }
 0x25a   :  { %4810 = vmatpush.bf16.msra.mxu2 %v8801_v19  ;;  %v8580_v19 = vld [vmem:[#allocation11 + $0x48] sm:$0xf]  ;;  %v8933_v5 = vor.u32 %v10461_v59, %v8932_v27  ;;  %v10375_v27 = vld [vmem:[#allocation11 + $0x6c] sm:$0xf]  ;;  %v8598_v59 = vld [vmem:[#allocation11 + $0x78] sm:$0xf0] }
 0x25b   :  { %4823 = vmatpush.bf16.msra.mxu3 %v8929_v9  ;;  %4785 = vmatmul.bf16.vlgmr.msra.gmra.mxu0 %v11357_v26  ;;  %v3786_v3 = vadd.f32 %v3785_v13, %v3773_v40  ;;  %v8981_v9 = vor.u32 %v10473_v7, %v8980_v6  ;;  %v8581_v20 = vor.u32 %v10373_v8, %v8580_v19  ;;  %v8662_v40 = vld [vmem:[#allocation11 + $0xf8] sm:$0xf0] }
 0x25c   :  { %4829 = vmatpush.bf16.msrb.mxu0 %v8661_v58  ;;  %4798 = vmatmul.bf16.vlgmr.msra.gmra.mxu1 %v11359_v32  ;;  %v8665_v63 = vor.u32 %v10391_v39, %v8662_v40  ;;  %v8921_v7 = vor.u32 %v10455_v45, %v8918_v47  ;;  %v8774_v8 = vld [vmem:[#allocation11 + $0x1d8] sm:$0xf0] }
 0x25d   :  { %4842 = vmatpush.bf16.msrb.mxu1 %v8789_v22  ;;  %4811 = vmatmul.bf16.vlgmr.msra.gmra.mxu2 %v11361_v44  ;;  %v10405_v22 = vld [vmem:[#allocation11 + $0x154] sm:$0xf0]  ;;  %v8982_v45 = vld [vmem:[#allocation11 + $0x378] sm:$0xf0] }
 0x25e   :  { %4855 = vmatpush.bf16.msrb.mxu2 %v8917_v10  ;;  %v8836_v10 = vld [vmem:[#allocation11 + $0x248] sm:$0xf]  ;;  %4824 = vmatmul.bf16.vlgmr.msra.gmra.mxu3 %v11370_v1 }
 0x25f   :  { %4868 = vmatpush.bf16.msrb.mxu3 %v9045_v16  ;;  %v8964_v16 = vld [vmem:[#allocation11 + $0x348] sm:$0xf] }
 0x260   :  { %4830 = vmatpush.bf16.msrb.mxu0 %v8645_v29  ;;  %v3798_v58 = vpop.f32.mrf.mxu2  ;;  %v3774_v30 = vpop.f32.mrf.mxu0  ;;  %v8709_v29 = vor.u32 %v10405_v22, %v8708_v14  ;;  %v8965_v49 = vor.u32 %v10469_v17, %v8964_v16  ;;  %v10451_v14 = vld [vmem:[#allocation11 + $0x2cc] sm:$0xf]  ;;  %v9030_v22 = vld [vmem:[#allocation11 + $0x3d8] sm:$0xf0] }
 0x261   :  { %4843 = vmatpush.bf16.msrb.mxu1 %v8773_v31  ;;  %v3799_v12 = vadd.f32 %v3798_v58, %v3786_v3  ;;  %v3811_v15 = vpop.f32.mrf.mxu3  ;;  %v3787_v21 = vpop.f32.mrf.mxu1  ;;  %v8837_v31 = vor.u32 %v10437_v11, %v8836_v10  ;;  %v10487_v3 = vld [vmem:[#allocation11 + $0x3ec] sm:$0xf]  ;;  %v8630_v16 = vld [vmem:[#allocation11 + $0xb8] sm:$0xf0] }
 0x262   :  { %4856 = vmatpush.bf16.msrb.mxu2 %v8901_v24  ;;  %v8564_v24 = vld [vmem:[#allocation11 + $0x28] sm:$0xf]  ;;  %v9049_v19 = vor.u32 %v10487_v3, %v9046_v4  ;;  %v10483_v58 = vld [vmem:[#allocation11 + $0x3cc] sm:$0xf]  ;;  %v8582_v3 = vld [vmem:[#allocation11 + $0x58] sm:$0xf0] }
 0x263   :  { %4869 = vmatpush.bf16.msrb.mxu3 %v9029_v33  ;;  %v11378_v18 = vadd.f32 %v3811_v15, %v3799_v12  ;;  %v10401_v33 = vld [vmem:[#allocation11 + $0x134] sm:$0xf0]  ;;  %v8565_v36 = vor.u32 %v10369_v35, %v8564_v24  ;;  %v10383_v15 = vld [vmem:[#allocation11 + $0xac] sm:$0xf]  ;;  %v9033_v30 = vor.u32 %v10483_v58, %v9030_v22  ;;  %v9014_v24 = vld [vmem:[#allocation11 + $0x3b8] sm:$0xf0] }
 0x264   :  { %4831 = vmatpush.bf16.msrb.mxu0 %v8629_v54  ;;  %v8548_v54 = vld [vmem:[#allocation11 + $0x8] sm:$0xf]  ;;  %v10415_v17 = vld [vmem:[#allocation11 + $0x1ac] sm:$0xf]  ;;  %v8633_v35 = vor.u32 %v10383_v15, %v8630_v16  ;;  %v8566_v15 = vld [vmem:[#allocation11 + $0x38] sm:$0xf0] }
 0x265   :  { %4844 = vmatpush.bf16.msrb.mxu1 %v8757_v55  ;;  %v10365_v55 = vld [vmem:[#allocation11 + $0x14] sm:$0xf0]  ;;  %v10447_v21 = vld [vmem:[#allocation11 + $0x2ac] sm:$0xf] }
 0x266   :  { %4857 = vmatpush.bf16.msrb.mxu2 %v8885_v57  ;;  %v8693_v57 = vor.u32 %v10401_v33, %v8692_v56  ;;  %v10379_v33 = vld [vmem:[#allocation11 + $0x8c] sm:$0xf] }
 0x267   :  { %4870 = vmatpush.bf16.msrb.mxu3 %v9013_v42  ;;  %v8804_v42 = vld [vmem:[#allocation11 + $0x208] sm:$0xf]  ;;  %v8617_v43 = vor.u32 %v10379_v33, %v8614_v50  ;;  %v10403_v4 = vld [vmem:[#allocation11 + $0x14c] sm:$0xf]  ;;  %v8678_v50 = vld [vmem:[#allocation11 + $0x118] sm:$0xf0] }
 0x268   :  { %4832 = vmatpush.bf16.msrb.mxu0 %v8613_v38  ;;  %v3800_v60 = vpop.f32.mrf.mxu2  ;;  %v10423_v38 = vld [vmem:[#allocation11 + $0x1ec] sm:$0xf] }
 0x269   :  { %4845 = vmatpush.bf16.msrb.mxu1 %v8741_v62  ;;  %v3813_v13 = vpop.f32.mrf.mxu3  ;;  %v8549_v62 = vor.u32 %v10365_v55, %v8548_v54  ;;  %v8870_v54 = vld [vmem:[#allocation11 + $0x298] sm:$0xf0]  ;;  %v10407_v60 = vld [vmem:[#allocation11 + $0x16c] sm:$0xf] }
 0x26a   :  { %4858 = vmatpush.bf16.msrb.mxu2 %v8869_v46  ;;  %v8790_v46 = vld [vmem:[#allocation11 + $0x1f8] sm:$0xf0]  ;;  %v10439_v13 = vld [vmem:[#allocation11 + $0x26c] sm:$0xf] }
 0x26b   :  { %4871 = vmatpush.bf16.msrb.mxu3 %v8997_v48  ;;  %v8805_v48 = vor.u32 %v10429_v28, %v8804_v42  ;;  %v8793_v6 = vor.u32 %v10423_v38, %v8790_v46  ;;  %v8726_v38 = vld [vmem:[#allocation11 + $0x178] sm:$0xf0]  ;;  %v10471_v46 = vld [vmem:[#allocation11 + $0x36c] sm:$0xf] }
 0x26c   :  { %4833 = vmatpush.bf16.msrb.mxu0 %v8597_v2  ;;  %v10387_v2 = vld [vmem:[#allocation11 + $0xcc] sm:$0xf]  ;;  %v8729_v47 = vor.u32 %v10407_v60, %v8726_v38  ;;  %v10516_v38 = vld [vmem:[#allocation14 + $0xcc] sm:$0xf0] }
 0x26d   :  { %4846 = vmatpush.bf16.msrb.mxu1 %v8725_v34  ;;  %v8646_v34 = vld [vmem:[#allocation11 + $0xd8] sm:$0xf0]  ;;  %v10399_v16 = vld [vmem:[#allocation11 + $0x12c] sm:$0xf] }
 0x26e   :  { %4859 = vmatpush.bf16.msrb.mxu2 %v8853_v25  ;;  %v10419_v25 = vld [vmem:[#allocation11 + $0x1cc] sm:$0xf]  ;;  %v8649_v10 = vor.u32 %v10387_v2, %v8646_v34  ;;  %v8838_v2 = vld [vmem:[#allocation11 + $0x258] sm:$0xf0] }
 0x26f   :  { %4872 = vmatpush.bf16.msrb.mxu3 %v8981_v9  ;;  %v8902_v9 = vld [vmem:[#allocation11 + $0x2d8] sm:$0xf0]  ;;  %v8777_v11 = vor.u32 %v10419_v25, %v8774_v8  ;;  %v10395_v33 = vld [vmem:[#allocation11 + $0x10c] sm:$0xf] }
 0x270   :  { %4834 = vmatpush.bf16.msrb.mxu0 %v8581_v20  ;;  %v8905_v12 = vor.u32 %v10451_v14, %v8902_v9  ;;  %v8758_v20 = vld [vmem:[#allocation11 + $0x1b8] sm:$0xf0] }
 0x271   :  { %4847 = vmatpush.bf16.msrb.mxu1 %v8709_v29  ;;  %v8886_v29 = vld [vmem:[#allocation11 + $0x2b8] sm:$0xf0]  ;;  %v8761_v56 = vor.u32 %v10415_v17, %v8758_v20 }
 0x272   :  { %4860 = vmatpush.bf16.msrb.mxu2 %v8837_v31  ;;  %v10479_v31 = vld [vmem:[#allocation11 + $0x3ac] sm:$0xf]  ;;  %v8966_v8 = vld [vmem:[#allocation11 + $0x358] sm:$0xf0] }
 0x273   :  { %4873 = vmatpush.bf16.msrb.mxu3 %v8965_v49  ;;  %v8889_v49 = vor.u32 %v10447_v21, %v8886_v29  ;;  %v9017_v52 = vor.u32 %v10479_v31, %v9014_v24  ;;  %v8822_v20 = vld [vmem:[#allocation11 + $0x238] sm:$0xf0]  ;;  %v10463_v21 = vld [vmem:[#allocation11 + $0x32c] sm:$0xf] }
 0x274   :  { %4835 = vmatpush.bf16.msrb.mxu0 %v8565_v36  ;;  %v10443_v36 = vld [vmem:[#allocation11 + $0x28c] sm:$0xf]  ;;  %v8950_v29 = vld [vmem:[#allocation11 + $0x338] sm:$0xf0] }
 0x275   :  { %4848 = vmatpush.bf16.msrb.mxu1 %v8693_v57  ;;  %v10475_v57 = vld [vmem:[#allocation11 + $0x38c] sm:$0xf]  ;;  %v8873_v28 = vor.u32 %v10443_v36, %v8870_v54 }
 0x276   :  { %4861 = vmatpush.bf16.msrb.mxu2 %v8821_v37  ;;  %v8998_v37 = vld [vmem:[#allocation11 + $0x398] sm:$0xf0]  ;;  %v10363_v24 = vld [vmem:[#allocation11 + $0xc] sm:$0xf] }
 0x277   :  { %4874 = vmatpush.bf16.msrb.mxu3 %v8949_v61  ;;  %v8745_v61 = vor.u32 %v10411_v51, %v8742_v53  ;;  %v9001_v39 = vor.u32 %v10475_v57, %v8998_v37  ;;  %v8953_v51 = vor.u32 %v10463_v21, %v8950_v29  ;;  %v8806_v53 = vld [vmem:[#allocation11 + $0x218] sm:$0xf0]  ;;  %v10459_v36 = vld [vmem:[#allocation11 + $0x30c] sm:$0xf]  ;;  %v9164_v37 = vld [vmem:[#allocation14 + $0xe0] sm:$0xf] }
 0x278   :  { %4836 = vmatpush.bf16.msrb.mxu0 %v8549_v62  ;;  %v3824_v55 = vpop.f32.mrf.mxu0  ;;  %v8854_v62 = vld [vmem:[#allocation11 + $0x278] sm:$0xf0]  ;;  %v10496_v21 = vld [vmem:[#allocation14 + $0x2c] sm:$0xf0] }
 0x279   :  { %4849 = vmatpush.bf16.msrb.mxu1 %v8677_v0  ;;  %v3825_v23 = vadd.f32 %v3824_v55, %v11378_v18  ;;  %v3837_v42 = vpop.f32.mrf.mxu1  ;;  %v8601_v18 = vor.u32 %v10375_v27, %v8598_v59  ;;  %v8857_v0 = vor.u32 %v10439_v13, %v8854_v62  ;;  %v8934_v55 = vld [vmem:[#allocation11 + $0x318] sm:$0xf0] }
 0x27a   :  { %4862 = vmatpush.bf16.msrb.mxu2 %v8805_v48  ;;  %v10371_v48 = vld [vmem:[#allocation11 + $0x4c] sm:$0xf]  ;;  %v8937_v59 = vor.u32 %v10459_v36, %v8934_v55 }
 0x27b   :  { %4875 = vmatpush.bf16.msrb.mxu3 %v8933_v5  ;;  %4837 = vmatmul.bf16.vlgmr.msrb.gmra.mxu0 %v11357_v26  ;;  %v11385_v40 = vadd.f32 %v3837_v42, %v3825_v23  ;;  %v8985_v5 = vor.u32 %v10471_v46, %v8982_v45  ;;  %v8585_v9 = vor.u32 %v10371_v48, %v8582_v3  ;;  %v10520_v23 = vld [vmem:[#allocation14 + $0xec] sm:$0xf0]  ;;  %v9292_v42 = vld [vmem:[#allocation14 + $0x1e0] sm:$0xf] }
 0x27c   :  { %4881 = vmatpush.bf16.msra.mxu0 %v8665_v63  ;;  %4850 = vmatmul.bf16.vlgmr.msrb.gmra.mxu1 %v11359_v32  ;;  %v9165_v60 = vor.u32 %v10520_v23, %v9164_v37  ;;  %v9132_v46 = vld [vmem:[#allocation14 + $0xa0] sm:$0xf]  ;;  %v10512_v45 = vld [vmem:[#allocation14 + $0xac] sm:$0xf0] }
 0x27d   :  { %4894 = vmatpush.bf16.msra.mxu1 %v8793_v6  ;;  %4863 = vmatmul.bf16.vlgmr.msrb.gmra.mxu2 %v11361_v44  ;;  %v8710_v6 = vld [vmem:[#allocation11 + $0x158] sm:$0xf0]  ;;  %v9276_v3 = vld [vmem:[#allocation14 + $0x1c0] sm:$0xf]  ;;  %v10580_v37 = vld [vmem:[#allocation14 + $0x2cc] sm:$0xf0] }
 0x27e   :  { %4907 = vmatpush.bf16.msra.mxu2 %v8921_v7  ;;  %4876 = vmatmul.bf16.vlgmr.msrb.gmra.mxu3 %v11370_v1  ;;  %v10435_v7 = vld [vmem:[#allocation11 + $0x24c] sm:$0xf] }
 0x27f   :  { %4920 = vmatpush.bf16.msra.mxu3 %v9049_v19  ;;  %v10467_v19 = vld [vmem:[#allocation11 + $0x34c] sm:$0xf] }
 0x280   :  { %4882 = vmatpush.bf16.msra.mxu0 %v8649_v10  ;;  %v3850_v63 = vpop.f32.mrf.mxu2  ;;  %v3826_v14 = vpop.f32.mrf.mxu0  ;;  %v8713_v10 = vor.u32 %v10403_v4, %v8710_v6  ;;  %v8969_v17 = vor.u32 %v10467_v19, %v8966_v8  ;;  %v10548_v6 = vld [vmem:[#allocation14 + $0x1cc] sm:$0xf0]  ;;  %v9084_v19 = vld [vmem:[#allocation14 + $0x40] sm:$0xf] }
 0x281   :  { %4895 = vmatpush.bf16.msra.mxu1 %v8777_v11  ;;  %v3851_v34 = vadd.f32 %v3850_v63, %v11287_v41  ;;  %v3863_v25 = vpop.f32.mrf.mxu3  ;;  %v3839_v58 = vpop.f32.mrf.mxu1  ;;  %v8841_v11 = vor.u32 %v10435_v7, %v8838_v2  ;;  %v10431_v41 = vld [vmem:[#allocation11 + $0x22c] sm:$0xf]  ;;  %v9100_v63 = vld [vmem:[#allocation14 + $0x60] sm:$0xf]  ;;  %v10504_v7 = vld [vmem:[#allocation14 + $0x6c] sm:$0xf0]  ;;  %v9277_v2 = vor.u32 %v10548_v6, %v9276_v3 }
 0x282   :  { %4908 = vmatpush.bf16.msra.mxu2 %v8905_v12  ;;  %v10367_v12 = vld [vmem:[#allocation11 + $0x2c] sm:$0xf]  ;;  %v10500_v8 = vld [vmem:[#allocation14 + $0x4c] sm:$0xf0]  ;;  %v10510_v3 = vld [vmem:[#allocation14 + $0xa4] sm:$0xf] }
 0x283   :  { %4921 = vmatpush.bf16.msra.mxu3 %v9033_v30  ;;  %v11388_v22 = vadd.f32 %v3863_v25, %v3851_v34  ;;  %v8694_v30 = vld [vmem:[#allocation11 + $0x138] sm:$0xf0]  ;;  %v8569_v31 = vor.u32 %v10367_v12, %v8566_v15  ;;  %v10544_v34 = vld [vmem:[#allocation14 + $0x1ac] sm:$0xf0]  ;;  %v9101_v25 = vor.u32 %v10504_v7, %v9100_v63  ;;  %v9085_v15 = vor.u32 %v10500_v8, %v9084_v19  ;;  %v10506_v7 = vld [vmem:[#allocation14 + $0x84] sm:$0xf] }
 0x284   :  { %4883 = vmatpush.bf16.msra.mxu0 %v8633_v35  ;;  %v8697_v35 = vor.u32 %v10399_v16, %v8694_v30  ;;  %v10536_v30 = vld [vmem:[#allocation14 + $0x16c] sm:$0xf0] }
 0x285   :  { %4896 = vmatpush.bf16.msra.mxu1 %v8761_v56  ;;  %v8825_v56 = vor.u32 %v10431_v41, %v8822_v20  ;;  %v9068_v20 = vld [vmem:[#allocation14 + $0x20] sm:$0xf]  ;;  %v10568_v19 = vld [vmem:[#allocation14 + $0x26c] sm:$0xf0] }
 0x286   :  { %4909 = vmatpush.bf16.msra.mxu2 %v8889_v49  ;;  %v8550_v49 = vld [vmem:[#allocation11 + $0x18] sm:$0xf0] }
 0x287   :  { %4922 = vmatpush.bf16.msra.mxu3 %v9017_v52  ;;  %v10427_v52 = vld [vmem:[#allocation11 + $0x20c] sm:$0xf] }
 0x288   :  { %4884 = vmatpush.bf16.msra.mxu0 %v8617_v43  ;;  %v3852_v54 = vpop.f32.mrf.mxu2  ;;  %v8553_v43 = vor.u32 %v10363_v24, %v8550_v49  ;;  %v8809_v27 = vor.u32 %v10427_v52, %v8806_v53  ;;  %v9052_v24 = vld [vmem:[#allocation14] sm:$0xf]  ;;  %v10584_v49 = vld [vmem:[#allocation14 + $0x2ec] sm:$0xf0]  ;;  %v10518_v52 = vld [vmem:[#allocation14 + $0xe4] sm:$0xf] }
 0x289   :  { %4897 = vmatpush.bf16.msra.mxu1 %v8745_v61  ;;  %v3865_v57 = vpop.f32.mrf.mxu3  ;;  %v10552_v61 = vld [vmem:[#allocation14 + $0x1ec] sm:$0xf0]  ;;  %v9166_v53 = vld [vmem:[#allocation14 + $0xf0] sm:$0xf0]  ;;  %v9404_v54 = vld [vmem:[#allocation14 + $0x2c0] sm:$0xf] }
 0x28a   :  { %4910 = vmatpush.bf16.msra.mxu2 %v8873_v28  ;;  %v8681_v28 = vor.u32 %v10395_v33, %v8678_v50  ;;  %v9293_v13 = vor.u32 %v10552_v61, %v9292_v42  ;;  %v9212_v33 = vld [vmem:[#allocation14 + $0x140] sm:$0xf]  ;;  %v10532_v50 = vld [vmem:[#allocation14 + $0x14c] sm:$0xf0] }
 0x28b   :  { %4923 = vmatpush.bf16.msra.mxu3 %v9001_v39  ;;  %v9148_v39 = vld [vmem:[#allocation14 + $0xc0] sm:$0xf]  ;;  %v9213_v57 = vor.u32 %v10532_v50, %v9212_v33  ;;  %v10528_v61 = vld [vmem:[#allocation14 + $0x12c] sm:$0xf0] }
 0x28c   :  { %4885 = vmatpush.bf16.msra.mxu0 %v8601_v18  ;;  %v9149_v62 = vor.u32 %v10516_v38, %v9148_v39  ;;  %v9133_v18 = vor.u32 %v10512_v45, %v9132_v46  ;;  %v9196_v42 = vld [vmem:[#allocation14 + $0x120] sm:$0xf]  ;;  %v9150_v39 = vld [vmem:[#allocation14 + $0xd0] sm:$0xf0]  ;;  %v10524_v46 = vld [vmem:[#allocation14 + $0x10c] sm:$0xf0] }
 0x28d   :  { %4898 = vmatpush.bf16.msra.mxu1 %v8729_v47  ;;  %v9116_v47 = vld [vmem:[#allocation14 + $0x80] sm:$0xf]  ;;  %v9197_v38 = vor.u32 %v10528_v61, %v9196_v42  ;;  %v10550_v45 = vld [vmem:[#allocation14 + $0x1e4] sm:$0xf]  ;;  %v10560_v33 = vld [vmem:[#allocation14 + $0x22c] sm:$0xf0] }
 0x28e   :  { %4911 = vmatpush.bf16.msra.mxu2 %v8857_v0  ;;  %v10508_v0 = vld [vmem:[#allocation14 + $0x8c] sm:$0xf0]  ;;  %v9054_v61 = vld [vmem:[#allocation14 + $0x10] sm:$0xf0] }
 0x28f   :  { %4924 = vmatpush.bf16.msra.mxu3 %v8985_v5  ;;  %v10556_v42 = vld [vmem:[#allocation14 + $0x20c] sm:$0xf0] }
 0x290   :  { %4886 = vmatpush.bf16.msra.mxu0 %v8585_v9  ;;  %v9244_v9 = vld [vmem:[#allocation14 + $0x180] sm:$0xf] }
 0x291   :  { %4899 = vmatpush.bf16.msra.mxu1 %v8713_v10 }
 0x292   :  { %4912 = vmatpush.bf16.msra.mxu2 %v8841_v11  ;;  %v10540_v11 = vld [vmem:[#allocation14 + $0x18c] sm:$0xf0] }
 0x293   :  { %4925 = vmatpush.bf16.msra.mxu3 %v8969_v17  ;;  %v9245_v16 = vor.u32 %v10540_v11, %v9244_v9  ;;  %v9228_v17 = vld [vmem:[#allocation14 + $0x160] sm:$0xf]  ;;  %v9102_v9 = vld [vmem:[#allocation14 + $0x70] sm:$0xf0] }
 0x294   :  { %4887 = vmatpush.bf16.msra.mxu0 %v8569_v31  ;;  %v9229_v29 = vor.u32 %v10536_v30, %v9228_v17  ;;  %v9069_v31 = vor.u32 %v10496_v21, %v9068_v20  ;;  %v10498_v17 = vld [vmem:[#allocation14 + $0x44] sm:$0xf]  ;;  %v9086_v30 = vld [vmem:[#allocation14 + $0x50] sm:$0xf0] }
 0x295   :  { %4900 = vmatpush.bf16.msra.mxu1 %v8697_v35  ;;  %v10492_v35 = vld [vmem:[#allocation14 + $0xc] sm:$0xf0] }
 0x296   :  { %4913 = vmatpush.bf16.msra.mxu2 %v8825_v56  ;;  %v9420_v56 = vld [vmem:[#allocation14 + $0x2e0] sm:$0xf]  ;;  %v9053_v23 = vor.u32 %v10492_v35, %v9052_v24  ;;  %v9089_v35 = vor.u32 %v10498_v17, %v9086_v30  ;;  %v10570_v17 = vld [vmem:[#allocation14 + $0x284] sm:$0xf]  ;;  %v9374_v30 = vld [vmem:[#allocation14 + $0x290] sm:$0xf0] }
 0x297   :  { %4926 = vmatpush.bf16.msra.mxu3 %v8953_v51  ;;  %v9421_v36 = vor.u32 %v10584_v49, %v9420_v56  ;;  %v9246_v56 = vld [vmem:[#allocation14 + $0x190] sm:$0xf0]  ;;  %v9324_v49 = vld [vmem:[#allocation14 + $0x220] sm:$0xf] }
 0x298   :  { %4888 = vmatpush.bf16.msra.mxu0 %v8553_v43  ;;  %v3876_v48 = vpop.f32.mrf.mxu0  ;;  %v9405_v43 = vor.u32 %v10580_v37, %v9404_v54  ;;  %v10534_v54 = vld [vmem:[#allocation14 + $0x164] sm:$0xf] }
 0x299   :  { %4901 = vmatpush.bf16.msra.mxu1 %v8681_v28  ;;  %v3877_v4 = vadd.f32 %v3876_v48, %v11388_v22  ;;  %v3889_v5 = vpop.f32.mrf.mxu1  ;;  %v9169_v28 = vor.u32 %v10518_v52, %v9166_v53  ;;  %v10572_v48 = vld [vmem:[#allocation14 + $0x28c] sm:$0xf0]  ;;  %v9070_v52 = vld [vmem:[#allocation14 + $0x30] sm:$0xf0] }
 0x29a   :  { %4914 = vmatpush.bf16.msra.mxu2 %v8809_v27  ;;  %v9388_v27 = vld [vmem:[#allocation14 + $0x2a0] sm:$0xf] }
 0x29b   :  { %4927 = vmatpush.bf16.msra.mxu3 %v8937_v59  ;;  %4889 = vmatmul.bf16.vlgmr.msra.gmra.mxu0 %v11357_v26  ;;  %v9117_v26 = vor.u32 %v10508_v0, %v9116_v47  ;;  %v10576_v59 = vld [vmem:[#allocation14 + $0x2ac] sm:$0xf0]  ;;  %v9294_v47 = vld [vmem:[#allocation14 + $0x1f0] sm:$0xf0]  ;;  %v9372_v0 = vld [vmem:[#allocation14 + $0x280] sm:$0xf] }
 0x29c   :  { %5719 = vmatpush.bf16.msrb.mxu0 %v9165_v60  ;;  %4902 = vmatmul.bf16.vlgmr.msra.gmra.mxu1 %v11359_v32  ;;  %v9260_v32 = vld [vmem:[#allocation14 + $0x1a0] sm:$0xf]  ;;  %v10514_v60 = vld [vmem:[#allocation14 + $0xc4] sm:$0xf]  ;;  %v9373_v63 = vor.u32 %v10572_v48, %v9372_v0 }
 0x29d   :  { %5732 = vmatpush.bf16.msrb.mxu1 %v9293_v13  ;;  %4915 = vmatmul.bf16.vlgmr.msra.gmra.mxu2 %v11361_v44  ;;  %v3890_v44 = vadd.f32 %v3889_v5, %v3877_v4  ;;  %v9389_v13 = vor.u32 %v10576_v59, %v9388_v27  ;;  %v9134_v4 = vld [vmem:[#allocation14 + $0xb0] sm:$0xf0]  ;;  %v9548_v27 = vld [vmem:[#allocation14 + $0x3e0] sm:$0xf]  ;;  %v10616_v59 = vld [vmem:[#allocation14 + $0x3ec] sm:$0xf0] }
 0x29e   :  { %4928 = vmatmul.bf16.vlgmr.msra.gmra.mxu3 %v11370_v1  ;;  %v9261_v1 = vor.u32 %v10544_v34, %v9260_v32  ;;  %5745 = vmatpush.bf16.msrb.mxu2 %v9421_v36  ;;  %v9137_v6 = vor.u32 %v10510_v3, %v9134_v4  ;;  %v10546_v32 = vld [vmem:[#allocation14 + $0x1c4] sm:$0xf]  ;;  %v9325_v36 = vor.u32 %v10560_v33, %v9324_v49  ;;  %v9532_v48 = vld [vmem:[#allocation14 + $0x3c0] sm:$0xf]  ;;  %v10612_v3 = vld [vmem:[#allocation14 + $0x3cc] sm:$0xf0] }
 0x29f   :  { %v10578_v4 = vld [vmem:[#allocation14 + $0x2c4] sm:$0xf]  ;;  %v9358_v33 = vld [vmem:[#allocation14 + $0x270] sm:$0xf0] }
 0x2a0   :  { %5720 = vmatpush.bf16.msrb.mxu0 %v9149_v62  ;;  %v3902_v14 = vpop.f32.mrf.mxu2  ;;  %v3878_v10 = vpop.f32.mrf.mxu0  ;;  %v9180_v62 = vld [vmem:[#allocation14 + $0x100] sm:$0xf] }
 0x2a1   :  { %5733 = vmatpush.bf16.msrb.mxu1 %v9277_v2  ;;  %v3903_v58 = vadd.f32 %v3902_v14, %v3890_v44  ;;  %v3915_v22 = vpop.f32.mrf.mxu3  ;;  %v3891_v12 = vpop.f32.mrf.mxu1  ;;  %v9181_v5 = vor.u32 %v10524_v46, %v9180_v62  ;;  %v9118_v2 = vld [vmem:[#allocation14 + $0x90] sm:$0xf0]  ;;  %v10502_v14 = vld [vmem:[#allocation14 + $0x64] sm:$0xf] }
 0x2a2   :  { %5746 = vmatpush.bf16.msrb.mxu2 %v9405_v43  ;;  %v9121_v44 = vor.u32 %v10506_v7, %v9118_v2  ;;  %v10542_v10 = vld [vmem:[#allocation14 + $0x1a4] sm:$0xf]  ;;  %v9105_v11 = vor.u32 %v10502_v14, %v9102_v9  ;;  %v9262_v12 = vld [vmem:[#allocation14 + $0x1b0] sm:$0xf0]  ;;  %v9308_v43 = vld [vmem:[#allocation14 + $0x200] sm:$0xf] }
 0x2a3   :  { %v11395_v41 = vadd.f32 %v3915_v22, %v3903_v58  ;;  %v9265_v20 = vor.u32 %v10542_v10, %v9262_v12  ;;  %v9198_v7 = vld [vmem:[#allocation14 + $0x130] sm:$0xf0]  ;;  %v10522_v9 = vld [vmem:[#allocation14 + $0x104] sm:$0xf]  ;;  %v9500_v12 = vld [vmem:[#allocation14 + $0x380] sm:$0xf] }
 0x2a4   :  { %5721 = vmatpush.bf16.msrb.mxu0 %v9133_v18  ;;  %v9153_v18 = vor.u32 %v10514_v60, %v9150_v39  ;;  %v9549_v60 = vor.u32 %v10616_v59, %v9548_v27  ;;  %v10582_v39 = vld [vmem:[#allocation14 + $0x2e4] sm:$0xf]  ;;  %v9390_v14 = vld [vmem:[#allocation14 + $0x2b0] sm:$0xf0]  ;;  %v10517_v27 = vld [vmem:[#allocation14 + $0xd4] sm:$0xf0] }
 0x2a5   :  { %5734 = vmatpush.bf16.msrb.mxu1 %v9261_v1  ;;  %v9278_v1 = vld [vmem:[#allocation14 + $0x1d0] sm:$0xf0] }
 0x2a6   :  { %5747 = vmatpush.bf16.msrb.mxu2 %v9389_v13  ;;  %v9281_v58 = vor.u32 %v10546_v32, %v9278_v1  ;;  %v10530_v13 = vld [vmem:[#allocation14 + $0x144] sm:$0xf]  ;;  %5758 = vmatpush.bf16.msrb.mxu3 %v9549_v60  ;;  %v10608_v1 = vld [vmem:[#allocation14 + $0x3ac] sm:$0xf0]  ;;  %v9452_v60 = vld [vmem:[#allocation14 + $0x320] sm:$0xf] }
 0x2a8   :  { %5722 = vmatpush.bf16.msrb.mxu0 %v9117_v26  ;;  %v3904_v51 = vpop.f32.mrf.mxu2  ;;  %v9297_v26 = vor.u32 %v10550_v45, %v9294_v47  ;;  %v9214_v45 = vld [vmem:[#allocation14 + $0x150] sm:$0xf0] }
 0x2a9   :  { %5735 = vmatpush.bf16.msrb.mxu1 %v9245_v16  ;;  %v3917_v55 = vpop.f32.mrf.mxu3  ;;  %v10564_v16 = vld [vmem:[#allocation14 + $0x24c] sm:$0xf0]  ;;  %v10494_v51 = vld [vmem:[#allocation14 + $0x24] sm:$0xf]  ;;  %v9217_v0 = vor.u32 %v10530_v13, %v9214_v45  ;;  %v9326_v45 = vld [vmem:[#allocation14 + $0x230] sm:$0xf0] }
 0x2aa   :  { %5748 = vmatpush.bf16.msrb.mxu2 %v9373_v63  ;;  %v9230_v55 = vld [vmem:[#allocation14 + $0x170] sm:$0xf0]  ;;  %v9073_v37 = vor.u32 %v10494_v51, %v9070_v52 }
 0x2ac   :  { %5723 = vmatpush.bf16.msrb.mxu0 %v9101_v25  ;;  %v9356_v25 = vld [vmem:[#allocation14 + $0x260] sm:$0xf] }
 0x2ad   :  { %5736 = vmatpush.bf16.msrb.mxu1 %v9229_v29  ;;  %v9357_v22 = vor.u32 %v10568_v19, %v9356_v25  ;;  %v10574_v25 = vld [vmem:[#allocation14 + $0x2a4] sm:$0xf] }
 0x2af   :  { %5749 = vmatpush.bf16.msrb.mxu2 %v9357_v22  ;;  %v9393_v22 = vor.u32 %v10574_v25, %v9390_v14  ;;  %v10614_v25 = vld [vmem:[#allocation14 + $0x3e4] sm:$0xf]  ;;  %v9124_v14 = vld [vmem:[#allocation14 + $0x88] sm:$0xf] }
 0x2b0   :  { %5724 = vmatpush.bf16.msrb.mxu0 %v9085_v15  ;;  %v9340_v15 = vld [vmem:[#allocation14 + $0x240] sm:$0xf] }
 0x2b1   :  { %5737 = vmatpush.bf16.msrb.mxu1 %v9213_v57  ;;  %v9341_v21 = vor.u32 %v10564_v16, %v9340_v15  ;;  %v9233_v57 = vor.u32 %v10534_v54, %v9230_v55  ;;  %v10604_v15 = vld [vmem:[#allocation14 + $0x38c] sm:$0xf0]  ;;  %v10521_v54 = vld [vmem:[#allocation14 + $0xf4] sm:$0xf0]  ;;  %v9468_v55 = vld [vmem:[#allocation14 + $0x340] sm:$0xf] }
 0x2b2   :  { %v9501_v16 = vor.u32 %v10604_v15, %v9500_v12  ;;  %v9534_v12 = vld [vmem:[#allocation14 + $0x3d0] sm:$0xf0] }
 0x2b3   :  { %5750 = vmatpush.bf16.msrb.mxu2 %v9341_v21 }
 0x2b4   :  { %5725 = vmatpush.bf16.msrb.mxu0 %v9069_v31  ;;  %v10538_v31 = vld [vmem:[#allocation14 + $0x184] sm:$0xf] }
 0x2b5   :  { %5738 = vmatpush.bf16.msrb.mxu1 %v9197_v38  ;;  %v9249_v53 = vor.u32 %v10538_v31, %v9246_v56  ;;  %v9422_v38 = vld [vmem:[#allocation14 + $0x2f0] sm:$0xf0]  ;;  %v9484_v31 = vld [vmem:[#allocation14 + $0x360] sm:$0xf] }
 0x2b6   :  { %v9425_v46 = vor.u32 %v10582_v39, %v9422_v38  ;;  %v10592_v39 = vld [vmem:[#allocation14 + $0x32c] sm:$0xf0] }
 0x2b7   :  { %5751 = vmatpush.bf16.msrb.mxu2 %v9325_v36  ;;  %v9172_v36 = vld [vmem:[#allocation14 + $0xe8] sm:$0xf] }
 0x2b8   :  { %5726 = vmatpush.bf16.msrb.mxu0 %v9053_v23  ;;  %v11397_v34 = vpop.f32.mrf.mxu0  ;;  %v10490_v23 = vld [vmem:[#allocation14 + $0x4] sm:$0xf] }
 0x2b9   :  { %5739 = vmatpush.bf16.msrb.mxu1 %v9181_v5  ;;  %v11399_v8 = vpop.f32.mrf.mxu1  ;;  %v9057_v47 = vor.u32 %v10490_v23, %v9054_v61  ;;  %v9533_v5 = vor.u32 %v10612_v3, %v9532_v48 }
 0x2bb   :  { %5759 = vmatpush.bf16.msrb.mxu3 %v9533_v5  ;;  %v10513_v5 = vld [vmem:[#allocation14 + $0xb4] sm:$0xf0] }
 0x2bc   :  { %5771 = vmatpush.bf16.msra.mxu0 %v9169_v28  ;;  %v9309_v28 = vor.u32 %v10556_v42, %v9308_v43  ;;  %v9342_v43 = vld [vmem:[#allocation14 + $0x250] sm:$0xf0]  ;;  %v9173_v42 = vor.u32 %v10521_v54, %v9172_v36  ;;  %v9284_v36 = vld [vmem:[#allocation14 + $0x1c8] sm:$0xf] }
 0x2bd   :  { %5784 = vmatpush.bf16.msra.mxu1 %v9297_v26  ;;  %v9406_v26 = vld [vmem:[#allocation14 + $0x2d0] sm:$0xf0] }
 0x2be   :  { %5752 = vmatpush.bf16.msrb.mxu2 %v9309_v28  ;;  %v9409_v63 = vor.u32 %v10578_v4, %v9406_v26  ;;  %v9156_v28 = vld [vmem:[#allocation14 + $0xc8] sm:$0xf]  ;;  %v9436_v26 = vld [vmem:[#allocation14 + $0x300] sm:$0xf] }
 0x2bf   :  { %v9157_v48 = vor.u32 %v10517_v27, %v9156_v28  ;;  %v9140_v4 = vld [vmem:[#allocation14 + $0xa8] sm:$0xf] }
 0x2c0   :  { %5772 = vmatpush.bf16.msra.mxu0 %v9153_v18  ;;  %v11401_v29 = vpop.f32.mrf.mxu2  ;;  %v4736_v24 = vpop.f32.mrf.mxu0  ;;  %v11403_v18 = vld [vmem:[#allocation13] sm:$0xf] }
 0x2c1   :  { %5785 = vmatpush.bf16.msra.mxu1 %v9281_v58  ;;  %v4749_v50 = vpop.f32.mrf.mxu1  ;;  %v4077_v2 = vperm.slane %v11403_v18, 0  ;;  %v9182_v58 = vld [vmem:[#allocation14 + $0x110] sm:$0xf0]  ;;  %v10600_v24 = vld [vmem:[#allocation14 + $0x36c] sm:$0xf0]  ;;  %v4078_v38 = vperm.slane %v11403_v18, 1 }
 0x2c2   :  { %5797 = vmatpush.bf16.msra.mxu2 %v9425_v46  ;;  %v9185_v10 = vor.u32 %v10522_v9, %v9182_v58  ;;  %v9485_v49 = vor.u32 %v10600_v24, %v9484_v31  ;;  %v10558_v46 = vld [vmem:[#allocation14 + $0x224] sm:$0xf]  ;;  %v10509_v9 = vld [vmem:[#allocation14 + $0x94] sm:$0xf0]  ;;  %v4079_v28 = vperm.slane %v11403_v18, 2 }
 0x2c3   :  { %v9329_v3 = vor.u32 %v10558_v46, %v9326_v45  ;;  %v9125_v15 = vor.u32 %v10509_v9, %v9124_v14  ;;  %v10606_v31 = vld [vmem:[#allocation14 + $0x3a4] sm:$0xf]  ;;  %v9060_v46 = vld [vmem:[#allocation14 + $0x8] sm:$0xf]  ;;  %v10493_v45 = vld [vmem:[#allocation14 + $0x14] sm:$0xf0] }
 0x2c4   :  { %5773 = vmatpush.bf16.msra.mxu0 %v9137_v6  ;;  %v10526_v6 = vld [vmem:[#allocation14 + $0x124] sm:$0xf]  ;;  %v9158_v14 = vld [vmem:[#allocation14 + $0xd8] sm:$0xf0] }
 0x2c5   :  { %5786 = vmatpush.bf16.msra.mxu1 %v9265_v20  ;;  %v9201_v32 = vor.u32 %v10526_v6, %v9198_v7  ;;  %v9377_v20 = vor.u32 %v10570_v17, %v9374_v30  ;;  %v10554_v6 = vld [vmem:[#allocation14 + $0x204] sm:$0xf]  ;;  %v9108_v30 = vld [vmem:[#allocation14 + $0x68] sm:$0xf] }
 0x2c6   :  { %5798 = vmatpush.bf16.msra.mxu2 %v9409_v63  ;;  %v10588_v63 = vld [vmem:[#allocation14 + $0x30c] sm:$0xf0] }
 0x2c8   :  { %5774 = vmatpush.bf16.msra.mxu0 %v9121_v44  ;;  %v4762_v62 = vpop.f32.mrf.mxu2  ;;  %v9516_v44 = vld [vmem:[#allocation14 + $0x3a0] sm:$0xf] }
 0x2c9   :  { %5787 = vmatpush.bf16.msra.mxu1 %v9249_v53  ;;  %v9517_v19 = vor.u32 %v10608_v1, %v9516_v44  ;;  %v9453_v62 = vor.u32 %v10592_v39, %v9452_v60  ;;  %v9141_v44 = vor.u32 %v10513_v5, %v9140_v4  ;;  %v10545_v60 = vld [vmem:[#allocation14 + $0x1b4] sm:$0xf0]  ;;  %v10598_v39 = vld [vmem:[#allocation14 + $0x364] sm:$0xf]  ;;  %v10519_v4 = vld [vmem:[#allocation14 + $0xec] sm:$0xf] }
 0x2ca   :  { %5799 = vmatpush.bf16.msra.mxu2 %v9393_v22  ;;  %v9174_v5 = vld [vmem:[#allocation14 + $0xf8] sm:$0xf0] }
 0x2cb   :  { %5760 = vmatpush.bf16.msrb.mxu3 %v9517_v19  ;;  %v9550_v19 = vld [vmem:[#allocation14 + $0x3f0] sm:$0xf0] }
 0x2cc   :  { %5775 = vmatpush.bf16.msra.mxu0 %v9105_v11  ;;  %v4735_v11 = vadd.f32 %v11397_v34, %v4077_v2  ;;  %v10566_v34 = vld [vmem:[#allocation14 + $0x264] sm:$0xf]  ;;  %v9437_v2 = vor.u32 %v10588_v63, %v9436_v26  ;;  %v9553_v58 = vor.u32 %v10614_v25, %v9550_v19  ;;  %v10541_v63 = vld [vmem:[#allocation14 + $0x194] sm:$0xf0]  ;;  %v9236_v25 = vld [vmem:[#allocation14 + $0x168] sm:$0xf] }
 0x2cd   :  { %5788 = vmatpush.bf16.msra.mxu1 %v9233_v57  ;;  %v9361_v52 = vor.u32 %v10566_v34, %v9358_v33  ;;  %v10562_v57 = vld [vmem:[#allocation14 + $0x244] sm:$0xf]  ;;  %v10515_v19 = vld [vmem:[#allocation14 + $0xcc] sm:$0xf] }
 0x2ce   :  { %v4748_v21 = vadd.f32 %v11399_v8, %v4735_v11  ;;  %5800 = vmatpush.bf16.msra.mxu2 %v9377_v20  ;;  %v10596_v8 = vld [vmem:[#allocation14 + $0x34c] sm:$0xf0]  ;;  %v10505_v20 = vld [vmem:[#allocation14 + $0x74] sm:$0xf0] }
 0x2cf   :  { %5761 = vmatpush.bf16.msrb.mxu3 %v9501_v16  ;;  %v4773_v51 = vpop.f32.mrf.mxu3  ;;  %v9469_v23 = vor.u32 %v10596_v8, %v9468_v55  ;;  %v9109_v34 = vor.u32 %v10505_v20, %v9108_v30  ;;  %v10549_v55 = vld [vmem:[#allocation14 + $0x1d4] sm:$0xf0]  ;;  %v10602_v8 = vld [vmem:[#allocation14 + $0x384] sm:$0xf]  ;;  %v9161_v30 = vor.u32 %v10515_v19, %v9158_v14  ;;  %v9428_v20 = vld [vmem:[#allocation14 + $0x2e8] sm:$0xf] }
 0x2d0   :  { %5776 = vmatpush.bf16.msra.mxu0 %v9089_v35  ;;  %v4761_v35 = vadd.f32 %v11401_v29, %v4748_v21  ;;  %v9345_v29 = vor.u32 %v10562_v57, %v9342_v43  ;;  %v9502_v57 = vld [vmem:[#allocation14 + $0x390] sm:$0xf0]  ;;  %v9076_v43 = vld [vmem:[#allocation14 + $0x28] sm:$0xf]  ;;  %v9285_v27 = vor.u32 %v10549_v55, %v9284_v36  ;;  %v10495_v14 = vld [vmem:[#allocation14 + $0x2c] sm:$0xf] }
 0x2d1   :  { %5789 = vmatpush.bf16.msra.mxu1 %v9217_v0 }
 0x2d2   :  { %v4774_v53 = vadd.f32 %v4773_v51, %v4761_v35  ;;  %5801 = vmatpush.bf16.msra.mxu2 %v9361_v52  ;;  %v9300_v35 = vld [vmem:[#allocation14 + $0x1e8] sm:$0xf]  ;;  %v10501_v52 = vld [vmem:[#allocation14 + $0x54] sm:$0xf0] }
 0x2d3   :  { %5762 = vmatpush.bf16.msrb.mxu3 %v9485_v49  ;;  %v9518_v49 = vld [vmem:[#allocation14 + $0x3b0] sm:$0xf0] }
 0x2d4   :  { %5777 = vmatpush.bf16.msra.mxu0 %v9073_v37  ;;  %v4933_v37 = vmax.f32 %v4774_v53, 0.0  ;;  %v9521_v33 = vor.u32 %v10606_v31, %v9518_v49  ;;  %v9142_v49 = vld [vmem:[#allocation14 + $0xb8] sm:$0xf0] }
 0x2d5   :  { %5790 = vmatpush.bf16.msra.mxu1 %v9201_v32  ;;  %v9310_v32 = vld [vmem:[#allocation14 + $0x210] sm:$0xf0] }
 0x2d6   :  { %v11409_v61 = vpack.c.bf16 %v4933_v37, %v4933_v37  ;;  %5802 = vmatpush.bf16.msra.mxu2 %v9345_v29  ;;  %v9313_v1 = vor.u32 %v10554_v6, %v9310_v32  ;;  %v10594_v6 = vld [vmem:[#allocation14 + $0x344] sm:$0xf] }
 0x2d7   :  { %5763 = vmatpush.bf16.msrb.mxu3 %v9469_v23  ;;  %v4775_v0 = vpop.f32.mrf.mxu3  ;;  %v9505_v23 = vor.u32 %v10602_v8, %v9502_v57  ;;  %v9412_v57 = vld [vmem:[#allocation14 + $0x2c8] sm:$0xf] }
 0x2d8   :  { %5778 = vmatpush.bf16.msra.mxu0 %v9057_v47  ;;  %v4786_v56 = vpop.f32.mrf.mxu0 }
 0x2d9   :  { %5791 = vmatpush.bf16.msra.mxu1 %v9185_v10  ;;  %v4799_v50 = vpop.f32.mrf.mxu1  ;;  %5727 = vmatmul.bf16.vlgmr.msrb.gmra.mxu0 %v11409_v61  ;;  %v4787_v7 = vadd.f32 %v4786_v56, %v4078_v38  ;;  %v10610_v10 = vld [vmem:[#allocation14 + $0x3c4] sm:$0xf]  ;;  %v10553_v56 = vld [vmem:[#allocation14 + $0x1f4] sm:$0xf0] }
 0x2da   :  { %5803 = vmatpush.bf16.msra.mxu2 %v9329_v3  ;;  %v9537_v16 = vor.u32 %v10610_v10, %v9534_v12  ;;  %v9301_v53 = vor.u32 %v10553_v56, %v9300_v35  ;;  %v9252_v3 = vld [vmem:[#allocation14 + $0x188] sm:$0xf]  ;;  %v9454_v10 = vld [vmem:[#allocation14 + $0x330] sm:$0xf0]  ;;  %v10511_v56 = vld [vmem:[#allocation14 + $0xac] sm:$0xf] }
 0x2db   :  { %5764 = vmatpush.bf16.msrb.mxu3 %v9453_v62  ;;  %v4800_v11 = vadd.f32 %v4799_v50, %v4787_v7  ;;  %v9092_v50 = vld [vmem:[#allocation14 + $0x48] sm:$0xf]  ;;  %v9470_v7 = vld [vmem:[#allocation14 + $0x350] sm:$0xf0]  ;;  %v9145_v36 = vor.u32 %v10511_v56, %v9142_v49  ;;  %v10565_v56 = vld [vmem:[#allocation14 + $0x254] sm:$0xf0] }
 0x2dc   :  { %5823 = vmatpush.bf16.msrb.mxu0 %v9173_v42  ;;  %v9093_v37 = vor.u32 %v10501_v52, %v9092_v50  ;;  %v10497_v42 = vld [vmem:[#allocation14 + $0x34] sm:$0xf0]  ;;  %v9473_v32 = vor.u32 %v10594_v6, %v9470_v7  ;;  %v9220_v35 = vld [vmem:[#allocation14 + $0x148] sm:$0xf]  ;;  %v9438_v50 = vld [vmem:[#allocation14 + $0x310] sm:$0xf0] }
 0x2dd   :  { %v9077_v38 = vor.u32 %v10497_v42, %v9076_v43  ;;  %v10581_v42 = vld [vmem:[#allocation14 + $0x2d4] sm:$0xf0]  ;;  %v9094_v6 = vld [vmem:[#allocation14 + $0x58] sm:$0xf0] }
 0x2de   :  { %5804 = vmatpush.bf16.msra.mxu2 %v9313_v1  ;;  %v9253_v1 = vor.u32 %v10541_v63, %v9252_v3  ;;  %v9302_v3 = vld [vmem:[#allocation14 + $0x1f8] sm:$0xf0]  ;;  %v10499_v63 = vld [vmem:[#allocation14 + $0x4c] sm:$0xf] }
 0x2df   :  { %5765 = vmatpush.bf16.msrb.mxu3 %v9437_v2  ;;  %v9061_v2 = vor.u32 %v10493_v45, %v9060_v46  ;;  %v9110_v46 = vld [vmem:[#allocation14 + $0x78] sm:$0xf0]  ;;  %v10577_v45 = vld [vmem:[#allocation14 + $0x2b4] sm:$0xf0] }
 0x2e0   :  { %v4812_v59 = vpop.f32.mrf.mxu2  ;;  %v4788_v13 = vpop.f32.mrf.mxu0  ;;  %5824 = vmatpush.bf16.msrb.mxu0 %v9157_v48 }
 0x2e1   :  { %v4801_v47 = vpop.f32.mrf.mxu1  ;;  %v4813_v17 = vadd.f32 %v4812_v59, %v4800_v11  ;;  %v4825_v21 = vpop.f32.mrf.mxu3  ;;  %v9268_v59 = vld [vmem:[#allocation14 + $0x1a8] sm:$0xf]  ;;  %v9486_v13 = vld [vmem:[#allocation14 + $0x370] sm:$0xf0] }
 0x2e2   :  { %v9489_v47 = vor.u32 %v10598_v39, %v9486_v13  ;;  %v9269_v48 = vor.u32 %v10545_v60, %v9268_v59  ;;  %v9413_v39 = vor.u32 %v10581_v42, %v9412_v57  ;;  %v9396_v13 = vld [vmem:[#allocation14 + $0x2a8] sm:$0xf] }
 0x2e3   :  { %5810 = vmatpush.bf16.msra.mxu3 %v9553_v58  ;;  %v4826_v24 = vadd.f32 %v4825_v21, %v4813_v17  ;;  %v10537_v58 = vld [vmem:[#allocation14 + $0x174] sm:$0xf0] }
 0x2e4   :  { %5825 = vmatpush.bf16.msrb.mxu0 %v9141_v44  ;;  %v9177_v44 = vor.u32 %v10519_v4, %v9174_v5  ;;  %v10585_v21 = vld [vmem:[#allocation14 + $0x2f4] sm:$0xf0]  ;;  %v9397_v5 = vor.u32 %v10577_v45, %v9396_v13  ;;  %v10531_v45 = vld [vmem:[#allocation14 + $0x14c] sm:$0xf] }
 0x2e5   :  { %v4934_v51 = vmax.f32 %v4826_v24, 0.0  ;;  %v9237_v24 = vor.u32 %v10537_v58, %v9236_v25  ;;  %v9429_v55 = vor.u32 %v10585_v21, %v9428_v20  ;;  %v9097_v25 = vor.u32 %v10499_v63, %v9094_v6  ;;  %v10491_v20 = vld [vmem:[#allocation14 + $0xc] sm:$0xf]  ;;  %v9062_v21 = vld [vmem:[#allocation14 + $0x18] sm:$0xf0] }
 0x2e6   :  { %v10617_v13 = vld [vmem:[#allocation14 + $0x3f4] sm:$0xf0] }
 0x2e7   :  { %5811 = vmatpush.bf16.msra.mxu3 %v9537_v16  ;;  %v11413_v54 = vpack.c.bf16 %v4934_v51, %v4934_v51  ;;  %v10586_v51 = vld [vmem:[#allocation14 + $0x304] sm:$0xf]  ;;  %v10613_v6 = vld [vmem:[#allocation14 + $0x3d4] sm:$0xf0] }
 0x2e8   :  { %v4814_v22 = vpop.f32.mrf.mxu2  ;;  %5826 = vmatpush.bf16.msrb.mxu0 %v9125_v15  ;;  %v9441_v52 = vor.u32 %v10586_v51, %v9438_v50 }
 0x2e9   :  { %5779 = vmatmul.bf16.vlgmr.msra.gmra.mxu0 %v11409_v61  ;;  %5740 = vmatmul.bf16.vlgmr.msrb.gmra.mxu1 %v11413_v54  ;;  %v4827_v29 = vpop.f32.mrf.mxu3  ;;  %v10590_v22 = vld [vmem:[#allocation14 + $0x324] sm:$0xf] }
 0x2ea   :  { %5836 = vmatpush.bf16.msrb.mxu1 %v9301_v53  ;;  %v9457_v12 = vor.u32 %v10590_v22, %v9454_v10  ;;  %v9204_v29 = vld [vmem:[#allocation14 + $0x128] sm:$0xf]  ;;  %v10569_v10 = vld [vmem:[#allocation14 + $0x274] sm:$0xf0] }
 0x2eb   :  { %5812 = vmatpush.bf16.msra.mxu3 %v9521_v33  ;;  %v10533_v33 = vld [vmem:[#allocation14 + $0x154] sm:$0xf0]  ;;  %v9364_v22 = vld [vmem:[#allocation14 + $0x268] sm:$0xf] }
 0x2ec   :  { %5827 = vmatpush.bf16.msrb.mxu0 %v9109_v34  ;;  %v9221_v8 = vor.u32 %v10533_v33, %v9220_v35  ;;  %v9348_v35 = vld [vmem:[#allocation14 + $0x248] sm:$0xf]  ;;  %v9254_v33 = vld [vmem:[#allocation14 + $0x198] sm:$0xf0] }
 0x2ed   :  { %v9349_v51 = vor.u32 %v10565_v56, %v9348_v35  ;;  %v9492_v56 = vld [vmem:[#allocation14 + $0x368] sm:$0xf] }
 0x2ee   :  { %5837 = vmatpush.bf16.msrb.mxu1 %v9285_v27 }
 0x2ef   :  { %5813 = vmatpush.bf16.msra.mxu3 %v9505_v23  ;;  %v9126_v23 = vld [vmem:[#allocation14 + $0x98] sm:$0xf0] }
 0x2f0   :  { %5828 = vmatpush.bf16.msrb.mxu0 %v9093_v37  ;;  %v10507_v37 = vld [vmem:[#allocation14 + $0x8c] sm:$0xf] }
 0x2f1   :  { %v9129_v60 = vor.u32 %v10507_v37, %v9126_v23 }
 0x2f2   :  { %5838 = vmatpush.bf16.msrb.mxu1 %v9269_v48  ;;  %v10551_v48 = vld [vmem:[#allocation14 + $0x1ec] sm:$0xf] }
 0x2f3   :  { %5814 = vmatpush.bf16.msra.mxu3 %v9489_v47  ;;  %v9188_v47 = vld [vmem:[#allocation14 + $0x108] sm:$0xf]  ;;  %v9305_v7 = vor.u32 %v10551_v48, %v9302_v3 }
 0x2f4   :  { %5829 = vmatpush.bf16.msrb.mxu0 %v9077_v38 }
 0x2f6   :  { %5839 = vmatpush.bf16.msrb.mxu1 %v9253_v1  ;;  %v9286_v1 = vld [vmem:[#allocation14 + $0x1d8] sm:$0xf0] }
 0x2f7   :  { %5815 = vmatpush.bf16.msra.mxu3 %v9473_v32  ;;  %v10573_v32 = vld [vmem:[#allocation14 + $0x294] sm:$0xf0] }
 0x2f8   :  { %v4838_v62 = vpop.f32.mrf.mxu0  ;;  %5830 = vmatpush.bf16.msrb.mxu0 %v9061_v2  ;;  %v9380_v2 = vld [vmem:[#allocation14 + $0x288] sm:$0xf] }
 0x2f9   :  { %v4851_v0 = vpop.f32.mrf.mxu1  ;;  %v4839_v26 = vadd.f32 %v4838_v62, %v4079_v28  ;;  %5792 = vmatmul.bf16.vlgmr.msra.gmra.mxu1 %v11413_v54  ;;  %v10529_v28 = vld [vmem:[#allocation14 + $0x134] sm:$0xf0]  ;;  %v10503_v62 = vld [vmem:[#allocation14 + $0x6c] sm:$0xf]  ;;  %v9381_v19 = vor.u32 %v10573_v32, %v9380_v2  ;;  %v9414_v2 = vld [vmem:[#allocation14 + $0x2d8] sm:$0xf0] }
 0x2fa   :  { %5840 = vmatpush.bf16.msrb.mxu1 %v9237_v24  ;;  %v9205_v38 = vor.u32 %v10529_v28, %v9204_v29  ;;  %v9113_v4 = vor.u32 %v10503_v62, %v9110_v46  ;;  %v10583_v62 = vld [vmem:[#allocation14 + $0x2ec] sm:$0xf]  ;;  %v9430_v46 = vld [vmem:[#allocation14 + $0x2f8] sm:$0xf0] }
 0x2fb   :  { %v4852_v9 = vadd.f32 %v4851_v0, %v4839_v26  ;;  %5831 = vmatmul.bf16.vlgmr.msrb.gmra.mxu0 %v11409_v61  ;;  %5816 = vmatpush.bf16.msra.mxu3 %v9457_v12  ;;  %v10525_v0 = vld [vmem:[#allocation14 + $0x114] sm:$0xf0]  ;;  %v10543_v12 = vld [vmem:[#allocation14 + $0x1ac] sm:$0xf] }
 0x2fc   :  { %5875 = vmatpush.bf16.msra.mxu0 %v9177_v44  ;;  %v9189_v26 = vor.u32 %v10525_v0, %v9188_v47  ;;  %v10547_v44 = vld [vmem:[#allocation14 + $0x1cc] sm:$0xf]  ;;  %v9222_v47 = vld [vmem:[#allocation14 + $0x158] sm:$0xf0] }
 0x2fd   :  { %v9289_v58 = vor.u32 %v10547_v44, %v9286_v1  ;;  %v9225_v63 = vor.u32 %v10531_v45, %v9222_v47  ;;  %v9206_v44 = vld [vmem:[#allocation14 + $0x138] sm:$0xf0]  ;;  %v10611_v45 = vld [vmem:[#allocation14 + $0x3cc] sm:$0xf] }
 0x2fe   :  { %5841 = vmatpush.bf16.msrb.mxu1 %v9221_v8  ;;  %v9238_v8 = vld [vmem:[#allocation14 + $0x178] sm:$0xf0] }
 0x2ff   :  { %5817 = vmatpush.bf16.msra.mxu3 %v9441_v52  ;;  %v9332_v52 = vld [vmem:[#allocation14 + $0x228] sm:$0xf]  ;;  %v9542_v47 = vld [vmem:[#allocation14 + $0x3d8] sm:$0xf0] }
 0x300   :  { %v4864_v11 = vpop.f32.mrf.mxu2  ;;  %v4840_v17 = vpop.f32.mrf.mxu0  ;;  %5876 = vmatpush.bf16.msra.mxu0 %v9161_v30  ;;  %v9365_v30 = vor.u32 %v10569_v10, %v9364_v22  ;;  %v10575_v22 = vld [vmem:[#allocation14 + $0x2ac] sm:$0xf]  ;;  %v9398_v10 = vld [vmem:[#allocation14 + $0x2b8] sm:$0xf0] }
 0x301   :  { %v4865_v15 = vadd.f32 %v4864_v11, %v4852_v9  ;;  %v4877_v16 = vpop.f32.mrf.mxu3  ;;  %v4853_v31 = vpop.f32.mrf.mxu1  ;;  %v9078_v9 = vld [vmem:[#allocation14 + $0x38] sm:$0xf0]  ;;  %v4080_v11 = vperm.slane %v11403_v18, 3  ;;  %v9065_v18 = vor.u32 %v10491_v20, %v9062_v21  ;;  %v10605_v20 = vld [vmem:[#allocation14 + $0x394] sm:$0xf0] }
 0x302   :  { %5842 = vmatpush.bf16.msrb.mxu1 %v9205_v38  ;;  %v10571_v21 = vld [vmem:[#allocation14 + $0x28c] sm:$0xf] }
 0x303   :  { %v4878_v34 = vadd.f32 %v4877_v16, %v4865_v15  ;;  %v9270_v15 = vld [vmem:[#allocation14 + $0x1b8] sm:$0xf0]  ;;  %v9081_v16 = vor.u32 %v10495_v14, %v9078_v9  ;;  %v9524_v14 = vld [vmem:[#allocation14 + $0x3a8] sm:$0xf] }
 0x304   :  { %5877 = vmatpush.bf16.msra.mxu0 %v9145_v36  ;;  %v9273_v24 = vor.u32 %v10543_v12, %v9270_v15  ;;  %v9190_v12 = vld [vmem:[#allocation14 + $0x118] sm:$0xf0] }
 0x305   :  { %v4935_v53 = vmax.f32 %v4878_v34, 0.0  ;;  %v10539_v34 = vld [vmem:[#allocation14 + $0x18c] sm:$0xf] }
 0x306   :  { %5843 = vmatpush.bf16.msrb.mxu1 %v9189_v26  ;;  %v9257_v50 = vor.u32 %v10539_v34, %v9254_v33  ;;  %v10567_v34 = vld [vmem:[#allocation14 + $0x26c] sm:$0xf]  ;;  %v9366_v33 = vld [vmem:[#allocation14 + $0x278] sm:$0xf0] }
 0x307   :  { %v11420_v43 = vpack.c.bf16 %v4935_v53, %v4935_v53  ;;  %v10561_v53 = vld [vmem:[#allocation14 + $0x234] sm:$0xf0] }
 0x308   :  { %v4866_v27 = vpop.f32.mrf.mxu2  ;;  %5878 = vmatpush.bf16.msra.mxu0 %v9129_v60  ;;  %v9333_v29 = vor.u32 %v10561_v53, %v9332_v52  ;;  %v10557_v60 = vld [vmem:[#allocation14 + $0x214] sm:$0xf0]  ;;  %v10563_v53 = vld [vmem:[#allocation14 + $0x24c] sm:$0xf] }
 0x309   :  { %v4879_v59 = vpop.f32.mrf.mxu3  ;;  %5753 = vmatmul.bf16.vlgmr.msrb.gmra.mxu2 %v11420_v43  ;;  %5844 = vmatmul.bf16.vlgmr.msrb.gmra.mxu1 %v11413_v54  ;;  %v10597_v52 = vld [vmem:[#allocation14 + $0x354] sm:$0xf0] }
 0x30a   :  { %5849 = vmatpush.bf16.msrb.mxu2 %v9429_v55  ;;  %5888 = vmatpush.bf16.msra.mxu1 %v9305_v7  ;;  %v10535_v55 = vld [vmem:[#allocation14 + $0x16c] sm:$0xf]  ;;  %v9316_v59 = vld [vmem:[#allocation14 + $0x208] sm:$0xf] }
 0x30b   :  { %v9241_v27 = vor.u32 %v10535_v55, %v9238_v8  ;;  %v9317_v48 = vor.u32 %v10557_v60, %v9316_v59  ;;  %v10579_v7 = vld [vmem:[#allocation14 + $0x2cc] sm:$0xf]  ;;  %v10589_v59 = vld [vmem:[#allocation14 + $0x314] sm:$0xf0]  ;;  %v9318_v60 = vld [vmem:[#allocation14 + $0x218] sm:$0xf0] }
 0x30c   :  { %5879 = vmatpush.bf16.msra.mxu0 %v9113_v4  ;;  %v9433_v4 = vor.u32 %v10583_v62, %v9430_v46 }
 0x30e   :  { %5850 = vmatpush.bf16.msrb.mxu2 %v9413_v39  ;;  %5889 = vmatpush.bf16.msra.mxu1 %v9289_v58  ;;  %v9556_v39 = vld [vmem:[#allocation14 + $0x3e8] sm:$0xf]  ;;  %v10609_v58 = vld [vmem:[#allocation14 + $0x3b4] sm:$0xf0] }
 0x30f   :  { %v9557_v3 = vor.u32 %v10617_v13, %v9556_v39  ;;  %v9525_v15 = vor.u32 %v10609_v58, %v9524_v14  ;;  %v10615_v39 = vld [vmem:[#allocation14 + $0x3ec] sm:$0xf] }
 0x310   :  { %5880 = vmatpush.bf16.msra.mxu0 %v9097_v25  ;;  %v10587_v14 = vld [vmem:[#allocation14 + $0x30c] sm:$0xf] }
 0x312   :  { %5851 = vmatpush.bf16.msrb.mxu2 %v9397_v5  ;;  %5890 = vmatpush.bf16.msra.mxu1 %v9273_v24  ;;  %v9540_v5 = vld [vmem:[#allocation14 + $0x3c8] sm:$0xf] }
 0x313   :  { %v9541_v25 = vor.u32 %v10613_v6, %v9540_v5  ;;  %v10603_v5 = vld [vmem:[#allocation14 + $0x38c] sm:$0xf] }
 0x314   :  { %5881 = vmatpush.bf16.msra.mxu0 %v9081_v16  ;;  %v9401_v16 = vor.u32 %v10575_v22, %v9398_v10  ;;  %v9620_v10 = vld [vmem:[#allocation17 + $0x70] sm:$0xf] }
 0x316   :  { %5852 = vmatpush.bf16.msrb.mxu2 %v9381_v19  ;;  %5891 = vmatpush.bf16.msra.mxu1 %v9257_v50  ;;  %v9417_v19 = vor.u32 %v10579_v7, %v9414_v2  ;;  %v9476_v50 = vld [vmem:[#allocation14 + $0x348] sm:$0xf]  ;;  %v10599_v7 = vld [vmem:[#allocation14 + $0x36c] sm:$0xf]  ;;  %v9494_v2 = vld [vmem:[#allocation14 + $0x378] sm:$0xf0] }
 0x317   :  { %v9477_v55 = vor.u32 %v10597_v52, %v9476_v50  ;;  %v10649_v50 = vld [vmem:[#allocation17 + $0xf4] sm:$0xf0] }
 0x318   :  { %v4890_v17 = vpop.f32.mrf.mxu0  ;;  %5882 = vmatpush.bf16.msra.mxu0 %v9065_v18 }
 0x319   :  { %v4903_v31 = vpop.f32.mrf.mxu1  ;;  %v4891_v49 = vadd.f32 %v4890_v17, %v4080_v11  ;;  %5805 = vmatmul.bf16.vlgmr.msra.gmra.mxu2 %v11420_v43  ;;  %v10523_v11 = vld [vmem:[#allocation14 + $0x10c] sm:$0xf]  ;;  %v9508_v17 = vld [vmem:[#allocation14 + $0x388] sm:$0xf] }
 0x31a   :  { %5853 = vmatpush.bf16.msrb.mxu2 %v9365_v30  ;;  %5892 = vmatpush.bf16.msra.mxu1 %v9241_v27  ;;  %v9193_v30 = vor.u32 %v10523_v11, %v9190_v12  ;;  %v9509_v24 = vor.u32 %v10605_v20, %v9508_v17  ;;  %v9444_v27 = vld [vmem:[#allocation14 + $0x308] sm:$0xf]  ;;  %v10633_v11 = vld [vmem:[#allocation17 + $0x74] sm:$0xf0]  ;;  %v9604_v20 = vld [vmem:[#allocation17 + $0x50] sm:$0xf] }
 0x31b   :  { %v4904_v36 = vadd.f32 %v4903_v31, %v4891_v49  ;;  %5883 = vmatmul.bf16.vlgmr.msra.gmra.mxu0 %v11409_v61  ;;  %v10527_v61 = vld [vmem:[#allocation14 + $0x12c] sm:$0xf]  ;;  %v9382_v31 = vld [vmem:[#allocation14 + $0x298] sm:$0xf0]  ;;  %v10601_v49 = vld [vmem:[#allocation14 + $0x374] sm:$0xf0]  ;;  %v9445_v13 = vor.u32 %v10589_v59, %v9444_v27  ;;  %v9621_v12 = vor.u32 %v10633_v11, %v9620_v10 }
 0x31c   :  { %v9209_v9 = vor.u32 %v10527_v61, %v9206_v44  ;;  %v9385_v35 = vor.u32 %v10571_v21, %v9382_v31  ;;  %v9493_v18 = vor.u32 %v10601_v49, %v9492_v56  ;;  %v10595_v61 = vld [vmem:[#allocation14 + $0x34c] sm:$0xf]  ;;  %v9478_v44 = vld [vmem:[#allocation14 + $0x358] sm:$0xf0]  ;;  %v9668_v27 = vld [vmem:[#allocation17 + $0xd0] sm:$0xf] }
 0x31d   :  { %6319 = vmatpush.bf16.msrb.mxu0 %v9621_v12  ;;  %v10629_v21 = vld [vmem:[#allocation17 + $0x54] sm:$0xf0]  ;;  %v10628_v10 = vld [vmem:[#allocation17 + $0x54] sm:$0xf]  ;;  %v9606_v11 = vld [vmem:[#allocation17 + $0x58] sm:$0xf0] }
 0x31e   :  { %5854 = vmatpush.bf16.msrb.mxu2 %v9349_v51  ;;  %5893 = vmatpush.bf16.msra.mxu1 %v9225_v63  ;;  %v9369_v51 = vor.u32 %v10567_v34, %v9366_v33  ;;  %v9510_v63 = vld [vmem:[#allocation14 + $0x398] sm:$0xf0]  ;;  %v9605_v31 = vor.u32 %v10629_v21, %v9604_v20  ;;  %v9732_v20 = vld [vmem:[#allocation17 + $0x150] sm:$0xf] }
 0x31f   :  { %v9513_v6 = vor.u32 %v10603_v5, %v9510_v63  ;;  %v10625_v33 = vld [vmem:[#allocation17 + $0x34] sm:$0xf0]  ;;  %v9652_v5 = vld [vmem:[#allocation17 + $0xb0] sm:$0xf] }
 0x320   :  { %v4916_v57 = vpop.f32.mrf.mxu2  ;;  %v4892_v42 = vpop.f32.mrf.mxu0  ;;  %v10641_v63 = vld [vmem:[#allocation17 + $0xb4] sm:$0xf0] }
 0x321   :  { %v4917_v37 = vadd.f32 %v4916_v57, %v4904_v36  ;;  %v4929_v23 = vpop.f32.mrf.mxu3  ;;  %v4905_v28 = vpop.f32.mrf.mxu1  ;;  %v9350_v36 = vld [vmem:[#allocation14 + $0x258] sm:$0xf0]  ;;  %v9460_v57 = vld [vmem:[#allocation14 + $0x328] sm:$0xf] }
 0x322   :  { %5855 = vmatpush.bf16.msrb.mxu2 %v9333_v29  ;;  %5894 = vmatpush.bf16.msra.mxu1 %v9209_v9  ;;  %v9353_v8 = vor.u32 %v10563_v53, %v9350_v36  ;;  %v9334_v42 = vld [vmem:[#allocation14 + $0x238] sm:$0xf0]  ;;  %v9580_v53 = vld [vmem:[#allocation17 + $0x20] sm:$0xf]  ;;  %v10623_v36 = vld [vmem:[#allocation17 + $0x24] sm:$0xf0] }
 0x323   :  { %v4930_v38 = vadd.f32 %v4929_v23, %v4917_v37  ;;  %v10593_v37 = vld [vmem:[#allocation14 + $0x334] sm:$0xf0]  ;;  %v10559_v23 = vld [vmem:[#allocation14 + $0x22c] sm:$0xf]  ;;  %v9446_v9 = vld [vmem:[#allocation14 + $0x318] sm:$0xf0] }
 0x324   :  { %v9461_v29 = vor.u32 %v10593_v37, %v9460_v57  ;;  %v9337_v28 = vor.u32 %v10559_v23, %v9334_v42  ;;  %v9449_v58 = vor.u32 %v10587_v14, %v9446_v9  ;;  %v10647_v57 = vld [vmem:[#allocation17 + $0xe4] sm:$0xf0] }
 0x325   :  { %v4936_v0 = vmax.f32 %v4930_v38, 0.0  ;;  %v9558_v38 = vld [vmem:[#allocation14 + $0x3f8] sm:$0xf0]  ;;  %v10663_v9 = vld [vmem:[#allocation17 + $0x164] sm:$0xf0] }
 0x326   :  { %5856 = vmatpush.bf16.msrb.mxu2 %v9317_v48  ;;  %5895 = vmatpush.bf16.msra.mxu1 %v9193_v30  ;;  %v9561_v46 = vor.u32 %v10615_v39, %v9558_v38  ;;  %v10607_v48 = vld [vmem:[#allocation14 + $0x3ac] sm:$0xf]  ;;  %v9564_v39 = vld [vmem:[#allocation17] sm:$0xf] }
 0x327   :  { %v11427_v26 = vpack.c.bf16 %v4936_v0, %v4936_v0  ;;  %v9545_v0 = vor.u32 %v10611_v45, %v9542_v47  ;;  %v10619_v38 = vld [vmem:[#allocation17 + $0x4] sm:$0xf0]  ;;  %v10632_v45 = vld [vmem:[#allocation17 + $0x74] sm:$0xf]  ;;  %v9622_v47 = vld [vmem:[#allocation17 + $0x78] sm:$0xf0] }
 0x328   :  { %v4918_v32 = vpop.f32.mrf.mxu2 }
 0x329   :  { %v4931_v1 = vpop.f32.mrf.mxu3  ;;  %5766 = vmatmul.bf16.vlgmr.msrb.gmra.mxu3 %v11427_v26  ;;  %5857 = vmatmul.bf16.vlgmr.msrb.gmra.mxu2 %v11420_v43  ;;  %v9497_v32 = vor.u32 %v10599_v7, %v9494_v2  ;;  %v9653_v7 = vor.u32 %v10641_v63, %v9652_v5  ;;  %v10665_v2 = vld [vmem:[#allocation17 + $0x174] sm:$0xf0]  ;;  %v9574_v5 = vld [vmem:[#allocation17 + $0x18] sm:$0xf0]  ;;  %v10644_v63 = vld [vmem:[#allocation17 + $0xd4] sm:$0xf] }
 0x32a   :  { %5862 = vmatpush.bf16.msrb.mxu3 %v9557_v3  ;;  %5901 = vmatpush.bf16.msra.mxu2 %v9433_v4  ;;  %v9526_v3 = vld [vmem:[#allocation14 + $0x3b8] sm:$0xf0]  ;;  %v9481_v1 = vor.u32 %v10595_v61, %v9478_v44  ;;  %v9614_v61 = vld [vmem:[#allocation17 + $0x68] sm:$0xf0] }
 0x32b   :  { %5896 = vmatmul.bf16.vlgmr.msra.gmra.mxu1 %v11413_v54  ;;  %v10555_v54 = vld [vmem:[#allocation14 + $0x20c] sm:$0xf]  ;;  %v9529_v4 = vor.u32 %v10607_v48, %v9526_v3  ;;  %v9625_v3 = vor.u32 %v10632_v45, %v9622_v47  ;;  %v9708_v45 = vld [vmem:[#allocation17 + $0x120] sm:$0xf] }
 0x32c   :  { %v9321_v62 = vor.u32 %v10555_v54, %v9318_v60  ;;  %v10645_v54 = vld [vmem:[#allocation17 + $0xd4] sm:$0xf0]  ;;  %v10655_v47 = vld [vmem:[#allocation17 + $0x124] sm:$0xf0] }
 0x32d   :  { %v9669_v60 = vor.u32 %v10645_v54, %v9668_v27  ;;  %v10657_v27 = vld [vmem:[#allocation17 + $0x134] sm:$0xf0]  ;;  %v10622_v54 = vld [vmem:[#allocation17 + $0x24] sm:$0xf] }
 0x32e   :  { %5863 = vmatpush.bf16.msrb.mxu3 %v9541_v25  ;;  %5902 = vmatpush.bf16.msra.mxu2 %v9417_v19  ;;  %v10591_v25 = vld [vmem:[#allocation14 + $0x32c] sm:$0xf]  ;;  %v9462_v19 = vld [vmem:[#allocation14 + $0x338] sm:$0xf0] }
 0x332   :  { %5864 = vmatpush.bf16.msrb.mxu3 %v9525_v15  ;;  %5903 = vmatpush.bf16.msra.mxu2 %v9401_v16  ;;  %v9612_v15 = vld [vmem:[#allocation17 + $0x60] sm:$0xf]  ;;  %v10631_v16 = vld [vmem:[#allocation17 + $0x64] sm:$0xf0] }
 0x333   :  { %v9613_v17 = vor.u32 %v10631_v16, %v9612_v15  ;;  %v9609_v15 = vor.u32 %v10628_v10, %v9606_v11  ;;  %v11452_v10 = vld [vmem:[#allocation16] sm:$0xf] }
 0x335   :  { %6320 = vmatpush.bf16.msrb.mxu0 %v9613_v17  ;;  %v9636_v17 = vld [vmem:[#allocation17 + $0x90] sm:$0xf] }
 0x336   :  { %5865 = vmatpush.bf16.msrb.mxu3 %v9509_v24  ;;  %5904 = vmatpush.bf16.msra.mxu2 %v9385_v35  ;;  %v9596_v24 = vld [vmem:[#allocation17 + $0x40] sm:$0xf]  ;;  %v10627_v35 = vld [vmem:[#allocation17 + $0x44] sm:$0xf0] }
 0x337   :  { %v9597_v56 = vor.u32 %v10627_v35, %v9596_v24  ;;  %v10626_v24 = vld [vmem:[#allocation17 + $0x44] sm:$0xf]  ;;  %v9598_v35 = vld [vmem:[#allocation17 + $0x48] sm:$0xf0] }
 0x339   :  { %5818 = vmatmul.bf16.vlgmr.msra.gmra.mxu3 %v11427_v26  ;;  %6321 = vmatpush.bf16.msrb.mxu0 %v9605_v31  ;;  %v10661_v31 = vld [vmem:[#allocation17 + $0x154] sm:$0xf0] }
 0x33a   :  { %5866 = vmatpush.bf16.msrb.mxu3 %v9493_v18  ;;  %5905 = vmatpush.bf16.msra.mxu2 %v9369_v51  ;;  %v9684_v18 = vld [vmem:[#allocation17 + $0xf0] sm:$0xf] }
 0x33b   :  { %v9685_v52 = vor.u32 %v10649_v50, %v9684_v18  ;;  %v9628_v18 = vld [vmem:[#allocation17 + $0x80] sm:$0xf] }
 0x33c   :  { %v9724_v50 = vld [vmem:[#allocation17 + $0x140] sm:$0xf] }
 0x33d   :  { %6322 = vmatpush.bf16.msrb.mxu0 %v9597_v56  ;;  %6332 = vmatpush.bf16.msrb.mxu1 %v9685_v52 }
 0x33e   :  { %5867 = vmatpush.bf16.msrb.mxu3 %v9477_v55  ;;  %5906 = vmatpush.bf16.msra.mxu2 %v9353_v8  ;;  %v9676_v55 = vld [vmem:[#allocation17 + $0xe0] sm:$0xf]  ;;  %v9581_v8 = vor.u32 %v10623_v36, %v9580_v53  ;;  %v10659_v53 = vld [vmem:[#allocation17 + $0x144] sm:$0xf0]  ;;  %v10624_v36 = vld [vmem:[#allocation17 + $0x34] sm:$0xf] }
 0x33f   :  { %v9677_v37 = vor.u32 %v10647_v57, %v9676_v55  ;;  %v9590_v55 = vld [vmem:[#allocation17 + $0x38] sm:$0xf0] }
 0x340   :  { %v9593_v57 = vor.u32 %v10624_v36, %v9590_v55  ;;  %v9646_v55 = vld [vmem:[#allocation17 + $0xa8] sm:$0xf0] }
 0x341   :  { %6333 = vmatpush.bf16.msrb.mxu1 %v9677_v37  ;;  %v10648_v37 = vld [vmem:[#allocation17 + $0xf4] sm:$0xf] }
 0x342   :  { %5868 = vmatpush.bf16.msrb.mxu3 %v9461_v29  ;;  %5907 = vmatpush.bf16.msra.mxu2 %v9337_v28  ;;  %v9572_v29 = vld [vmem:[#allocation17 + $0x10] sm:$0xf]  ;;  %v10621_v28 = vld [vmem:[#allocation17 + $0x14] sm:$0xf0] }
 0x343   :  { %v9573_v59 = vor.u32 %v10621_v28, %v9572_v29  ;;  %v9716_v28 = vld [vmem:[#allocation17 + $0x130] sm:$0xf] }
 0x345   :  { %6334 = vmatpush.bf16.msrb.mxu1 %v9669_v60  ;;  %v9582_v60 = vld [vmem:[#allocation17 + $0x28] sm:$0xf0] }
 0x346   :  { %5869 = vmatpush.bf16.msrb.mxu3 %v9445_v13  ;;  %5908 = vmatpush.bf16.msra.mxu2 %v9321_v62  ;;  %v9660_v13 = vld [vmem:[#allocation17 + $0xc0] sm:$0xf]  ;;  %v9565_v62 = vor.u32 %v10619_v38, %v9564_v39  ;;  %v10646_v39 = vld [vmem:[#allocation17 + $0xe4] sm:$0xf] }
 0x349   :  { %5909 = vmatmul.bf16.vlgmr.msra.gmra.mxu2 %v11420_v43  ;;  %5870 = vmatmul.bf16.vlgmr.msrb.gmra.mxu3 %v11427_v26  ;;  %v9465_v43 = vor.u32 %v10591_v25, %v9462_v19  ;;  %v9644_v25 = vld [vmem:[#allocation17 + $0xa0] sm:$0xf]  ;;  %v10639_v19 = vld [vmem:[#allocation17 + $0xa4] sm:$0xf0] }
 0x34a   :  { %5914 = vmatpush.bf16.msra.mxu3 %v9561_v46  ;;  %v10643_v46 = vld [vmem:[#allocation17 + $0xc4] sm:$0xf0]  ;;  %v9645_v14 = vor.u32 %v10639_v19, %v9644_v25  ;;  %v10618_v25 = vld [vmem:[#allocation17 + $0x4] sm:$0xf]  ;;  %v9566_v19 = vld [vmem:[#allocation17 + $0x8] sm:$0xf0] }
 0x34b   :  { %v9661_v48 = vor.u32 %v10643_v46, %v9660_v13  ;;  %v9585_v13 = vor.u32 %v10622_v54, %v9582_v60  ;;  %v9796_v54 = vld [vmem:[#allocation17 + $0x1d0] sm:$0xf]  ;;  %v10677_v60 = vld [vmem:[#allocation17 + $0x1d4] sm:$0xf0] }
 0x34d   :  { %6335 = vmatpush.bf16.msrb.mxu1 %v9661_v48  ;;  %v9709_v48 = vor.u32 %v10655_v47, %v9708_v45  ;;  %v9734_v47 = vld [vmem:[#allocation17 + $0x158] sm:$0xf0] }
 0x34e   :  { %5915 = vmatpush.bf16.msra.mxu3 %v9545_v0 }
 0x351   :  { %6336 = vmatpush.bf16.msrb.mxu1 %v9653_v7  ;;  %v9670_v7 = vld [vmem:[#allocation17 + $0xd8] sm:$0xf0] }
 0x352   :  { %5916 = vmatpush.bf16.msra.mxu3 %v9529_v4 }
 0x355   :  { %6337 = vmatpush.bf16.msrb.mxu1 %v9645_v14 }
 0x356   :  { %5917 = vmatpush.bf16.msra.mxu3 %v9513_v6  ;;  %v11435_v22 = vpop.f32.mrf.mxu0  ;;  %v9748_v6 = vld [vmem:[#allocation17 + $0x170] sm:$0xf] }
 0x357   :  { %v9749_v44 = vor.u32 %v10665_v2, %v9748_v6  ;;  %v9673_v2 = vor.u32 %v10644_v63, %v9670_v7  ;;  %v10675_v63 = vld [vmem:[#allocation17 + $0x1c4] sm:$0xf0]  ;;  %v9630_v7 = vld [vmem:[#allocation17 + $0x88] sm:$0xf0] }
 0x359   :  { %6345 = vmatpush.bf16.msrb.mxu2 %v9749_v44  ;;  %v10653_v44 = vld [vmem:[#allocation17 + $0x114] sm:$0xf0] }
 0x35a   :  { %5918 = vmatpush.bf16.msra.mxu3 %v9497_v32  ;;  %v10630_v32 = vld [vmem:[#allocation17 + $0x64] sm:$0xf] }
 0x35e   :  { %5919 = vmatpush.bf16.msra.mxu3 %v9481_v1  ;;  %v5730_v30 = vpop.f32.mrf.mxu0  ;;  %v9617_v1 = vor.u32 %v10630_v32, %v9614_v61  ;;  %v9700_v61 = vld [vmem:[#allocation17 + $0x110] sm:$0xf] }
 0x35f   :  { %v10637_v30 = vld [vmem:[#allocation17 + $0x94] sm:$0xf0] }
 0x360   :  { %v9637_v21 = vor.u32 %v10637_v30, %v9636_v17  ;;  %v9812_v17 = vld [vmem:[#allocation17 + $0x1f0] sm:$0xf] }
 0x362   :  { %5920 = vmatpush.bf16.msra.mxu3 %v9465_v43  ;;  %v9740_v43 = vld [vmem:[#allocation17 + $0x160] sm:$0xf]  ;;  %6338 = vmatpush.bf16.msrb.mxu1 %v9637_v21  ;;  %v10640_v21 = vld [vmem:[#allocation17 + $0xb4] sm:$0xf] }
 0x366   :  { %5921 = vmatpush.bf16.msra.mxu3 %v9449_v58  ;;  %v11438_v49 = vpop.f32.mrf.mxu0  ;;  %v11440_v34 = vpop.f32.mrf.mxu1  ;;  %v9741_v58 = vor.u32 %v10663_v9, %v9740_v43  ;;  %v10642_v43 = vld [vmem:[#allocation17 + $0xc4] sm:$0xf]  ;;  %v9569_v9 = vor.u32 %v10618_v25, %v9566_v19  ;;  %v9780_v19 = vld [vmem:[#allocation17 + $0x1b0] sm:$0xf] }
 0x368   :  { %6346 = vmatpush.bf16.msrb.mxu2 %v9741_v58  ;;  %v9662_v58 = vld [vmem:[#allocation17 + $0xc8] sm:$0xf0] }
 0x369   :  { %5922 = vmatmul.bf16.vlgmr.msra.gmra.mxu3 %v11427_v26  ;;  %v9588_v26 = vld [vmem:[#allocation17 + $0x30] sm:$0xf] }
 0x36a   :  { %v9589_v51 = vor.u32 %v10625_v33, %v9588_v26  ;;  %v9733_v26 = vor.u32 %v10661_v31, %v9732_v20  ;;  %v9601_v33 = vor.u32 %v10626_v24, %v9598_v35  ;;  %v10681_v20 = vld [vmem:[#allocation17 + $0x1f4] sm:$0xf0]  ;;  %v9654_v31 = vld [vmem:[#allocation17 + $0xb8] sm:$0xf0]  ;;  %v5071_v24 = vperm.slane %v11452_v10, 0 }
 0x36b   :  { %v9813_v35 = vor.u32 %v10681_v20, %v9812_v17  ;;  %v9772_v20 = vld [vmem:[#allocation17 + $0x1a0] sm:$0xf] }
 0x36c   :  { %6323 = vmatpush.bf16.msrb.mxu0 %v9589_v51  ;;  %6347 = vmatpush.bf16.msrb.mxu2 %v9733_v26  ;;  %v10635_v51 = vld [vmem:[#allocation17 + $0x84] sm:$0xf0]  ;;  %v9657_v26 = vor.u32 %v10640_v21, %v9654_v31  ;;  %v10654_v31 = vld [vmem:[#allocation17 + $0x124] sm:$0xf] }
 0x36d   :  { %v9629_v52 = vor.u32 %v10635_v51, %v9628_v18  ;;  %v9750_v18 = vld [vmem:[#allocation17 + $0x178] sm:$0xf0]  ;;  %6358 = vmatpush.bf16.msrb.mxu3 %v9813_v35  ;;  %v10671_v21 = vld [vmem:[#allocation17 + $0x1a4] sm:$0xf0]  ;;  %v9710_v35 = vld [vmem:[#allocation17 + $0x128] sm:$0xf0] }
 0x36e   :  { %v5782_v23 = vpop.f32.mrf.mxu0  ;;  %v5743_v42 = vpop.f32.mrf.mxu1 }
 0x36f   :  { %v9686_v23 = vld [vmem:[#allocation17 + $0xf8] sm:$0xf0]  ;;  %6339 = vmatpush.bf16.msrb.mxu1 %v9629_v52  ;;  %v10679_v52 = vld [vmem:[#allocation17 + $0x1e4] sm:$0xf0] }
 0x370   :  { %6324 = vmatpush.bf16.msrb.mxu0 %v9581_v8  ;;  %v9725_v8 = vor.u32 %v10659_v53, %v9724_v50  ;;  %v9689_v42 = vor.u32 %v10648_v37, %v9686_v23  ;;  %v9804_v50 = vld [vmem:[#allocation17 + $0x1e0] sm:$0xf]  ;;  %v10638_v53 = vld [vmem:[#allocation17 + $0xa4] sm:$0xf] }
 0x371   :  { %v9805_v36 = vor.u32 %v10679_v52, %v9804_v50  ;;  %v9649_v37 = vor.u32 %v10638_v53, %v9646_v55  ;;  %v10652_v52 = vld [vmem:[#allocation17 + $0x114] sm:$0xf]  ;;  %v9702_v53 = vld [vmem:[#allocation17 + $0x118] sm:$0xf0] }
 0x372   :  { %6348 = vmatpush.bf16.msrb.mxu2 %v9725_v8  ;;  %v10662_v8 = vld [vmem:[#allocation17 + $0x164] sm:$0xf] }
 0x373   :  { %6384 = vmatpush.bf16.msra.mxu1 %v9689_v42  ;;  %v5729_v42 = vadd.f32 %v11435_v22, %v5071_v24  ;;  %6359 = vmatpush.bf16.msrb.mxu3 %v9805_v36  ;;  %v9773_v24 = vor.u32 %v10671_v21, %v9772_v20  ;;  %v10666_v21 = vld [vmem:[#allocation17 + $0x184] sm:$0xf] }
 0x374   :  { %6325 = vmatpush.bf16.msrb.mxu0 %v9573_v59  ;;  %v9717_v59 = vor.u32 %v10657_v27, %v9716_v28 }
 0x376   :  { %v11444_v4 = vpop.f32.mrf.mxu1  ;;  %6349 = vmatpush.bf16.msrb.mxu2 %v9717_v59  ;;  %v5742_v59 = vadd.f32 %v11440_v34, %v5729_v42 }
 0x378   :  { %v11442_v0 = vpop.f32.mrf.mxu0  ;;  %6326 = vmatpush.bf16.msrb.mxu0 %v9565_v62  ;;  %v9678_v62 = vld [vmem:[#allocation17 + $0xe8] sm:$0xf0] }
 0x379   :  { %v9681_v46 = vor.u32 %v10646_v39, %v9678_v62  ;;  %v9797_v39 = vor.u32 %v10677_v60, %v9796_v54  ;;  %v10660_v62 = vld [vmem:[#allocation17 + $0x154] sm:$0xf] }
 0x37a   :  { %6350 = vmatpush.bf16.msrb.mxu2 %v9709_v48 }
 0x37b   :  { %6385 = vmatpush.bf16.msra.mxu1 %v9681_v46  ;;  %6360 = vmatpush.bf16.msrb.mxu3 %v9797_v39 }
 0x37c   :  { %6371 = vmatpush.bf16.msra.mxu0 %v9625_v3  ;;  %v10620_v3 = vld [vmem:[#allocation17 + $0x14] sm:$0xf] }
 0x37d   :  { %v9577_v6 = vor.u32 %v10620_v3, %v9574_v5  ;;  %v9737_v3 = vor.u32 %v10660_v62, %v9734_v47  ;;  %v9788_v5 = vld [vmem:[#allocation17 + $0x1c0] sm:$0xf] }
 0x37e   :  { %v5795_v16 = vpop.f32.mrf.mxu1  ;;  %v9789_v34 = vor.u32 %v10675_v63, %v9788_v5 }
 0x37f   :  { %6386 = vmatpush.bf16.msra.mxu1 %v9673_v2  ;;  %v10651_v16 = vld [vmem:[#allocation17 + $0x104] sm:$0xf0]  ;;  %v10658_v2 = vld [vmem:[#allocation17 + $0x144] sm:$0xf] }
 0x380   :  { %6372 = vmatpush.bf16.msra.mxu0 %v9617_v1  ;;  %v5834_v12 = vpop.f32.mrf.mxu0  ;;  %v9701_v1 = vor.u32 %v10653_v44, %v9700_v61  ;;  %6361 = vmatpush.bf16.msrb.mxu3 %v9789_v34 }
 0x381   :  { %v9665_v12 = vor.u32 %v10642_v43, %v9662_v58  ;;  %v10673_v43 = vld [vmem:[#allocation17 + $0x1b4] sm:$0xf0]  ;;  %v10656_v58 = vld [vmem:[#allocation17 + $0x134] sm:$0xf] }
 0x382   :  { %6351 = vmatpush.bf16.msrb.mxu2 %v9701_v1  ;;  %v9726_v1 = vld [vmem:[#allocation17 + $0x148] sm:$0xf0] }
 0x383   :  { %6387 = vmatpush.bf16.msra.mxu1 %v9665_v12  ;;  %v9718_v12 = vld [vmem:[#allocation17 + $0x138] sm:$0xf0] }
 0x384   :  { %6373 = vmatpush.bf16.msra.mxu0 %v9609_v15  ;;  %v9692_v15 = vld [vmem:[#allocation17 + $0x100] sm:$0xf] }
 0x385   :  { %v9693_v30 = vor.u32 %v10651_v16, %v9692_v15  ;;  %v5072_v15 = vperm.slane %v11452_v10, 1  ;;  %v9721_v16 = vor.u32 %v10656_v58, %v9718_v12  ;;  %v10670_v12 = vld [vmem:[#allocation17 + $0x1a4] sm:$0xf] }
 0x386   :  { %v11448_v29 = vpop.f32.mrf.mxu1 }
 0x387   :  { %6352 = vmatpush.bf16.msrb.mxu2 %v9693_v30  ;;  %6388 = vmatpush.bf16.msra.mxu1 %v9657_v26  ;;  %v9713_v26 = vor.u32 %v10654_v31, %v9710_v35  ;;  %v9758_v31 = vld [vmem:[#allocation17 + $0x188] sm:$0xf0]  ;;  %v5074_v35 = vperm.slane %v11452_v10, 3 }
 0x388   :  { %6374 = vmatpush.bf16.msra.mxu0 %v9601_v33  ;;  %v10664_v33 = vld [vmem:[#allocation17 + $0x174] sm:$0xf] }
 0x389   :  { %v9753_v51 = vor.u32 %v10664_v33, %v9750_v18  ;;  %v9764_v33 = vld [vmem:[#allocation17 + $0x190] sm:$0xf]  ;;  %v10669_v18 = vld [vmem:[#allocation17 + $0x194] sm:$0xf0] }
 0x38a   :  { %v9765_v55 = vor.u32 %v10669_v18, %v9764_v33 }
 0x38b   :  { %6397 = vmatpush.bf16.msra.mxu2 %v9753_v51  ;;  %6389 = vmatpush.bf16.msra.mxu1 %v9649_v37  ;;  %v5781_v51 = vadd.f32 %v11438_v49, %v5072_v15  ;;  %v10667_v37 = vld [vmem:[#allocation17 + $0x184] sm:$0xf0] }
 0x38c   :  { %v11446_v56 = vpop.f32.mrf.mxu2  ;;  %6375 = vmatpush.bf16.msra.mxu0 %v9593_v57  ;;  %v9742_v57 = vld [vmem:[#allocation17 + $0x168] sm:$0xf0] }
 0x38d   :  { %v9745_v23 = vor.u32 %v10662_v8, %v9742_v57  ;;  %v5755_v46 = vadd.f32 %v11446_v56, %v5742_v59  ;;  %v9729_v56 = vor.u32 %v10658_v2, %v9726_v1  ;;  %v5794_v36 = vadd.f32 %v11444_v4, %v5781_v51  ;;  %v9756_v57 = vld [vmem:[#allocation17 + $0x180] sm:$0xf]  ;;  %v9814_v59 = vld [vmem:[#allocation17 + $0x1f8] sm:$0xf0] }
 0x38e   :  { %v5847_v32 = vpop.f32.mrf.mxu1  ;;  %v9705_v8 = vor.u32 %v10652_v52, %v9702_v53  ;;  %v9757_v39 = vor.u32 %v10667_v37, %v9756_v57  ;;  %v10689_v57 = vld [vmem:[#allocation20 + $0x38] sm:$0xff]  ;;  %v10688_v37 = vld [vmem:[#allocation20 + $0x30] sm:$0xff] }
 0x38f   :  { %6398 = vmatpush.bf16.msra.mxu2 %v9745_v23  ;;  %v10650_v23 = vld [vmem:[#allocation17 + $0x104] sm:$0xf] }
 0x390   :  { %6376 = vmatpush.bf16.msra.mxu0 %v9585_v13  ;;  %v9638_v13 = vld [vmem:[#allocation17 + $0x98] sm:$0xf0] }
 0x393   :  { %6399 = vmatpush.bf16.msra.mxu2 %v9737_v3  ;;  %v10676_v3 = vld [vmem:[#allocation17 + $0x1d4] sm:$0xf] }
 0x394   :  { %v5756_v38 = vpop.f32.mrf.mxu2  ;;  %6377 = vmatpush.bf16.msra.mxu0 %v9577_v6  ;;  %v10634_v6 = vld [vmem:[#allocation17 + $0x84] sm:$0xf] }
 0x395   :  { %v10636_v38 = vld [vmem:[#allocation17 + $0x94] sm:$0xf]  ;;  %v9633_v44 = vor.u32 %v10634_v6, %v9630_v7  ;;  %v10674_v6 = vld [vmem:[#allocation17 + $0x1c4] sm:$0xf]  ;;  %v9790_v7 = vld [vmem:[#allocation17 + $0x1c8] sm:$0xf0] }
 0x396   :  { %v9641_v45 = vor.u32 %v10636_v38, %v9638_v13 }
 0x397   :  { %6400 = vmatpush.bf16.msra.mxu2 %v9729_v56 }
 0x398   :  { %v11454_v11 = vpop.f32.mrf.mxu0  ;;  %6378 = vmatpush.bf16.msra.mxu0 %v9569_v9  ;;  %6390 = vmatpush.bf16.msra.mxu1 %v9641_v45  ;;  %v9781_v9 = vor.u32 %v10673_v43, %v9780_v19  ;;  %v9806_v45 = vld [vmem:[#allocation17 + $0x1e8] sm:$0xf0]  ;;  %v9782_v19 = vld [vmem:[#allocation17 + $0x1b8] sm:$0xf0] }
 0x39a   :  { %6362 = vmatpush.bf16.msrb.mxu3 %v9781_v9 }
 0x39b   :  { %6401 = vmatpush.bf16.msra.mxu2 %v9721_v16  ;;  %v9766_v16 = vld [vmem:[#allocation17 + $0x198] sm:$0xf0] }
 0x39c   :  { %v11450_v14 = vpop.f32.mrf.mxu2  ;;  %6391 = vmatpush.bf16.msra.mxu1 %v9633_v44 }
 0x39d   :  { %v5807_v42 = vadd.f32 %v11450_v14, %v5794_v36  ;;  %v5073_v14 = vperm.slane %v11452_v10, 2 }
 0x39e   :  { %6363 = vmatpush.bf16.msrb.mxu3 %v9773_v24  ;;  %v9761_v24 = vor.u32 %v10666_v21, %v9758_v31 }
 0x39f   :  { %6402 = vmatpush.bf16.msra.mxu2 %v9713_v26  ;;  %v5833_v5 = vadd.f32 %v11442_v0, %v5073_v14  ;;  %v9774_v0 = vld [vmem:[#allocation17 + $0x1a8] sm:$0xf0]  ;;  %v5885_v26 = vadd.f32 %v11454_v11, %v5074_v35  ;;  %v10686_v11 = vld [vmem:[#allocation20 + $0x20] sm:$0xff]  ;;  %v10692_v14 = vld [vmem:[#allocation20 + $0x50] sm:$0xff] }
 0x3a0   :  { %v5886_v27 = vpop.f32.mrf.mxu0  ;;  %v9777_v15 = vor.u32 %v10670_v12, %v9774_v0 }
 0x3a1   :  { %v10680_v27 = vld [vmem:[#allocation17 + $0x1f4] sm:$0xf]  ;;  %v5846_v34 = vadd.f32 %v11448_v29, %v5833_v5 }
 0x3a2   :  { %6364 = vmatpush.bf16.msrb.mxu3 %v9765_v55  ;;  %v9817_v4 = vor.u32 %v10680_v27, %v9814_v59  ;;  %v10668_v29 = vld [vmem:[#allocation17 + $0x194] sm:$0xf]  ;;  %v10685_v59 = vld [vmem:[#allocation20 + $0x18] sm:$0xff] }
 0x3a3   :  { %6403 = vmatpush.bf16.msra.mxu2 %v9705_v8  ;;  %v9769_v20 = vor.u32 %v10668_v29, %v9766_v16  ;;  %v10727_v5 = vld [vmem:[#allocation10] sm:$0x3f] }
 0x3a4   :  { %v5808_v28 = vpop.f32.mrf.mxu2 }
 0x3a5   :  { %v9694_v28 = vld [vmem:[#allocation17 + $0x108] sm:$0xf0] }
 0x3a6   :  { %v9697_v38 = vor.u32 %v10650_v23, %v9694_v28  ;;  %6365 = vmatpush.bf16.msrb.mxu3 %v9757_v39  ;;  %v10683_v39 = vld [vmem:[#allocation20 + $0x8] sm:$0xff] }
 0x3a8   :  { %v11463_v17 = vpop.f32.mrf.mxu1  ;;  %6404 = vmatpush.bf16.msra.mxu2 %v9697_v38  ;;  %v10695_v38 = vld [vmem:[#allocation20 + $0x68] sm:$0xff] }
 0x3a9   :  { %v5898_v33 = vadd.f32 %v11463_v17, %v5885_v26  ;;  %v10697_v17 = vld [vmem:[#allocation20 + $0x78] sm:$0xff] }
 0x3aa   :  { %6410 = vmatpush.bf16.msra.mxu3 %v9817_v4 }
 0x3ac   :  { %v5767_v48 = vpop.f32.mrf.mxu3  ;;  %v11460_v61 = vpop.f32.mrf.mxu2 }
 0x3ad   :  { %v5768_v22 = vadd.f32 %v5767_v48, %v5755_v46  ;;  %v10678_v46 = vld [vmem:[#allocation17 + $0x1e4] sm:$0xf]  ;;  %v5859_v2 = vadd.f32 %v11460_v61, %v5846_v34 }
 0x3ae   :  { %v9809_v47 = vor.u32 %v10678_v46, %v9806_v45  ;;  %v10693_v45 = vld [vmem:[#allocation20 + $0x58] sm:$0xff] }
 0x3af   :  { %v5927_v32 = vmax.f32 %v5768_v22, 0.0  ;;  %v9798_v22 = vld [vmem:[#allocation17 + $0x1d8] sm:$0xf0] }
 0x3b0   :  { %v5899_v54 = vpop.f32.mrf.mxu1  ;;  %6411 = vmatpush.bf16.msra.mxu3 %v9809_v47  ;;  %v9801_v63 = vor.u32 %v10676_v3, %v9798_v22  ;;  %v10690_v22 = vld [vmem:[#allocation20 + $0x40] sm:$0xff] }
 0x3b1   :  { %v5931_v25 = vpack.c.bf16 %v5927_v32, %v5927_v32  ;;  %v9793_v32 = vor.u32 %v10674_v6, %v9790_v7  ;;  %v10684_v54 = vld [vmem:[#allocation20 + $0x10] sm:$0xff] }
 0x3b3   :  { %6327 = vmatmul.bf16.vlgmr.msrb.gmra.mxu0 %v5931_v25 }
 0x3b4   :  { %v5769_v30 = vpop.f32.mrf.mxu3  ;;  %v5860_v50 = vpop.f32.mrf.mxu2  ;;  %6412 = vmatpush.bf16.msra.mxu3 %v9801_v63  ;;  %6567 = vmatpush.bf16.msrb.mxu0 %v10689_v57  ;;  %v3925_v63 = vperm.slane %v10727_v5, 4 }
 0x3b6   :  { %v3937_v34 = vadd.f32 %v3925_v63, %v11385_v40 }
 0x3b8   :  { %6413 = vmatpush.bf16.msra.mxu3 %v9793_v32  ;;  %6568 = vmatpush.bf16.msrb.mxu0 %v10688_v37 }
 0x3bc   :  { %v5819_v60 = vpop.f32.mrf.mxu3 }
 0x3bd   :  { %v5820_v49 = vadd.f32 %v5819_v60, %v5807_v42  ;;  %v10687_v42 = vld [vmem:[#allocation20 + $0x28] sm:$0xff]  ;;  %v10696_v60 = vld [vmem:[#allocation20 + $0x70] sm:$0xff] }
 0x3be   :  { %6569 = vmatpush.bf16.msrb.mxu0 %v10687_v42 }
 0x3bf   :  { %v5928_v13 = vmax.f32 %v5820_v49, 0.0 }
 0x3c1   :  { %v5932_v62 = vpack.c.bf16 %v5928_v13, %v5928_v13  ;;  %v10682_v13 = vld [vmem:[#allocation20] sm:$0xff] }
 0x3c2   :  { %6570 = vmatpush.bf16.msrb.mxu0 %v10686_v11 }
 0x3c3   :  { %6340 = vmatmul.bf16.vlgmr.msrb.gmra.mxu1 %v5932_v62  ;;  %6379 = vmatmul.bf16.vlgmr.msra.gmra.mxu0 %v5931_v25  ;;  %v10672_v25 = vld [vmem:[#allocation17 + $0x1b4] sm:$0xf] }
 0x3c4   :  { %v5821_v48 = vpop.f32.mrf.mxu3  ;;  %v9785_v9 = vor.u32 %v10672_v25, %v9782_v19  ;;  %6580 = vmatpush.bf16.msrb.mxu1 %v10697_v17 }
 0x3c5   :  { %v10691_v48 = vld [vmem:[#allocation20 + $0x48] sm:$0xff] }
 0x3c6   :  { %6414 = vmatpush.bf16.msra.mxu3 %v9785_v9  ;;  %6571 = vmatpush.bf16.msrb.mxu0 %v10685_v59 }
 0x3c8   :  { %6581 = vmatpush.bf16.msrb.mxu1 %v10696_v60 }
 0x3ca   :  { %6415 = vmatpush.bf16.msra.mxu3 %v9777_v15  ;;  %6572 = vmatpush.bf16.msrb.mxu0 %v10684_v54 }
 0x3cc   :  { %v5910_v44 = vpop.f32.mrf.mxu2  ;;  %v5871_v1 = vpop.f32.mrf.mxu3  ;;  %6582 = vmatpush.bf16.msrb.mxu1 %v10695_v38 }
 0x3cd   :  { %v5872_v56 = vadd.f32 %v5871_v1, %v5859_v2  ;;  %v5911_v18 = vadd.f32 %v5910_v44, %v5898_v33  ;;  %v6423_v2 = vld [vmem:[#allocation19] sm:$0x3]  ;;  %v10720_v33 = vld [vmem:[#allocation22] ss:$0 sm:$0xff] }
 0x3ce   :  { %6416 = vmatpush.bf16.msra.mxu3 %v9769_v20  ;;  %6573 = vmatpush.bf16.msrb.mxu0 %v10683_v39  ;;  %v6425_v1 = vperm.slane %v6423_v2, 0  ;;  %v6426_v40 = vperm.slane %v6423_v2, 1 }
 0x3cf   :  { %v5929_v43 = vmax.f32 %v5872_v56, 0.0 }
 0x3d1   :  { %v5933_v58 = vpack.c.bf16 %v5929_v43, %v5929_v43  ;;  %v3926_v43 = vperm.slane %v10727_v5, 5 }
 0x3d2   :  { %6417 = vmatpush.bf16.msra.mxu3 %v9761_v24  ;;  %6574 = vmatpush.bf16.msrb.mxu0 %v10682_v13 }
 0x3d3   :  { %6353 = vmatmul.bf16.vlgmr.msrb.gmra.mxu2 %v5933_v58  ;;  %6392 = vmatmul.bf16.vlgmr.msra.gmra.mxu1 %v5932_v62  ;;  %v10694_v62 = vld [vmem:[#allocation20 + $0x60] sm:$0xff]  ;;  %v3938_v0 = vadd.f32 %v3926_v43, %v11395_v41 }
 0x3d4   :  { %v5912_v30 = vpop.f32.mrf.mxu2  ;;  %v5873_v61 = vpop.f32.mrf.mxu3  ;;  %6583 = vmatpush.bf16.msrb.mxu1 %v10694_v62 }
 0x3d8   :  { %6584 = vmatpush.bf16.msrb.mxu1 %v10693_v45 }
 0x3dc   :  { %6585 = vmatpush.bf16.msrb.mxu1 %v10692_v14 }
 0x3e0   :  { %6586 = vmatpush.bf16.msrb.mxu1 %v10691_v48 }
 0x3e3   :  { %6405 = vmatmul.bf16.vlgmr.msra.gmra.mxu2 %v5933_v58 }
 0x3e4   :  { %6587 = vmatpush.bf16.msrb.mxu1 %v10690_v22 }
 0x3ec   :  { %v5923_v51 = vpop.f32.mrf.mxu3 }
 0x3ed   :  { %v5924_v50 = vadd.f32 %v5923_v51, %v5911_v18 }
 0x3ef   :  { %v5930_v52 = vmax.f32 %v5924_v50, 0.0 }
 0x3f1   :  { %v5934_v53 = vpack.c.bf16 %v5930_v52, %v5930_v52 }
 0x3f3   :  { %6366 = vmatmul.bf16.vlgmr.msrb.gmra.mxu3 %v5934_v53 }
 0x3f4   :  { %v5925_v36 = vpop.f32.mrf.mxu3 }
 0x403   :  { %6418 = vmatmul.bf16.vlgmr.msra.gmra.mxu3 %v5934_v53 }
 0x430   :  { %v6328_v55 = vpop.f32.mrf.mxu0 }
 0x431   :  { %v6329_v6 = vadd.f32 %v6328_v55, %v3937_v34 }
 0x438   :  { %v6330_v8 = vpop.f32.mrf.mxu0 }
 0x440   :  { %v6341_v23 = vpop.f32.mrf.mxu1  ;;  %v6380_v10 = vpop.f32.mrf.mxu0 }
 0x441   :  { %v6342_v32 = vadd.f32 %v6341_v23, %v6329_v6  ;;  %v6381_v15 = vadd.f32 %v6380_v10, %v3938_v0 }
 0x448   :  { %v6343_v28 = vpop.f32.mrf.mxu1  ;;  %v6382_v27 = vpop.f32.mrf.mxu0 }
 0x450   :  { %v6393_v49 = vpop.f32.mrf.mxu1 }
 0x451   :  { %v6394_v29 = vadd.f32 %v6393_v49, %v6381_v15 }
 0x456   :  { %v6354_v4 = vpop.f32.mrf.mxu2 }
 0x457   :  { %v6355_v44 = vadd.f32 %v6354_v4, %v6342_v32 }
 0x458   :  { %v6395_v46 = vpop.f32.mrf.mxu1 }
 0x45e   :  { %v6356_v47 = vpop.f32.mrf.mxu2 }
 0x466   :  { %v6406_v3 = vpop.f32.mrf.mxu2 }
 0x467   :  { %v6407_v16 = vadd.f32 %v6406_v3, %v6394_v29 }
 0x46e   :  { %v6408_v7 = vpop.f32.mrf.mxu2 }
 0x476   :  { %v6367_v56 = vpop.f32.mrf.mxu3 }
 0x477   :  { %v6368_v25 = vadd.f32 %v6367_v56, %v6355_v44 }
 0x479   :  { %v6429_v19 = vadd.f32 %v6425_v1, %v6368_v25 }
 0x47b   :  { %v6431_v9 = vmax.f32 %v6429_v19, 0.0 }
 0x47d   :  { %v6433_v58 = vpack.c.bf16 %v6431_v9, %v6431_v9 }
 0x47e   :  { %v6369_v12 = vpop.f32.mrf.mxu3 }
 0x47f   :  { %6575 = vmatmul.bf16.vlgmr.msrb.gmra.mxu0 %v6433_v58 }
 0x486   :  { %v6419_v30 = vpop.f32.mrf.mxu3 }
 0x487   :  { %v6420_v61 = vadd.f32 %v6419_v30, %v6407_v16 }
 0x489   :  { %v6430_v20 = vadd.f32 %v6426_v40, %v6420_v61 }
 0x48b   :  { %v6432_v21 = vmax.f32 %v6430_v20, 0.0 }
 0x48d   :  { %v6434_v31 = vpack.c.bf16 %v6432_v21, %v6432_v21 }
 0x48e   :  { %v6421_v24 = vpop.f32.mrf.mxu3 }
 0x48f   :  { %6588 = vmatmul.bf16.vlgmr.msrb.gmra.mxu1 %v6434_v31 }
 0x4fc   :  { %v6576_v35 = vpop.f32.mrf.mxu0 }
 0x4fd   :  { %v6577_v18 = vadd.f32 %v10720_v33, %v6576_v35 }
 0x504   :  { %v6578_v26 = vpop.f32.mrf.mxu0 }
 0x50c   :  { %v6589_v51 = vpop.f32.mrf.mxu1 }
 0x50d   :  { %v6590_v41 = vadd.f32 %v6589_v51, %v6577_v18 }
 0x50f   :  { %v6593_v50 = vpack.c.bf16 %v6590_v41, %v6590_v41 }
 0x511   :  { %6594 = vst [vmem:[#allocation23] sm:$0x1] %v6593_v50 }
 0x512   :  { %6605 = dma.vmem_to_hbm [thread:$0]  %s6601_s12, 16, %s6603_s14, [#allocation4]  }
 0x514   :  { %v6591_v52 = vpop.f32.mrf.mxu1 }
 0x515   :  { %11078 = dma.done.wait [#allocation4], 16  }
 0x516   :  { %11079 = vsyncadd [#allocation4], 4294967280 }
 0x517   :  { %6610 = vsyncpa [#allocation3], 1 }
 0x518   :  { %6611 = vsyncpa [#allocation6], 1 }
 0x519   :  { %6612 = vsyncpa [#allocation9], 1 }
 0x51a   :  { %6613 = vsyncpa [#allocation12], 1 }
 0x51b   :  { %6614 = vsyncpa [#allocation15], 1 }
 0x51c   :  { %6615 = vsyncpa [#allocation18], 1 }
 0x51d   :  { %6616 = vsyncpa [#allocation21], 1 }
 0x51e   :  { %6617 = vsyncpa [#allocation4], 1 }

</bundles_post_ra>
